<compile_context>
chip_gen: v7x
topology: tpu7x:2x2x1
jax: 0.10.0
libtpu: 0.0.40
codegen_flags: <defaults>
</compile_context>

<pallas_src>
import jax
import jax.numpy as jnp
from jax import lax
from jax.experimental import pallas as pl
from jax.experimental.pallas import tpu as pltpu

# ----------------------------- config (mirrors the PyTorch config dict) -----
CONFIG = {"HIDDEN": 32, "FEATURE": 8, "NUM_LAYER": 2, "BIDIRECTIONAL": True}


# ----------------------------- fused Pallas kernel ---------------------------
def _make_fused_kernel(T, B, H, F, num_layers, bidirectional):
    num_dirs = 2 if bidirectional else 1

    def kernel(*refs):
        # ---- unpack refs: x, per-(layer,dir) (W_ih^T, W_hh^T, b), fc_w^T, fc_b, out
        x_ref = refs[0]
        pos = 1
        layers = []
        for _ in range(num_layers):
            dirs = []
            for _ in range(num_dirs):
                dirs.append((refs[pos], refs[pos + 1], refs[pos + 2]))
                pos += 3
            layers.append(dirs)
        fc_w_ref, fc_b_ref = refs[pos], refs[pos + 1]
        out_ref = refs[pos + 2]

        x = x_ref[...]                                    # (T*B, 1), time-major rows

        prev_seq = None                                   # per-dir (T*B, H) values
        h = None
        for l in range(num_layers):
            # ---- hoisted input projection: gates_x[d] has shape (T*B, 4H)
            gates_x = []
            whh = []
            for d in range(num_dirs):
                wih_ref, whh_ref, b_ref = layers[l][d]
                b = b_ref[...]                            # (1, 4H)
                if l == 0:
                    # Din == 1: broadcast multiply (VPU) instead of a K=1 MXU matmul
                    gx = x * wih_ref[...] + b             # (T*B,1)*(1,4H) -> (T*B,4H)
                else:
                    gx = b
                    for dd in range(num_dirs):
                        w_part = wih_ref[dd * H:(dd + 1) * H, :]       # (H, 4H)
                        gx = gx + jnp.dot(prev_seq[dd], w_part,
                                          preferred_element_type=jnp.float32)
                gates_x.append(gx)
                whh.append(whh_ref[...])                  # (H, 4H), hoisted load

            # ---- recurrence: fully unrolled, fwd & bwd interleaved per step
            h = [jnp.zeros((B, H), jnp.float32) for _ in range(num_dirs)]
            c = [jnp.zeros((B, H), jnp.float32) for _ in range(num_dirs)]
            out_seq = [[None] * T for _ in range(num_dirs)]
            for t in range(T):
                for d in range(num_dirs):
                    tt = t if d == 0 else T - 1 - t       # backward walks time reversed
                    gx_t = gates_x[d][tt * B:(tt + 1) * B, :]          # (B, 4H)
                    gates = gx_t + jnp.dot(h[d], whh[d],
                                           preferred_element_type=jnp.float32)
                    sig = jax.nn.sigmoid(gates)           # one full-width EUP pass
                    th = jnp.tanh(gates)                  # one full-width EUP pass
                    i_g = sig[:, 0 * H:1 * H]
                    f_g = sig[:, 1 * H:2 * H]
                    g_g = th[:, 2 * H:3 * H]
                    o_g = sig[:, 3 * H:4 * H]
                    c[d] = f_g * c[d] + i_g * g_g
                    h[d] = o_g * jnp.tanh(c[d])
                    out_seq[d][tt] = h[d]

            if l + 1 < num_layers:
                # this layer's hidden sequence becomes the next layer's input
                prev_seq = [jnp.concatenate(out_seq[d], axis=0)        # (T*B, H)
                            for d in range(num_dirs)]

        # ---- fused FC head on [h_fwd(T-1) | h_bwd(0)] (weight-split, no concat)
        out = jnp.dot(h[0], fc_w_ref[0:H, :],
                      preferred_element_type=jnp.float32) + fc_b_ref[...]
        if num_dirs == 2:
            out = out + jnp.dot(h[1], fc_w_ref[H:2 * H, :],
                                preferred_element_type=jnp.float32)
        out_ref[...] = out

    return kernel


# ----------------------------- wrapper ---------------------------------------
def plain_lstm_forward(x, lstm_params, fc_w_t, fc_b, hidden, bidirectional):
    """Matches PlainLSTM.forward: x (B, T) or (B, T, 1) -> (B, FEATURE)."""
    if x.ndim == 2:
        x = x[:, :, None]                                 # unsqueeze(2)
    B, T, Din = x.shape                                   # Din == 1
    x_tm = jnp.transpose(x, (1, 0, 2)).reshape(T * B, Din).astype(jnp.float32)

    num_dirs = 2 if bidirectional else 1
    flat_w = []
    for layer in lstm_params:
        for d in range(num_dirs):
            flat_w.extend(layer[d])

    F = fc_w_t.shape[1]
    kernel = _make_fused_kernel(T, B, hidden, F, len(lstm_params), bidirectional)
    n_in = 1 + len(flat_w) + 2
    return pl.pallas_call(
        kernel,
        out_shape=jax.ShapeDtypeStruct((B, F), jnp.float32),
        in_specs=[pl.BlockSpec(memory_space=pltpu.MemorySpace.VMEM)] * n_in,
        out_specs=pl.BlockSpec(memory_space=pltpu.MemorySpace.VMEM),
    )(x_tm, *flat_w, fc_w_t, fc_b)


# ----------------------------- pure-JAX reference ----------------------------
def _ref_lstm_layer(x_seq, wih_t, whh_t, b):
    T, B, _ = x_seq.shape
    H = whh_t.shape[0]

    def step(carry, x_t):
        h, c = carry
        gates = x_t @ wih_t + h @ whh_t + b
        i = jax.nn.sigmoid(gates[:, :H])
        f = jax.nn.sigmoid(gates[:, H:2 * H])
        g = jnp.tanh(gates[:, 2 * H:3 * H])
        o = jax.nn.sigmoid(gates[:, 3 * H:])
        c = f * c + i * g
        h = o * jnp.tanh(c)
        return (h, c), h

    init = (jnp.zeros((B, H), jnp.float32), jnp.zeros((B, H), jnp.float32))
    _, hs = lax.scan(step, init, x_seq)
    return hs


def ref_forward(x, lstm_params, fc_w_t, fc_b, hidden, bidirectional):
    if x.ndim == 2:
        x = x[:, :, None]
    seq = jnp.transpose(x, (1, 0, 2)).astype(jnp.float32)
    for layer in lstm_params:
        outs = [_ref_lstm_layer(seq, *layer[0])]
        if bidirectional:
            outs.append(_ref_lstm_layer(seq[::-1], *layer[1])[::-1])
        seq = jnp.concatenate(outs, axis=-1)
    out_f = seq[-1, :, :hidden]
    feats = (jnp.concatenate([out_f, seq[0, :, hidden:]], axis=1)
             if bidirectional else out_f)
    return feats @ fc_w_t + fc_b


# ----------------------------- parameter init --------------------------------
def init_params(key, hidden, feature, num_layers, bidirectional):
    num_dirs = 2 if bidirectional else 1
    bound = 1.0 / jnp.sqrt(jnp.float32(hidden))
    lstm_params = []
    for layer in range(num_layers):
        d_in = 1 if layer == 0 else hidden * num_dirs
        dirs = []
        for _ in range(num_dirs):
            key, k1, k2, k3, k4 = jax.random.split(key, 5)
            w_ih = jax.random.uniform(k1, (4 * hidden, d_in), jnp.float32, -bound, bound)
            w_hh = jax.random.uniform(k2, (4 * hidden, hidden), jnp.float32, -bound, bound)
            b_ih = jax.random.uniform(k3, (4 * hidden,), jnp.float32, -bound, bound)
            b_hh = jax.random.uniform(k4, (4 * hidden,), jnp.float32, -bound, bound)
            dirs.append((w_ih.T, w_hh.T, (b_ih + b_hh)[None, :]))
        lstm_params.append(dirs)
    key, k1, k2 = jax.random.split(key, 3)
    fc_in = hidden * num_dirs
    fb = 1.0 / jnp.sqrt(jnp.float32(fc_in))
    fc_w = jax.random.uniform(k1, (feature, fc_in), jnp.float32, -fb, fb)
    fc_b = jax.random.uniform(k2, (feature,), jnp.float32, -fb, fb)
    return lstm_params, fc_w.T, fc_b[None, :]


# ----------------------------- main -------------------------------------------
if __name__ == "__main__":
    B, T = 2, 8
    H, F = CONFIG["HIDDEN"], CONFIG["FEATURE"]
    NL, BI = CONFIG["NUM_LAYER"], CONFIG["BIDIRECTIONAL"]

    key = jax.random.PRNGKey(0)
    key, kx = jax.random.split(key)
    x = jax.random.normal(kx, (B, T), dtype=jnp.float32)   # 2-D input -> unsqueeze(2)

    lstm_params, fc_w_t, fc_b = init_params(key, H, F, NL, BI)

    fwd = jax.jit(plain_lstm_forward, static_argnums=(4, 5))
    out = jax.block_until_ready(fwd(x, lstm_params, fc_w_t, fc_b, H, BI))

    ref = jax.block_until_ready(ref_forward(x, lstm_params, fc_w_t, fc_b, H, BI))
    assert out.shape == (B, F), out.shape
    assert jnp.allclose(out, ref, rtol=1e-4, atol=1e-4), \
        f"mismatch: max err {jnp.max(jnp.abs(out - ref))}"

    print("KERNEL_OK")
</pallas_src>

<mosaic_0001>
module attributes {stable_mosaic.version = 11 : i64} {
  func.func @kernel(%arg0: memref<16x1xf32, #tpu.memory_space<vmem>>, %arg1: memref<1x128xf32, #tpu.memory_space<vmem>>, %arg2: memref<32x128xf32, #tpu.memory_space<vmem>>, %arg3: memref<1x128xf32, #tpu.memory_space<vmem>>, %arg4: memref<1x128xf32, #tpu.memory_space<vmem>>, %arg5: memref<32x128xf32, #tpu.memory_space<vmem>>, %arg6: memref<1x128xf32, #tpu.memory_space<vmem>>, %arg7: memref<64x128xf32, #tpu.memory_space<vmem>>, %arg8: memref<32x128xf32, #tpu.memory_space<vmem>>, %arg9: memref<1x128xf32, #tpu.memory_space<vmem>>, %arg10: memref<64x128xf32, #tpu.memory_space<vmem>>, %arg11: memref<32x128xf32, #tpu.memory_space<vmem>>, %arg12: memref<1x128xf32, #tpu.memory_space<vmem>>, %arg13: memref<64x8xf32, #tpu.memory_space<vmem>>, %arg14: memref<1x8xf32, #tpu.memory_space<vmem>>, %arg15: memref<2x8xf32, #tpu.memory_space<vmem>>) attributes {dimension_semantics = [], scalar_prefetch = 0 : i64, scratch_operands = 0 : i64, tpu.core_type = #tpu.core_type<tc>} {
    %c0 = arith.constant 0 : index
    %c0_0 = arith.constant 0 : index
    %0 = vector.load %arg0[%c0, %c0_0] : memref<16x1xf32, #tpu.memory_space<vmem>>, vector<16x1xf32>
    %c0_1 = arith.constant 0 : index
    %c0_2 = arith.constant 0 : index
    %1 = vector.load %arg3[%c0_1, %c0_2] : memref<1x128xf32, #tpu.memory_space<vmem>>, vector<1x128xf32>
    %c0_3 = arith.constant 0 : index
    %c0_4 = arith.constant 0 : index
    %2 = vector.load %arg1[%c0_3, %c0_4] : memref<1x128xf32, #tpu.memory_space<vmem>>, vector<1x128xf32>
    %3 = vector.broadcast %0 : vector<16x1xf32> to vector<16x128xf32>
    %4 = vector.broadcast %2 : vector<1x128xf32> to vector<16x128xf32>
    %5 = arith.mulf %3, %4 : vector<16x128xf32>
    %6 = vector.broadcast %1 : vector<1x128xf32> to vector<16x128xf32>
    %7 = arith.addf %5, %6 : vector<16x128xf32>
    %c0_5 = arith.constant 0 : index
    %c0_6 = arith.constant 0 : index
    %8 = vector.load %arg2[%c0_5, %c0_6] : memref<32x128xf32, #tpu.memory_space<vmem>>, vector<32x128xf32>
    %c0_7 = arith.constant 0 : index
    %c0_8 = arith.constant 0 : index
    %9 = vector.load %arg6[%c0_7, %c0_8] : memref<1x128xf32, #tpu.memory_space<vmem>>, vector<1x128xf32>
    %c0_9 = arith.constant 0 : index
    %c0_10 = arith.constant 0 : index
    %10 = vector.load %arg4[%c0_9, %c0_10] : memref<1x128xf32, #tpu.memory_space<vmem>>, vector<1x128xf32>
    %11 = vector.broadcast %0 : vector<16x1xf32> to vector<16x128xf32>
    %12 = vector.broadcast %10 : vector<1x128xf32> to vector<16x128xf32>
    %13 = arith.mulf %11, %12 : vector<16x128xf32>
    %14 = vector.broadcast %9 : vector<1x128xf32> to vector<16x128xf32>
    %15 = arith.addf %13, %14 : vector<16x128xf32>
    %c0_11 = arith.constant 0 : index
    %c0_12 = arith.constant 0 : index
    %16 = vector.load %arg5[%c0_11, %c0_12] : memref<32x128xf32, #tpu.memory_space<vmem>>, vector<32x128xf32>
    %cst = arith.constant 0.000000e+00 : f32
    %17 = vector.broadcast %cst : f32 to vector<2x32xf32>
    %cst_13 = arith.constant 0.000000e+00 : f32
    %18 = vector.broadcast %cst_13 : f32 to vector<2x32xf32>
    %cst_14 = arith.constant 0.000000e+00 : f32
    %19 = vector.broadcast %cst_14 : f32 to vector<2x32xf32>
    %cst_15 = arith.constant 0.000000e+00 : f32
    %20 = vector.broadcast %cst_15 : f32 to vector<2x32xf32>
    %21 = vector.extract_strided_slice %7 {offsets = [0, 0], sizes = [2, 128], strides = [1, 1]} : vector<16x128xf32> to vector<2x128xf32>
    %cst_16 = arith.constant dense<0.000000e+00> : vector<2x128xf32>
    %22 = tpu.matmul %17, %8, %cst_16 {dimension_numbers = #tpu.dot_dimension_numbers<[1], [0], [0], [1], [0, 0, 1, 1], [], []>} : vector<2x32xf32>, vector<32x128xf32>, vector<2x128xf32> -> vector<2x128xf32>
    %23 = arith.addf %21, %22 : vector<2x128xf32>
    %24 = arith.negf %23 : vector<2x128xf32>
    %25 = math.exp %24 : vector<2x128xf32>
    %cst_17 = arith.constant 1.000000e+00 : f32
    %26 = vector.broadcast %cst_17 : f32 to vector<2x128xf32>
    %27 = arith.addf %26, %25 : vector<2x128xf32>
    %28 = arith.divf %26, %27 : vector<2x128xf32>
    %29 = math.tanh %23 : vector<2x128xf32>
    %30 = vector.extract_strided_slice %28 {offsets = [0, 0], sizes = [2, 32], strides = [1, 1]} : vector<2x128xf32> to vector<2x32xf32>
    %31 = vector.extract_strided_slice %28 {offsets = [0, 32], sizes = [2, 32], strides = [1, 1]} : vector<2x128xf32> to vector<2x32xf32>
    %32 = vector.extract_strided_slice %29 {offsets = [0, 64], sizes = [2, 32], strides = [1, 1]} : vector<2x128xf32> to vector<2x32xf32>
    %33 = vector.extract_strided_slice %28 {offsets = [0, 96], sizes = [2, 32], strides = [1, 1]} : vector<2x128xf32> to vector<2x32xf32>
    %34 = arith.mulf %31, %19 : vector<2x32xf32>
    %35 = arith.mulf %30, %32 : vector<2x32xf32>
    %36 = arith.addf %34, %35 : vector<2x32xf32>
    %37 = math.tanh %36 : vector<2x32xf32>
    %38 = arith.mulf %33, %37 : vector<2x32xf32>
    %39 = vector.extract_strided_slice %15 {offsets = [14, 0], sizes = [2, 128], strides = [1, 1]} : vector<16x128xf32> to vector<2x128xf32>
    %cst_18 = arith.constant dense<0.000000e+00> : vector<2x128xf32>
    %40 = tpu.matmul %18, %16, %cst_18 {dimension_numbers = #tpu.dot_dimension_numbers<[1], [0], [0], [1], [0, 0, 1, 1], [], []>} : vector<2x32xf32>, vector<32x128xf32>, vector<2x128xf32> -> vector<2x128xf32>
    %41 = arith.addf %39, %40 : vector<2x128xf32>
    %42 = arith.negf %41 : vector<2x128xf32>
    %43 = math.exp %42 : vector<2x128xf32>
    %cst_19 = arith.constant 1.000000e+00 : f32
    %44 = vector.broadcast %cst_19 : f32 to vector<2x128xf32>
    %45 = arith.addf %44, %43 : vector<2x128xf32>
    %46 = arith.divf %44, %45 : vector<2x128xf32>
    %47 = math.tanh %41 : vector<2x128xf32>
    %48 = vector.extract_strided_slice %46 {offsets = [0, 0], sizes = [2, 32], strides = [1, 1]} : vector<2x128xf32> to vector<2x32xf32>
    %49 = vector.extract_strided_slice %46 {offsets = [0, 32], sizes = [2, 32], strides = [1, 1]} : vector<2x128xf32> to vector<2x32xf32>
    %50 = vector.extract_strided_slice %47 {offsets = [0, 64], sizes = [2, 32], strides = [1, 1]} : vector<2x128xf32> to vector<2x32xf32>
    %51 = vector.extract_strided_slice %46 {offsets = [0, 96], sizes = [2, 32], strides = [1, 1]} : vector<2x128xf32> to vector<2x32xf32>
    %52 = arith.mulf %49, %20 : vector<2x32xf32>
    %53 = arith.mulf %48, %50 : vector<2x32xf32>
    %54 = arith.addf %52, %53 : vector<2x32xf32>
    %55 = math.tanh %54 : vector<2x32xf32>
    %56 = arith.mulf %51, %55 : vector<2x32xf32>
    %57 = vector.extract_strided_slice %7 {offsets = [2, 0], sizes = [2, 128], strides = [1, 1]} : vector<16x128xf32> to vector<2x128xf32>
    %cst_20 = arith.constant dense<0.000000e+00> : vector<2x128xf32>
    %58 = tpu.matmul %38, %8, %cst_20 {dimension_numbers = #tpu.dot_dimension_numbers<[1], [0], [0], [1], [0, 0, 1, 1], [], []>} : vector<2x32xf32>, vector<32x128xf32>, vector<2x128xf32> -> vector<2x128xf32>
    %59 = arith.addf %57, %58 : vector<2x128xf32>
    %60 = arith.negf %59 : vector<2x128xf32>
    %61 = math.exp %60 : vector<2x128xf32>
    %cst_21 = arith.constant 1.000000e+00 : f32
    %62 = vector.broadcast %cst_21 : f32 to vector<2x128xf32>
    %63 = arith.addf %62, %61 : vector<2x128xf32>
    %64 = arith.divf %62, %63 : vector<2x128xf32>
    %65 = math.tanh %59 : vector<2x128xf32>
    %66 = vector.extract_strided_slice %64 {offsets = [0, 0], sizes = [2, 32], strides = [1, 1]} : vector<2x128xf32> to vector<2x32xf32>
    %67 = vector.extract_strided_slice %64 {offsets = [0, 32], sizes = [2, 32], strides = [1, 1]} : vector<2x128xf32> to vector<2x32xf32>
    %68 = vector.extract_strided_slice %65 {offsets = [0, 64], sizes = [2, 32], strides = [1, 1]} : vector<2x128xf32> to vector<2x32xf32>
    %69 = vector.extract_strided_slice %64 {offsets = [0, 96], sizes = [2, 32], strides = [1, 1]} : vector<2x128xf32> to vector<2x32xf32>
    %70 = arith.mulf %67, %36 : vector<2x32xf32>
    %71 = arith.mulf %66, %68 : vector<2x32xf32>
    %72 = arith.addf %70, %71 : vector<2x32xf32>
    %73 = math.tanh %72 : vector<2x32xf32>
    %74 = arith.mulf %69, %73 : vector<2x32xf32>
    %75 = vector.extract_strided_slice %15 {offsets = [12, 0], sizes = [2, 128], strides = [1, 1]} : vector<16x128xf32> to vector<2x128xf32>
    %cst_22 = arith.constant dense<0.000000e+00> : vector<2x128xf32>
    %76 = tpu.matmul %56, %16, %cst_22 {dimension_numbers = #tpu.dot_dimension_numbers<[1], [0], [0], [1], [0, 0, 1, 1], [], []>} : vector<2x32xf32>, vector<32x128xf32>, vector<2x128xf32> -> vector<2x128xf32>
    %77 = arith.addf %75, %76 : vector<2x128xf32>
    %78 = arith.negf %77 : vector<2x128xf32>
    %79 = math.exp %78 : vector<2x128xf32>
    %cst_23 = arith.constant 1.000000e+00 : f32
    %80 = vector.broadcast %cst_23 : f32 to vector<2x128xf32>
    %81 = arith.addf %80, %79 : vector<2x128xf32>
    %82 = arith.divf %80, %81 : vector<2x128xf32>
    %83 = math.tanh %77 : vector<2x128xf32>
    %84 = vector.extract_strided_slice %82 {offsets = [0, 0], sizes = [2, 32], strides = [1, 1]} : vector<2x128xf32> to vector<2x32xf32>
    %85 = vector.extract_strided_slice %82 {offsets = [0, 32], sizes = [2, 32], strides = [1, 1]} : vector<2x128xf32> to vector<2x32xf32>
    %86 = vector.extract_strided_slice %83 {offsets = [0, 64], sizes = [2, 32], strides = [1, 1]} : vector<2x128xf32> to vector<2x32xf32>
    %87 = vector.extract_strided_slice %82 {offsets = [0, 96], sizes = [2, 32], strides = [1, 1]} : vector<2x128xf32> to vector<2x32xf32>
    %88 = arith.mulf %85, %54 : vector<2x32xf32>
    %89 = arith.mulf %84, %86 : vector<2x32xf32>
    %90 = arith.addf %88, %89 : vector<2x32xf32>
    %91 = math.tanh %90 : vector<2x32xf32>
    %92 = arith.mulf %87, %91 : vector<2x32xf32>
    %93 = vector.extract_strided_slice %7 {offsets = [4, 0], sizes = [2, 128], strides = [1, 1]} : vector<16x128xf32> to vector<2x128xf32>
    %cst_24 = arith.constant dense<0.000000e+00> : vector<2x128xf32>
    %94 = tpu.matmul %74, %8, %cst_24 {dimension_numbers = #tpu.dot_dimension_numbers<[1], [0], [0], [1], [0, 0, 1, 1], [], []>} : vector<2x32xf32>, vector<32x128xf32>, vector<2x128xf32> -> vector<2x128xf32>
    %95 = arith.addf %93, %94 : vector<2x128xf32>
    %96 = arith.negf %95 : vector<2x128xf32>
    %97 = math.exp %96 : vector<2x128xf32>
    %cst_25 = arith.constant 1.000000e+00 : f32
    %98 = vector.broadcast %cst_25 : f32 to vector<2x128xf32>
    %99 = arith.addf %98, %97 : vector<2x128xf32>
    %100 = arith.divf %98, %99 : vector<2x128xf32>
    %101 = math.tanh %95 : vector<2x128xf32>
    %102 = vector.extract_strided_slice %100 {offsets = [0, 0], sizes = [2, 32], strides = [1, 1]} : vector<2x128xf32> to vector<2x32xf32>
    %103 = vector.extract_strided_slice %100 {offsets = [0, 32], sizes = [2, 32], strides = [1, 1]} : vector<2x128xf32> to vector<2x32xf32>
    %104 = vector.extract_strided_slice %101 {offsets = [0, 64], sizes = [2, 32], strides = [1, 1]} : vector<2x128xf32> to vector<2x32xf32>
    %105 = vector.extract_strided_slice %100 {offsets = [0, 96], sizes = [2, 32], strides = [1, 1]} : vector<2x128xf32> to vector<2x32xf32>
    %106 = arith.mulf %103, %72 : vector<2x32xf32>
    %107 = arith.mulf %102, %104 : vector<2x32xf32>
    %108 = arith.addf %106, %107 : vector<2x32xf32>
    %109 = math.tanh %108 : vector<2x32xf32>
    %110 = arith.mulf %105, %109 : vector<2x32xf32>
    %111 = vector.extract_strided_slice %15 {offsets = [10, 0], sizes = [2, 128], strides = [1, 1]} : vector<16x128xf32> to vector<2x128xf32>
    %cst_26 = arith.constant dense<0.000000e+00> : vector<2x128xf32>
    %112 = tpu.matmul %92, %16, %cst_26 {dimension_numbers = #tpu.dot_dimension_numbers<[1], [0], [0], [1], [0, 0, 1, 1], [], []>} : vector<2x32xf32>, vector<32x128xf32>, vector<2x128xf32> -> vector<2x128xf32>
    %113 = arith.addf %111, %112 : vector<2x128xf32>
    %114 = arith.negf %113 : vector<2x128xf32>
    %115 = math.exp %114 : vector<2x128xf32>
    %cst_27 = arith.constant 1.000000e+00 : f32
    %116 = vector.broadcast %cst_27 : f32 to vector<2x128xf32>
    %117 = arith.addf %116, %115 : vector<2x128xf32>
    %118 = arith.divf %116, %117 : vector<2x128xf32>
    %119 = math.tanh %113 : vector<2x128xf32>
    %120 = vector.extract_strided_slice %118 {offsets = [0, 0], sizes = [2, 32], strides = [1, 1]} : vector<2x128xf32> to vector<2x32xf32>
    %121 = vector.extract_strided_slice %118 {offsets = [0, 32], sizes = [2, 32], strides = [1, 1]} : vector<2x128xf32> to vector<2x32xf32>
    %122 = vector.extract_strided_slice %119 {offsets = [0, 64], sizes = [2, 32], strides = [1, 1]} : vector<2x128xf32> to vector<2x32xf32>
    %123 = vector.extract_strided_slice %118 {offsets = [0, 96], sizes = [2, 32], strides = [1, 1]} : vector<2x128xf32> to vector<2x32xf32>
    %124 = arith.mulf %121, %90 : vector<2x32xf32>
    %125 = arith.mulf %120, %122 : vector<2x32xf32>
    %126 = arith.addf %124, %125 : vector<2x32xf32>
    %127 = math.tanh %126 : vector<2x32xf32>
    %128 = arith.mulf %123, %127 : vector<2x32xf32>
    %129 = vector.extract_strided_slice %7 {offsets = [6, 0], sizes = [2, 128], strides = [1, 1]} : vector<16x128xf32> to vector<2x128xf32>
    %cst_28 = arith.constant dense<0.000000e+00> : vector<2x128xf32>
    %130 = tpu.matmul %110, %8, %cst_28 {dimension_numbers = #tpu.dot_dimension_numbers<[1], [0], [0], [1], [0, 0, 1, 1], [], []>} : vector<2x32xf32>, vector<32x128xf32>, vector<2x128xf32> -> vector<2x128xf32>
    %131 = arith.addf %129, %130 : vector<2x128xf32>
    %132 = arith.negf %131 : vector<2x128xf32>
    %133 = math.exp %132 : vector<2x128xf32>
    %cst_29 = arith.constant 1.000000e+00 : f32
    %134 = vector.broadcast %cst_29 : f32 to vector<2x128xf32>
    %135 = arith.addf %134, %133 : vector<2x128xf32>
    %136 = arith.divf %134, %135 : vector<2x128xf32>
    %137 = math.tanh %131 : vector<2x128xf32>
    %138 = vector.extract_strided_slice %136 {offsets = [0, 0], sizes = [2, 32], strides = [1, 1]} : vector<2x128xf32> to vector<2x32xf32>
    %139 = vector.extract_strided_slice %136 {offsets = [0, 32], sizes = [2, 32], strides = [1, 1]} : vector<2x128xf32> to vector<2x32xf32>
    %140 = vector.extract_strided_slice %137 {offsets = [0, 64], sizes = [2, 32], strides = [1, 1]} : vector<2x128xf32> to vector<2x32xf32>
    %141 = vector.extract_strided_slice %136 {offsets = [0, 96], sizes = [2, 32], strides = [1, 1]} : vector<2x128xf32> to vector<2x32xf32>
    %142 = arith.mulf %139, %108 : vector<2x32xf32>
    %143 = arith.mulf %138, %140 : vector<2x32xf32>
    %144 = arith.addf %142, %143 : vector<2x32xf32>
    %145 = math.tanh %144 : vector<2x32xf32>
    %146 = arith.mulf %141, %145 : vector<2x32xf32>
    %147 = vector.extract_strided_slice %15 {offsets = [8, 0], sizes = [2, 128], strides = [1, 1]} : vector<16x128xf32> to vector<2x128xf32>
    %cst_30 = arith.constant dense<0.000000e+00> : vector<2x128xf32>
    %148 = tpu.matmul %128, %16, %cst_30 {dimension_numbers = #tpu.dot_dimension_numbers<[1], [0], [0], [1], [0, 0, 1, 1], [], []>} : vector<2x32xf32>, vector<32x128xf32>, vector<2x128xf32> -> vector<2x128xf32>
    %149 = arith.addf %147, %148 : vector<2x128xf32>
    %150 = arith.negf %149 : vector<2x128xf32>
    %151 = math.exp %150 : vector<2x128xf32>
    %cst_31 = arith.constant 1.000000e+00 : f32
    %152 = vector.broadcast %cst_31 : f32 to vector<2x128xf32>
    %153 = arith.addf %152, %151 : vector<2x128xf32>
    %154 = arith.divf %152, %153 : vector<2x128xf32>
    %155 = math.tanh %149 : vector<2x128xf32>
    %156 = vector.extract_strided_slice %154 {offsets = [0, 0], sizes = [2, 32], strides = [1, 1]} : vector<2x128xf32> to vector<2x32xf32>
    %157 = vector.extract_strided_slice %154 {offsets = [0, 32], sizes = [2, 32], strides = [1, 1]} : vector<2x128xf32> to vector<2x32xf32>
    %158 = vector.extract_strided_slice %155 {offsets = [0, 64], sizes = [2, 32], strides = [1, 1]} : vector<2x128xf32> to vector<2x32xf32>
    %159 = vector.extract_strided_slice %154 {offsets = [0, 96], sizes = [2, 32], strides = [1, 1]} : vector<2x128xf32> to vector<2x32xf32>
    %160 = arith.mulf %157, %126 : vector<2x32xf32>
    %161 = arith.mulf %156, %158 : vector<2x32xf32>
    %162 = arith.addf %160, %161 : vector<2x32xf32>
    %163 = math.tanh %162 : vector<2x32xf32>
    %164 = arith.mulf %159, %163 : vector<2x32xf32>
    %165 = vector.extract_strided_slice %7 {offsets = [8, 0], sizes = [2, 128], strides = [1, 1]} : vector<16x128xf32> to vector<2x128xf32>
    %cst_32 = arith.constant dense<0.000000e+00> : vector<2x128xf32>
    %166 = tpu.matmul %146, %8, %cst_32 {dimension_numbers = #tpu.dot_dimension_numbers<[1], [0], [0], [1], [0, 0, 1, 1], [], []>} : vector<2x32xf32>, vector<32x128xf32>, vector<2x128xf32> -> vector<2x128xf32>
    %167 = arith.addf %165, %166 : vector<2x128xf32>
    %168 = arith.negf %167 : vector<2x128xf32>
    %169 = math.exp %168 : vector<2x128xf32>
    %cst_33 = arith.constant 1.000000e+00 : f32
    %170 = vector.broadcast %cst_33 : f32 to vector<2x128xf32>
    %171 = arith.addf %170, %169 : vector<2x128xf32>
    %172 = arith.divf %170, %171 : vector<2x128xf32>
    %173 = math.tanh %167 : vector<2x128xf32>
    %174 = vector.extract_strided_slice %172 {offsets = [0, 0], sizes = [2, 32], strides = [1, 1]} : vector<2x128xf32> to vector<2x32xf32>
    %175 = vector.extract_strided_slice %172 {offsets = [0, 32], sizes = [2, 32], strides = [1, 1]} : vector<2x128xf32> to vector<2x32xf32>
    %176 = vector.extract_strided_slice %173 {offsets = [0, 64], sizes = [2, 32], strides = [1, 1]} : vector<2x128xf32> to vector<2x32xf32>
    %177 = vector.extract_strided_slice %172 {offsets = [0, 96], sizes = [2, 32], strides = [1, 1]} : vector<2x128xf32> to vector<2x32xf32>
    %178 = arith.mulf %175, %144 : vector<2x32xf32>
    %179 = arith.mulf %174, %176 : vector<2x32xf32>
    %180 = arith.addf %178, %179 : vector<2x32xf32>
    %181 = math.tanh %180 : vector<2x32xf32>
    %182 = arith.mulf %177, %181 : vector<2x32xf32>
    %183 = vector.extract_strided_slice %15 {offsets = [6, 0], sizes = [2, 128], strides = [1, 1]} : vector<16x128xf32> to vector<2x128xf32>
    %cst_34 = arith.constant dense<0.000000e+00> : vector<2x128xf32>
    %184 = tpu.matmul %164, %16, %cst_34 {dimension_numbers = #tpu.dot_dimension_numbers<[1], [0], [0], [1], [0, 0, 1, 1], [], []>} : vector<2x32xf32>, vector<32x128xf32>, vector<2x128xf32> -> vector<2x128xf32>
    %185 = arith.addf %183, %184 : vector<2x128xf32>
    %186 = arith.negf %185 : vector<2x128xf32>
    %187 = math.exp %186 : vector<2x128xf32>
    %cst_35 = arith.constant 1.000000e+00 : f32
    %188 = vector.broadcast %cst_35 : f32 to vector<2x128xf32>
    %189 = arith.addf %188, %187 : vector<2x128xf32>
    %190 = arith.divf %188, %189 : vector<2x128xf32>
    %191 = math.tanh %185 : vector<2x128xf32>
    %192 = vector.extract_strided_slice %190 {offsets = [0, 0], sizes = [2, 32], strides = [1, 1]} : vector<2x128xf32> to vector<2x32xf32>
    %193 = vector.extract_strided_slice %190 {offsets = [0, 32], sizes = [2, 32], strides = [1, 1]} : vector<2x128xf32> to vector<2x32xf32>
    %194 = vector.extract_strided_slice %191 {offsets = [0, 64], sizes = [2, 32], strides = [1, 1]} : vector<2x128xf32> to vector<2x32xf32>
    %195 = vector.extract_strided_slice %190 {offsets = [0, 96], sizes = [2, 32], strides = [1, 1]} : vector<2x128xf32> to vector<2x32xf32>
    %196 = arith.mulf %193, %162 : vector<2x32xf32>
    %197 = arith.mulf %192, %194 : vector<2x32xf32>
    %198 = arith.addf %196, %197 : vector<2x32xf32>
    %199 = math.tanh %198 : vector<2x32xf32>
    %200 = arith.mulf %195, %199 : vector<2x32xf32>
    %201 = vector.extract_strided_slice %7 {offsets = [10, 0], sizes = [2, 128], strides = [1, 1]} : vector<16x128xf32> to vector<2x128xf32>
    %cst_36 = arith.constant dense<0.000000e+00> : vector<2x128xf32>
    %202 = tpu.matmul %182, %8, %cst_36 {dimension_numbers = #tpu.dot_dimension_numbers<[1], [0], [0], [1], [0, 0, 1, 1], [], []>} : vector<2x32xf32>, vector<32x128xf32>, vector<2x128xf32> -> vector<2x128xf32>
    %203 = arith.addf %201, %202 : vector<2x128xf32>
    %204 = arith.negf %203 : vector<2x128xf32>
    %205 = math.exp %204 : vector<2x128xf32>
    %cst_37 = arith.constant 1.000000e+00 : f32
    %206 = vector.broadcast %cst_37 : f32 to vector<2x128xf32>
    %207 = arith.addf %206, %205 : vector<2x128xf32>
    %208 = arith.divf %206, %207 : vector<2x128xf32>
    %209 = math.tanh %203 : vector<2x128xf32>
    %210 = vector.extract_strided_slice %208 {offsets = [0, 0], sizes = [2, 32], strides = [1, 1]} : vector<2x128xf32> to vector<2x32xf32>
    %211 = vector.extract_strided_slice %208 {offsets = [0, 32], sizes = [2, 32], strides = [1, 1]} : vector<2x128xf32> to vector<2x32xf32>
    %212 = vector.extract_strided_slice %209 {offsets = [0, 64], sizes = [2, 32], strides = [1, 1]} : vector<2x128xf32> to vector<2x32xf32>
    %213 = vector.extract_strided_slice %208 {offsets = [0, 96], sizes = [2, 32], strides = [1, 1]} : vector<2x128xf32> to vector<2x32xf32>
    %214 = arith.mulf %211, %180 : vector<2x32xf32>
    %215 = arith.mulf %210, %212 : vector<2x32xf32>
    %216 = arith.addf %214, %215 : vector<2x32xf32>
    %217 = math.tanh %216 : vector<2x32xf32>
    %218 = arith.mulf %213, %217 : vector<2x32xf32>
    %219 = vector.extract_strided_slice %15 {offsets = [4, 0], sizes = [2, 128], strides = [1, 1]} : vector<16x128xf32> to vector<2x128xf32>
    %cst_38 = arith.constant dense<0.000000e+00> : vector<2x128xf32>
    %220 = tpu.matmul %200, %16, %cst_38 {dimension_numbers = #tpu.dot_dimension_numbers<[1], [0], [0], [1], [0, 0, 1, 1], [], []>} : vector<2x32xf32>, vector<32x128xf32>, vector<2x128xf32> -> vector<2x128xf32>
    %221 = arith.addf %219, %220 : vector<2x128xf32>
    %222 = arith.negf %221 : vector<2x128xf32>
    %223 = math.exp %222 : vector<2x128xf32>
    %cst_39 = arith.constant 1.000000e+00 : f32
    %224 = vector.broadcast %cst_39 : f32 to vector<2x128xf32>
    %225 = arith.addf %224, %223 : vector<2x128xf32>
    %226 = arith.divf %224, %225 : vector<2x128xf32>
    %227 = math.tanh %221 : vector<2x128xf32>
    %228 = vector.extract_strided_slice %226 {offsets = [0, 0], sizes = [2, 32], strides = [1, 1]} : vector<2x128xf32> to vector<2x32xf32>
    %229 = vector.extract_strided_slice %226 {offsets = [0, 32], sizes = [2, 32], strides = [1, 1]} : vector<2x128xf32> to vector<2x32xf32>
    %230 = vector.extract_strided_slice %227 {offsets = [0, 64], sizes = [2, 32], strides = [1, 1]} : vector<2x128xf32> to vector<2x32xf32>
    %231 = vector.extract_strided_slice %226 {offsets = [0, 96], sizes = [2, 32], strides = [1, 1]} : vector<2x128xf32> to vector<2x32xf32>
    %232 = arith.mulf %229, %198 : vector<2x32xf32>
    %233 = arith.mulf %228, %230 : vector<2x32xf32>
    %234 = arith.addf %232, %233 : vector<2x32xf32>
    %235 = math.tanh %234 : vector<2x32xf32>
    %236 = arith.mulf %231, %235 : vector<2x32xf32>
    %237 = vector.extract_strided_slice %7 {offsets = [12, 0], sizes = [2, 128], strides = [1, 1]} : vector<16x128xf32> to vector<2x128xf32>
    %cst_40 = arith.constant dense<0.000000e+00> : vector<2x128xf32>
    %238 = tpu.matmul %218, %8, %cst_40 {dimension_numbers = #tpu.dot_dimension_numbers<[1], [0], [0], [1], [0, 0, 1, 1], [], []>} : vector<2x32xf32>, vector<32x128xf32>, vector<2x128xf32> -> vector<2x128xf32>
    %239 = arith.addf %237, %238 : vector<2x128xf32>
    %240 = arith.negf %239 : vector<2x128xf32>
    %241 = math.exp %240 : vector<2x128xf32>
    %cst_41 = arith.constant 1.000000e+00 : f32
    %242 = vector.broadcast %cst_41 : f32 to vector<2x128xf32>
    %243 = arith.addf %242, %241 : vector<2x128xf32>
    %244 = arith.divf %242, %243 : vector<2x128xf32>
    %245 = math.tanh %239 : vector<2x128xf32>
    %246 = vector.extract_strided_slice %244 {offsets = [0, 0], sizes = [2, 32], strides = [1, 1]} : vector<2x128xf32> to vector<2x32xf32>
    %247 = vector.extract_strided_slice %244 {offsets = [0, 32], sizes = [2, 32], strides = [1, 1]} : vector<2x128xf32> to vector<2x32xf32>
    %248 = vector.extract_strided_slice %245 {offsets = [0, 64], sizes = [2, 32], strides = [1, 1]} : vector<2x128xf32> to vector<2x32xf32>
    %249 = vector.extract_strided_slice %244 {offsets = [0, 96], sizes = [2, 32], strides = [1, 1]} : vector<2x128xf32> to vector<2x32xf32>
    %250 = arith.mulf %247, %216 : vector<2x32xf32>
    %251 = arith.mulf %246, %248 : vector<2x32xf32>
    %252 = arith.addf %250, %251 : vector<2x32xf32>
    %253 = math.tanh %252 : vector<2x32xf32>
    %254 = arith.mulf %249, %253 : vector<2x32xf32>
    %255 = vector.extract_strided_slice %15 {offsets = [2, 0], sizes = [2, 128], strides = [1, 1]} : vector<16x128xf32> to vector<2x128xf32>
    %cst_42 = arith.constant dense<0.000000e+00> : vector<2x128xf32>
    %256 = tpu.matmul %236, %16, %cst_42 {dimension_numbers = #tpu.dot_dimension_numbers<[1], [0], [0], [1], [0, 0, 1, 1], [], []>} : vector<2x32xf32>, vector<32x128xf32>, vector<2x128xf32> -> vector<2x128xf32>
    %257 = arith.addf %255, %256 : vector<2x128xf32>
    %258 = arith.negf %257 : vector<2x128xf32>
    %259 = math.exp %258 : vector<2x128xf32>
    %cst_43 = arith.constant 1.000000e+00 : f32
    %260 = vector.broadcast %cst_43 : f32 to vector<2x128xf32>
    %261 = arith.addf %260, %259 : vector<2x128xf32>
    %262 = arith.divf %260, %261 : vector<2x128xf32>
    %263 = math.tanh %257 : vector<2x128xf32>
    %264 = vector.extract_strided_slice %262 {offsets = [0, 0], sizes = [2, 32], strides = [1, 1]} : vector<2x128xf32> to vector<2x32xf32>
    %265 = vector.extract_strided_slice %262 {offsets = [0, 32], sizes = [2, 32], strides = [1, 1]} : vector<2x128xf32> to vector<2x32xf32>
    %266 = vector.extract_strided_slice %263 {offsets = [0, 64], sizes = [2, 32], strides = [1, 1]} : vector<2x128xf32> to vector<2x32xf32>
    %267 = vector.extract_strided_slice %262 {offsets = [0, 96], sizes = [2, 32], strides = [1, 1]} : vector<2x128xf32> to vector<2x32xf32>
    %268 = arith.mulf %265, %234 : vector<2x32xf32>
    %269 = arith.mulf %264, %266 : vector<2x32xf32>
    %270 = arith.addf %268, %269 : vector<2x32xf32>
    %271 = math.tanh %270 : vector<2x32xf32>
    %272 = arith.mulf %267, %271 : vector<2x32xf32>
    %273 = vector.extract_strided_slice %7 {offsets = [14, 0], sizes = [2, 128], strides = [1, 1]} : vector<16x128xf32> to vector<2x128xf32>
    %cst_44 = arith.constant dense<0.000000e+00> : vector<2x128xf32>
    %274 = tpu.matmul %254, %8, %cst_44 {dimension_numbers = #tpu.dot_dimension_numbers<[1], [0], [0], [1], [0, 0, 1, 1], [], []>} : vector<2x32xf32>, vector<32x128xf32>, vector<2x128xf32> -> vector<2x128xf32>
    %275 = arith.addf %273, %274 : vector<2x128xf32>
    %276 = arith.negf %275 : vector<2x128xf32>
    %277 = math.exp %276 : vector<2x128xf32>
    %cst_45 = arith.constant 1.000000e+00 : f32
    %278 = vector.broadcast %cst_45 : f32 to vector<2x128xf32>
    %279 = arith.addf %278, %277 : vector<2x128xf32>
    %280 = arith.divf %278, %279 : vector<2x128xf32>
    %281 = math.tanh %275 : vector<2x128xf32>
    %282 = vector.extract_strided_slice %280 {offsets = [0, 0], sizes = [2, 32], strides = [1, 1]} : vector<2x128xf32> to vector<2x32xf32>
    %283 = vector.extract_strided_slice %280 {offsets = [0, 32], sizes = [2, 32], strides = [1, 1]} : vector<2x128xf32> to vector<2x32xf32>
    %284 = vector.extract_strided_slice %281 {offsets = [0, 64], sizes = [2, 32], strides = [1, 1]} : vector<2x128xf32> to vector<2x32xf32>
    %285 = vector.extract_strided_slice %280 {offsets = [0, 96], sizes = [2, 32], strides = [1, 1]} : vector<2x128xf32> to vector<2x32xf32>
    %286 = arith.mulf %283, %252 : vector<2x32xf32>
    %287 = arith.mulf %282, %284 : vector<2x32xf32>
    %288 = arith.addf %286, %287 : vector<2x32xf32>
    %289 = math.tanh %288 : vector<2x32xf32>
    %290 = arith.mulf %285, %289 : vector<2x32xf32>
    %291 = vector.extract_strided_slice %15 {offsets = [0, 0], sizes = [2, 128], strides = [1, 1]} : vector<16x128xf32> to vector<2x128xf32>
    %cst_46 = arith.constant dense<0.000000e+00> : vector<2x128xf32>
    %292 = tpu.matmul %272, %16, %cst_46 {dimension_numbers = #tpu.dot_dimension_numbers<[1], [0], [0], [1], [0, 0, 1, 1], [], []>} : vector<2x32xf32>, vector<32x128xf32>, vector<2x128xf32> -> vector<2x128xf32>
    %293 = arith.addf %291, %292 : vector<2x128xf32>
    %294 = arith.negf %293 : vector<2x128xf32>
    %295 = math.exp %294 : vector<2x128xf32>
    %cst_47 = arith.constant 1.000000e+00 : f32
    %296 = vector.broadcast %cst_47 : f32 to vector<2x128xf32>
    %297 = arith.addf %296, %295 : vector<2x128xf32>
    %298 = arith.divf %296, %297 : vector<2x128xf32>
    %299 = math.tanh %293 : vector<2x128xf32>
    %300 = vector.extract_strided_slice %298 {offsets = [0, 0], sizes = [2, 32], strides = [1, 1]} : vector<2x128xf32> to vector<2x32xf32>
    %301 = vector.extract_strided_slice %298 {offsets = [0, 32], sizes = [2, 32], strides = [1, 1]} : vector<2x128xf32> to vector<2x32xf32>
    %302 = vector.extract_strided_slice %299 {offsets = [0, 64], sizes = [2, 32], strides = [1, 1]} : vector<2x128xf32> to vector<2x32xf32>
    %303 = vector.extract_strided_slice %298 {offsets = [0, 96], sizes = [2, 32], strides = [1, 1]} : vector<2x128xf32> to vector<2x32xf32>
    %304 = arith.mulf %301, %270 : vector<2x32xf32>
    %305 = arith.mulf %300, %302 : vector<2x32xf32>
    %306 = arith.addf %304, %305 : vector<2x32xf32>
    %307 = math.tanh %306 : vector<2x32xf32>
    %308 = arith.mulf %303, %307 : vector<2x32xf32>
    %309 = tpu.concatenate %38, %74, %110, %146, %182, %218, %254, %290 in 0 : vector<2x32xf32>, vector<2x32xf32>, vector<2x32xf32>, vector<2x32xf32>, vector<2x32xf32>, vector<2x32xf32>, vector<2x32xf32>, vector<2x32xf32> -> vector<16x32xf32>
    %310 = tpu.concatenate %308, %272, %236, %200, %164, %128, %92, %56 in 0 : vector<2x32xf32>, vector<2x32xf32>, vector<2x32xf32>, vector<2x32xf32>, vector<2x32xf32>, vector<2x32xf32>, vector<2x32xf32>, vector<2x32xf32> -> vector<16x32xf32>
    %c0_48 = arith.constant 0 : index
    %c0_49 = arith.constant 0 : index
    %311 = vector.load %arg9[%c0_48, %c0_49] : memref<1x128xf32, #tpu.memory_space<vmem>>, vector<1x128xf32>
    %c0_50 = arith.constant 0 : index
    %c0_51 = arith.constant 0 : index
    %312 = vector.load %arg7[%c0_50, %c0_51] : memref<64x128xf32, #tpu.memory_space<vmem>>, vector<32x128xf32>
    %cst_52 = arith.constant dense<0.000000e+00> : vector<16x128xf32>
    %313 = tpu.matmul %309, %312, %cst_52 {dimension_numbers = #tpu.dot_dimension_numbers<[1], [0], [0], [1], [0, 0, 1, 1], [], []>} : vector<16x32xf32>, vector<32x128xf32>, vector<16x128xf32> -> vector<16x128xf32>
    %314 = vector.broadcast %311 : vector<1x128xf32> to vector<16x128xf32>
    %315 = arith.addf %314, %313 : vector<16x128xf32>
    %c32 = arith.constant 32 : index
    %c0_53 = arith.constant 0 : index
    %316 = vector.load %arg7[%c32, %c0_53] : memref<64x128xf32, #tpu.memory_space<vmem>>, vector<32x128xf32>
    %cst_54 = arith.constant dense<0.000000e+00> : vector<16x128xf32>
    %317 = tpu.matmul %310, %316, %cst_54 {dimension_numbers = #tpu.dot_dimension_numbers<[1], [0], [0], [1], [0, 0, 1, 1], [], []>} : vector<16x32xf32>, vector<32x128xf32>, vector<16x128xf32> -> vector<16x128xf32>
    %318 = arith.addf %315, %317 : vector<16x128xf32>
    %c0_55 = arith.constant 0 : index
    %c0_56 = arith.constant 0 : index
    %319 = vector.load %arg8[%c0_55, %c0_56] : memref<32x128xf32, #tpu.memory_space<vmem>>, vector<32x128xf32>
    %c0_57 = arith.constant 0 : index
    %c0_58 = arith.constant 0 : index
    %320 = vector.load %arg12[%c0_57, %c0_58] : memref<1x128xf32, #tpu.memory_space<vmem>>, vector<1x128xf32>
    %c0_59 = arith.constant 0 : index
    %c0_60 = arith.constant 0 : index
    %321 = vector.load %arg10[%c0_59, %c0_60] : memref<64x128xf32, #tpu.memory_space<vmem>>, vector<32x128xf32>
    %cst_61 = arith.constant dense<0.000000e+00> : vector<16x128xf32>
    %322 = tpu.matmul %309, %321, %cst_61 {dimension_numbers = #tpu.dot_dimension_numbers<[1], [0], [0], [1], [0, 0, 1, 1], [], []>} : vector<16x32xf32>, vector<32x128xf32>, vector<16x128xf32> -> vector<16x128xf32>
    %323 = vector.broadcast %320 : vector<1x128xf32> to vector<16x128xf32>
    %324 = arith.addf %323, %322 : vector<16x128xf32>
    %c32_62 = arith.constant 32 : index
    %c0_63 = arith.constant 0 : index
    %325 = vector.load %arg10[%c32_62, %c0_63] : memref<64x128xf32, #tpu.memory_space<vmem>>, vector<32x128xf32>
    %cst_64 = arith.constant dense<0.000000e+00> : vector<16x128xf32>
    %326 = tpu.matmul %310, %325, %cst_64 {dimension_numbers = #tpu.dot_dimension_numbers<[1], [0], [0], [1], [0, 0, 1, 1], [], []>} : vector<16x32xf32>, vector<32x128xf32>, vector<16x128xf32> -> vector<16x128xf32>
    %327 = arith.addf %324, %326 : vector<16x128xf32>
    %c0_65 = arith.constant 0 : index
    %c0_66 = arith.constant 0 : index
    %328 = vector.load %arg11[%c0_65, %c0_66] : memref<32x128xf32, #tpu.memory_space<vmem>>, vector<32x128xf32>
    %cst_67 = arith.constant 0.000000e+00 : f32
    %329 = vector.broadcast %cst_67 : f32 to vector<2x32xf32>
    %cst_68 = arith.constant 0.000000e+00 : f32
    %330 = vector.broadcast %cst_68 : f32 to vector<2x32xf32>
    %cst_69 = arith.constant 0.000000e+00 : f32
    %331 = vector.broadcast %cst_69 : f32 to vector<2x32xf32>
    %cst_70 = arith.constant 0.000000e+00 : f32
    %332 = vector.broadcast %cst_70 : f32 to vector<2x32xf32>
    %333 = vector.extract_strided_slice %318 {offsets = [0, 0], sizes = [2, 128], strides = [1, 1]} : vector<16x128xf32> to vector<2x128xf32>
    %cst_71 = arith.constant dense<0.000000e+00> : vector<2x128xf32>
    %334 = tpu.matmul %329, %319, %cst_71 {dimension_numbers = #tpu.dot_dimension_numbers<[1], [0], [0], [1], [0, 0, 1, 1], [], []>} : vector<2x32xf32>, vector<32x128xf32>, vector<2x128xf32> -> vector<2x128xf32>
    %335 = arith.addf %333, %334 : vector<2x128xf32>
    %336 = arith.negf %335 : vector<2x128xf32>
    %337 = math.exp %336 : vector<2x128xf32>
    %cst_72 = arith.constant 1.000000e+00 : f32
    %338 = vector.broadcast %cst_72 : f32 to vector<2x128xf32>
    %339 = arith.addf %338, %337 : vector<2x128xf32>
    %340 = arith.divf %338, %339 : vector<2x128xf32>
    %341 = math.tanh %335 : vector<2x128xf32>
    %342 = vector.extract_strided_slice %340 {offsets = [0, 0], sizes = [2, 32], strides = [1, 1]} : vector<2x128xf32> to vector<2x32xf32>
    %343 = vector.extract_strided_slice %340 {offsets = [0, 32], sizes = [2, 32], strides = [1, 1]} : vector<2x128xf32> to vector<2x32xf32>
    %344 = vector.extract_strided_slice %341 {offsets = [0, 64], sizes = [2, 32], strides = [1, 1]} : vector<2x128xf32> to vector<2x32xf32>
    %345 = vector.extract_strided_slice %340 {offsets = [0, 96], sizes = [2, 32], strides = [1, 1]} : vector<2x128xf32> to vector<2x32xf32>
    %346 = arith.mulf %343, %331 : vector<2x32xf32>
    %347 = arith.mulf %342, %344 : vector<2x32xf32>
    %348 = arith.addf %346, %347 : vector<2x32xf32>
    %349 = math.tanh %348 : vector<2x32xf32>
    %350 = arith.mulf %345, %349 : vector<2x32xf32>
    %351 = vector.extract_strided_slice %327 {offsets = [14, 0], sizes = [2, 128], strides = [1, 1]} : vector<16x128xf32> to vector<2x128xf32>
    %cst_73 = arith.constant dense<0.000000e+00> : vector<2x128xf32>
    %352 = tpu.matmul %330, %328, %cst_73 {dimension_numbers = #tpu.dot_dimension_numbers<[1], [0], [0], [1], [0, 0, 1, 1], [], []>} : vector<2x32xf32>, vector<32x128xf32>, vector<2x128xf32> -> vector<2x128xf32>
    %353 = arith.addf %351, %352 : vector<2x128xf32>
    %354 = arith.negf %353 : vector<2x128xf32>
    %355 = math.exp %354 : vector<2x128xf32>
    %cst_74 = arith.constant 1.000000e+00 : f32
    %356 = vector.broadcast %cst_74 : f32 to vector<2x128xf32>
    %357 = arith.addf %356, %355 : vector<2x128xf32>
    %358 = arith.divf %356, %357 : vector<2x128xf32>
    %359 = math.tanh %353 : vector<2x128xf32>
    %360 = vector.extract_strided_slice %358 {offsets = [0, 0], sizes = [2, 32], strides = [1, 1]} : vector<2x128xf32> to vector<2x32xf32>
    %361 = vector.extract_strided_slice %358 {offsets = [0, 32], sizes = [2, 32], strides = [1, 1]} : vector<2x128xf32> to vector<2x32xf32>
    %362 = vector.extract_strided_slice %359 {offsets = [0, 64], sizes = [2, 32], strides = [1, 1]} : vector<2x128xf32> to vector<2x32xf32>
    %363 = vector.extract_strided_slice %358 {offsets = [0, 96], sizes = [2, 32], strides = [1, 1]} : vector<2x128xf32> to vector<2x32xf32>
    %364 = arith.mulf %361, %332 : vector<2x32xf32>
    %365 = arith.mulf %360, %362 : vector<2x32xf32>
    %366 = arith.addf %364, %365 : vector<2x32xf32>
    %367 = math.tanh %366 : vector<2x32xf32>
    %368 = arith.mulf %363, %367 : vector<2x32xf32>
    %369 = vector.extract_strided_slice %318 {offsets = [2, 0], sizes = [2, 128], strides = [1, 1]} : vector<16x128xf32> to vector<2x128xf32>
    %cst_75 = arith.constant dense<0.000000e+00> : vector<2x128xf32>
    %370 = tpu.matmul %350, %319, %cst_75 {dimension_numbers = #tpu.dot_dimension_numbers<[1], [0], [0], [1], [0, 0, 1, 1], [], []>} : vector<2x32xf32>, vector<32x128xf32>, vector<2x128xf32> -> vector<2x128xf32>
    %371 = arith.addf %369, %370 : vector<2x128xf32>
    %372 = arith.negf %371 : vector<2x128xf32>
    %373 = math.exp %372 : vector<2x128xf32>
    %cst_76 = arith.constant 1.000000e+00 : f32
    %374 = vector.broadcast %cst_76 : f32 to vector<2x128xf32>
    %375 = arith.addf %374, %373 : vector<2x128xf32>
    %376 = arith.divf %374, %375 : vector<2x128xf32>
    %377 = math.tanh %371 : vector<2x128xf32>
    %378 = vector.extract_strided_slice %376 {offsets = [0, 0], sizes = [2, 32], strides = [1, 1]} : vector<2x128xf32> to vector<2x32xf32>
    %379 = vector.extract_strided_slice %376 {offsets = [0, 32], sizes = [2, 32], strides = [1, 1]} : vector<2x128xf32> to vector<2x32xf32>
    %380 = vector.extract_strided_slice %377 {offsets = [0, 64], sizes = [2, 32], strides = [1, 1]} : vector<2x128xf32> to vector<2x32xf32>
    %381 = vector.extract_strided_slice %376 {offsets = [0, 96], sizes = [2, 32], strides = [1, 1]} : vector<2x128xf32> to vector<2x32xf32>
    %382 = arith.mulf %379, %348 : vector<2x32xf32>
    %383 = arith.mulf %378, %380 : vector<2x32xf32>
    %384 = arith.addf %382, %383 : vector<2x32xf32>
    %385 = math.tanh %384 : vector<2x32xf32>
    %386 = arith.mulf %381, %385 : vector<2x32xf32>
    %387 = vector.extract_strided_slice %327 {offsets = [12, 0], sizes = [2, 128], strides = [1, 1]} : vector<16x128xf32> to vector<2x128xf32>
    %cst_77 = arith.constant dense<0.000000e+00> : vector<2x128xf32>
    %388 = tpu.matmul %368, %328, %cst_77 {dimension_numbers = #tpu.dot_dimension_numbers<[1], [0], [0], [1], [0, 0, 1, 1], [], []>} : vector<2x32xf32>, vector<32x128xf32>, vector<2x128xf32> -> vector<2x128xf32>
    %389 = arith.addf %387, %388 : vector<2x128xf32>
    %390 = arith.negf %389 : vector<2x128xf32>
    %391 = math.exp %390 : vector<2x128xf32>
    %cst_78 = arith.constant 1.000000e+00 : f32
    %392 = vector.broadcast %cst_78 : f32 to vector<2x128xf32>
    %393 = arith.addf %392, %391 : vector<2x128xf32>
    %394 = arith.divf %392, %393 : vector<2x128xf32>
    %395 = math.tanh %389 : vector<2x128xf32>
    %396 = vector.extract_strided_slice %394 {offsets = [0, 0], sizes = [2, 32], strides = [1, 1]} : vector<2x128xf32> to vector<2x32xf32>
    %397 = vector.extract_strided_slice %394 {offsets = [0, 32], sizes = [2, 32], strides = [1, 1]} : vector<2x128xf32> to vector<2x32xf32>
    %398 = vector.extract_strided_slice %395 {offsets = [0, 64], sizes = [2, 32], strides = [1, 1]} : vector<2x128xf32> to vector<2x32xf32>
    %399 = vector.extract_strided_slice %394 {offsets = [0, 96], sizes = [2, 32], strides = [1, 1]} : vector<2x128xf32> to vector<2x32xf32>
    %400 = arith.mulf %397, %366 : vector<2x32xf32>
    %401 = arith.mulf %396, %398 : vector<2x32xf32>
    %402 = arith.addf %400, %401 : vector<2x32xf32>
    %403 = math.tanh %402 : vector<2x32xf32>
    %404 = arith.mulf %399, %403 : vector<2x32xf32>
    %405 = vector.extract_strided_slice %318 {offsets = [4, 0], sizes = [2, 128], strides = [1, 1]} : vector<16x128xf32> to vector<2x128xf32>
    %cst_79 = arith.constant dense<0.000000e+00> : vector<2x128xf32>
    %406 = tpu.matmul %386, %319, %cst_79 {dimension_numbers = #tpu.dot_dimension_numbers<[1], [0], [0], [1], [0, 0, 1, 1], [], []>} : vector<2x32xf32>, vector<32x128xf32>, vector<2x128xf32> -> vector<2x128xf32>
    %407 = arith.addf %405, %406 : vector<2x128xf32>
    %408 = arith.negf %407 : vector<2x128xf32>
    %409 = math.exp %408 : vector<2x128xf32>
    %cst_80 = arith.constant 1.000000e+00 : f32
    %410 = vector.broadcast %cst_80 : f32 to vector<2x128xf32>
    %411 = arith.addf %410, %409 : vector<2x128xf32>
    %412 = arith.divf %410, %411 : vector<2x128xf32>
    %413 = math.tanh %407 : vector<2x128xf32>
    %414 = vector.extract_strided_slice %412 {offsets = [0, 0], sizes = [2, 32], strides = [1, 1]} : vector<2x128xf32> to vector<2x32xf32>
    %415 = vector.extract_strided_slice %412 {offsets = [0, 32], sizes = [2, 32], strides = [1, 1]} : vector<2x128xf32> to vector<2x32xf32>
    %416 = vector.extract_strided_slice %413 {offsets = [0, 64], sizes = [2, 32], strides = [1, 1]} : vector<2x128xf32> to vector<2x32xf32>
    %417 = vector.extract_strided_slice %412 {offsets = [0, 96], sizes = [2, 32], strides = [1, 1]} : vector<2x128xf32> to vector<2x32xf32>
    %418 = arith.mulf %415, %384 : vector<2x32xf32>
    %419 = arith.mulf %414, %416 : vector<2x32xf32>
    %420 = arith.addf %418, %419 : vector<2x32xf32>
    %421 = math.tanh %420 : vector<2x32xf32>
    %422 = arith.mulf %417, %421 : vector<2x32xf32>
    %423 = vector.extract_strided_slice %327 {offsets = [10, 0], sizes = [2, 128], strides = [1, 1]} : vector<16x128xf32> to vector<2x128xf32>
    %cst_81 = arith.constant dense<0.000000e+00> : vector<2x128xf32>
    %424 = tpu.matmul %404, %328, %cst_81 {dimension_numbers = #tpu.dot_dimension_numbers<[1], [0], [0], [1], [0, 0, 1, 1], [], []>} : vector<2x32xf32>, vector<32x128xf32>, vector<2x128xf32> -> vector<2x128xf32>
    %425 = arith.addf %423, %424 : vector<2x128xf32>
    %426 = arith.negf %425 : vector<2x128xf32>
    %427 = math.exp %426 : vector<2x128xf32>
    %cst_82 = arith.constant 1.000000e+00 : f32
    %428 = vector.broadcast %cst_82 : f32 to vector<2x128xf32>
    %429 = arith.addf %428, %427 : vector<2x128xf32>
    %430 = arith.divf %428, %429 : vector<2x128xf32>
    %431 = math.tanh %425 : vector<2x128xf32>
    %432 = vector.extract_strided_slice %430 {offsets = [0, 0], sizes = [2, 32], strides = [1, 1]} : vector<2x128xf32> to vector<2x32xf32>
    %433 = vector.extract_strided_slice %430 {offsets = [0, 32], sizes = [2, 32], strides = [1, 1]} : vector<2x128xf32> to vector<2x32xf32>
    %434 = vector.extract_strided_slice %431 {offsets = [0, 64], sizes = [2, 32], strides = [1, 1]} : vector<2x128xf32> to vector<2x32xf32>
    %435 = vector.extract_strided_slice %430 {offsets = [0, 96], sizes = [2, 32], strides = [1, 1]} : vector<2x128xf32> to vector<2x32xf32>
    %436 = arith.mulf %433, %402 : vector<2x32xf32>
    %437 = arith.mulf %432, %434 : vector<2x32xf32>
    %438 = arith.addf %436, %437 : vector<2x32xf32>
    %439 = math.tanh %438 : vector<2x32xf32>
    %440 = arith.mulf %435, %439 : vector<2x32xf32>
    %441 = vector.extract_strided_slice %318 {offsets = [6, 0], sizes = [2, 128], strides = [1, 1]} : vector<16x128xf32> to vector<2x128xf32>
    %cst_83 = arith.constant dense<0.000000e+00> : vector<2x128xf32>
    %442 = tpu.matmul %422, %319, %cst_83 {dimension_numbers = #tpu.dot_dimension_numbers<[1], [0], [0], [1], [0, 0, 1, 1], [], []>} : vector<2x32xf32>, vector<32x128xf32>, vector<2x128xf32> -> vector<2x128xf32>
    %443 = arith.addf %441, %442 : vector<2x128xf32>
    %444 = arith.negf %443 : vector<2x128xf32>
    %445 = math.exp %444 : vector<2x128xf32>
    %cst_84 = arith.constant 1.000000e+00 : f32
    %446 = vector.broadcast %cst_84 : f32 to vector<2x128xf32>
    %447 = arith.addf %446, %445 : vector<2x128xf32>
    %448 = arith.divf %446, %447 : vector<2x128xf32>
    %449 = math.tanh %443 : vector<2x128xf32>
    %450 = vector.extract_strided_slice %448 {offsets = [0, 0], sizes = [2, 32], strides = [1, 1]} : vector<2x128xf32> to vector<2x32xf32>
    %451 = vector.extract_strided_slice %448 {offsets = [0, 32], sizes = [2, 32], strides = [1, 1]} : vector<2x128xf32> to vector<2x32xf32>
    %452 = vector.extract_strided_slice %449 {offsets = [0, 64], sizes = [2, 32], strides = [1, 1]} : vector<2x128xf32> to vector<2x32xf32>
    %453 = vector.extract_strided_slice %448 {offsets = [0, 96], sizes = [2, 32], strides = [1, 1]} : vector<2x128xf32> to vector<2x32xf32>
    %454 = arith.mulf %451, %420 : vector<2x32xf32>
    %455 = arith.mulf %450, %452 : vector<2x32xf32>
    %456 = arith.addf %454, %455 : vector<2x32xf32>
    %457 = math.tanh %456 : vector<2x32xf32>
    %458 = arith.mulf %453, %457 : vector<2x32xf32>
    %459 = vector.extract_strided_slice %327 {offsets = [8, 0], sizes = [2, 128], strides = [1, 1]} : vector<16x128xf32> to vector<2x128xf32>
    %cst_85 = arith.constant dense<0.000000e+00> : vector<2x128xf32>
    %460 = tpu.matmul %440, %328, %cst_85 {dimension_numbers = #tpu.dot_dimension_numbers<[1], [0], [0], [1], [0, 0, 1, 1], [], []>} : vector<2x32xf32>, vector<32x128xf32>, vector<2x128xf32> -> vector<2x128xf32>
    %461 = arith.addf %459, %460 : vector<2x128xf32>
    %462 = arith.negf %461 : vector<2x128xf32>
    %463 = math.exp %462 : vector<2x128xf32>
    %cst_86 = arith.constant 1.000000e+00 : f32
    %464 = vector.broadcast %cst_86 : f32 to vector<2x128xf32>
    %465 = arith.addf %464, %463 : vector<2x128xf32>
    %466 = arith.divf %464, %465 : vector<2x128xf32>
    %467 = math.tanh %461 : vector<2x128xf32>
    %468 = vector.extract_strided_slice %466 {offsets = [0, 0], sizes = [2, 32], strides = [1, 1]} : vector<2x128xf32> to vector<2x32xf32>
    %469 = vector.extract_strided_slice %466 {offsets = [0, 32], sizes = [2, 32], strides = [1, 1]} : vector<2x128xf32> to vector<2x32xf32>
    %470 = vector.extract_strided_slice %467 {offsets = [0, 64], sizes = [2, 32], strides = [1, 1]} : vector<2x128xf32> to vector<2x32xf32>
    %471 = vector.extract_strided_slice %466 {offsets = [0, 96], sizes = [2, 32], strides = [1, 1]} : vector<2x128xf32> to vector<2x32xf32>
    %472 = arith.mulf %469, %438 : vector<2x32xf32>
    %473 = arith.mulf %468, %470 : vector<2x32xf32>
    %474 = arith.addf %472, %473 : vector<2x32xf32>
    %475 = math.tanh %474 : vector<2x32xf32>
    %476 = arith.mulf %471, %475 : vector<2x32xf32>
    %477 = vector.extract_strided_slice %318 {offsets = [8, 0], sizes = [2, 128], strides = [1, 1]} : vector<16x128xf32> to vector<2x128xf32>
    %cst_87 = arith.constant dense<0.000000e+00> : vector<2x128xf32>
    %478 = tpu.matmul %458, %319, %cst_87 {dimension_numbers = #tpu.dot_dimension_numbers<[1], [0], [0], [1], [0, 0, 1, 1], [], []>} : vector<2x32xf32>, vector<32x128xf32>, vector<2x128xf32> -> vector<2x128xf32>
    %479 = arith.addf %477, %478 : vector<2x128xf32>
    %480 = arith.negf %479 : vector<2x128xf32>
    %481 = math.exp %480 : vector<2x128xf32>
    %cst_88 = arith.constant 1.000000e+00 : f32
    %482 = vector.broadcast %cst_88 : f32 to vector<2x128xf32>
    %483 = arith.addf %482, %481 : vector<2x128xf32>
    %484 = arith.divf %482, %483 : vector<2x128xf32>
    %485 = math.tanh %479 : vector<2x128xf32>
    %486 = vector.extract_strided_slice %484 {offsets = [0, 0], sizes = [2, 32], strides = [1, 1]} : vector<2x128xf32> to vector<2x32xf32>
    %487 = vector.extract_strided_slice %484 {offsets = [0, 32], sizes = [2, 32], strides = [1, 1]} : vector<2x128xf32> to vector<2x32xf32>
    %488 = vector.extract_strided_slice %485 {offsets = [0, 64], sizes = [2, 32], strides = [1, 1]} : vector<2x128xf32> to vector<2x32xf32>
    %489 = vector.extract_strided_slice %484 {offsets = [0, 96], sizes = [2, 32], strides = [1, 1]} : vector<2x128xf32> to vector<2x32xf32>
    %490 = arith.mulf %487, %456 : vector<2x32xf32>
    %491 = arith.mulf %486, %488 : vector<2x32xf32>
    %492 = arith.addf %490, %491 : vector<2x32xf32>
    %493 = math.tanh %492 : vector<2x32xf32>
    %494 = arith.mulf %489, %493 : vector<2x32xf32>
    %495 = vector.extract_strided_slice %327 {offsets = [6, 0], sizes = [2, 128], strides = [1, 1]} : vector<16x128xf32> to vector<2x128xf32>
    %cst_89 = arith.constant dense<0.000000e+00> : vector<2x128xf32>
    %496 = tpu.matmul %476, %328, %cst_89 {dimension_numbers = #tpu.dot_dimension_numbers<[1], [0], [0], [1], [0, 0, 1, 1], [], []>} : vector<2x32xf32>, vector<32x128xf32>, vector<2x128xf32> -> vector<2x128xf32>
    %497 = arith.addf %495, %496 : vector<2x128xf32>
    %498 = arith.negf %497 : vector<2x128xf32>
    %499 = math.exp %498 : vector<2x128xf32>
    %cst_90 = arith.constant 1.000000e+00 : f32
    %500 = vector.broadcast %cst_90 : f32 to vector<2x128xf32>
    %501 = arith.addf %500, %499 : vector<2x128xf32>
    %502 = arith.divf %500, %501 : vector<2x128xf32>
    %503 = math.tanh %497 : vector<2x128xf32>
    %504 = vector.extract_strided_slice %502 {offsets = [0, 0], sizes = [2, 32], strides = [1, 1]} : vector<2x128xf32> to vector<2x32xf32>
    %505 = vector.extract_strided_slice %502 {offsets = [0, 32], sizes = [2, 32], strides = [1, 1]} : vector<2x128xf32> to vector<2x32xf32>
    %506 = vector.extract_strided_slice %503 {offsets = [0, 64], sizes = [2, 32], strides = [1, 1]} : vector<2x128xf32> to vector<2x32xf32>
    %507 = vector.extract_strided_slice %502 {offsets = [0, 96], sizes = [2, 32], strides = [1, 1]} : vector<2x128xf32> to vector<2x32xf32>
    %508 = arith.mulf %505, %474 : vector<2x32xf32>
    %509 = arith.mulf %504, %506 : vector<2x32xf32>
    %510 = arith.addf %508, %509 : vector<2x32xf32>
    %511 = math.tanh %510 : vector<2x32xf32>
    %512 = arith.mulf %507, %511 : vector<2x32xf32>
    %513 = vector.extract_strided_slice %318 {offsets = [10, 0], sizes = [2, 128], strides = [1, 1]} : vector<16x128xf32> to vector<2x128xf32>
    %cst_91 = arith.constant dense<0.000000e+00> : vector<2x128xf32>
    %514 = tpu.matmul %494, %319, %cst_91 {dimension_numbers = #tpu.dot_dimension_numbers<[1], [0], [0], [1], [0, 0, 1, 1], [], []>} : vector<2x32xf32>, vector<32x128xf32>, vector<2x128xf32> -> vector<2x128xf32>
    %515 = arith.addf %513, %514 : vector<2x128xf32>
    %516 = arith.negf %515 : vector<2x128xf32>
    %517 = math.exp %516 : vector<2x128xf32>
    %cst_92 = arith.constant 1.000000e+00 : f32
    %518 = vector.broadcast %cst_92 : f32 to vector<2x128xf32>
    %519 = arith.addf %518, %517 : vector<2x128xf32>
    %520 = arith.divf %518, %519 : vector<2x128xf32>
    %521 = math.tanh %515 : vector<2x128xf32>
    %522 = vector.extract_strided_slice %520 {offsets = [0, 0], sizes = [2, 32], strides = [1, 1]} : vector<2x128xf32> to vector<2x32xf32>
    %523 = vector.extract_strided_slice %520 {offsets = [0, 32], sizes = [2, 32], strides = [1, 1]} : vector<2x128xf32> to vector<2x32xf32>
    %524 = vector.extract_strided_slice %521 {offsets = [0, 64], sizes = [2, 32], strides = [1, 1]} : vector<2x128xf32> to vector<2x32xf32>
    %525 = vector.extract_strided_slice %520 {offsets = [0, 96], sizes = [2, 32], strides = [1, 1]} : vector<2x128xf32> to vector<2x32xf32>
    %526 = arith.mulf %523, %492 : vector<2x32xf32>
    %527 = arith.mulf %522, %524 : vector<2x32xf32>
    %528 = arith.addf %526, %527 : vector<2x32xf32>
    %529 = math.tanh %528 : vector<2x32xf32>
    %530 = arith.mulf %525, %529 : vector<2x32xf32>
    %531 = vector.extract_strided_slice %327 {offsets = [4, 0], sizes = [2, 128], strides = [1, 1]} : vector<16x128xf32> to vector<2x128xf32>
    %cst_93 = arith.constant dense<0.000000e+00> : vector<2x128xf32>
    %532 = tpu.matmul %512, %328, %cst_93 {dimension_numbers = #tpu.dot_dimension_numbers<[1], [0], [0], [1], [0, 0, 1, 1], [], []>} : vector<2x32xf32>, vector<32x128xf32>, vector<2x128xf32> -> vector<2x128xf32>
    %533 = arith.addf %531, %532 : vector<2x128xf32>
    %534 = arith.negf %533 : vector<2x128xf32>
    %535 = math.exp %534 : vector<2x128xf32>
    %cst_94 = arith.constant 1.000000e+00 : f32
    %536 = vector.broadcast %cst_94 : f32 to vector<2x128xf32>
    %537 = arith.addf %536, %535 : vector<2x128xf32>
    %538 = arith.divf %536, %537 : vector<2x128xf32>
    %539 = math.tanh %533 : vector<2x128xf32>
    %540 = vector.extract_strided_slice %538 {offsets = [0, 0], sizes = [2, 32], strides = [1, 1]} : vector<2x128xf32> to vector<2x32xf32>
    %541 = vector.extract_strided_slice %538 {offsets = [0, 32], sizes = [2, 32], strides = [1, 1]} : vector<2x128xf32> to vector<2x32xf32>
    %542 = vector.extract_strided_slice %539 {offsets = [0, 64], sizes = [2, 32], strides = [1, 1]} : vector<2x128xf32> to vector<2x32xf32>
    %543 = vector.extract_strided_slice %538 {offsets = [0, 96], sizes = [2, 32], strides = [1, 1]} : vector<2x128xf32> to vector<2x32xf32>
    %544 = arith.mulf %541, %510 : vector<2x32xf32>
    %545 = arith.mulf %540, %542 : vector<2x32xf32>
    %546 = arith.addf %544, %545 : vector<2x32xf32>
    %547 = math.tanh %546 : vector<2x32xf32>
    %548 = arith.mulf %543, %547 : vector<2x32xf32>
    %549 = vector.extract_strided_slice %318 {offsets = [12, 0], sizes = [2, 128], strides = [1, 1]} : vector<16x128xf32> to vector<2x128xf32>
    %cst_95 = arith.constant dense<0.000000e+00> : vector<2x128xf32>
    %550 = tpu.matmul %530, %319, %cst_95 {dimension_numbers = #tpu.dot_dimension_numbers<[1], [0], [0], [1], [0, 0, 1, 1], [], []>} : vector<2x32xf32>, vector<32x128xf32>, vector<2x128xf32> -> vector<2x128xf32>
    %551 = arith.addf %549, %550 : vector<2x128xf32>
    %552 = arith.negf %551 : vector<2x128xf32>
    %553 = math.exp %552 : vector<2x128xf32>
    %cst_96 = arith.constant 1.000000e+00 : f32
    %554 = vector.broadcast %cst_96 : f32 to vector<2x128xf32>
    %555 = arith.addf %554, %553 : vector<2x128xf32>
    %556 = arith.divf %554, %555 : vector<2x128xf32>
    %557 = math.tanh %551 : vector<2x128xf32>
    %558 = vector.extract_strided_slice %556 {offsets = [0, 0], sizes = [2, 32], strides = [1, 1]} : vector<2x128xf32> to vector<2x32xf32>
    %559 = vector.extract_strided_slice %556 {offsets = [0, 32], sizes = [2, 32], strides = [1, 1]} : vector<2x128xf32> to vector<2x32xf32>
    %560 = vector.extract_strided_slice %557 {offsets = [0, 64], sizes = [2, 32], strides = [1, 1]} : vector<2x128xf32> to vector<2x32xf32>
    %561 = vector.extract_strided_slice %556 {offsets = [0, 96], sizes = [2, 32], strides = [1, 1]} : vector<2x128xf32> to vector<2x32xf32>
    %562 = arith.mulf %559, %528 : vector<2x32xf32>
    %563 = arith.mulf %558, %560 : vector<2x32xf32>
    %564 = arith.addf %562, %563 : vector<2x32xf32>
    %565 = math.tanh %564 : vector<2x32xf32>
    %566 = arith.mulf %561, %565 : vector<2x32xf32>
    %567 = vector.extract_strided_slice %327 {offsets = [2, 0], sizes = [2, 128], strides = [1, 1]} : vector<16x128xf32> to vector<2x128xf32>
    %cst_97 = arith.constant dense<0.000000e+00> : vector<2x128xf32>
    %568 = tpu.matmul %548, %328, %cst_97 {dimension_numbers = #tpu.dot_dimension_numbers<[1], [0], [0], [1], [0, 0, 1, 1], [], []>} : vector<2x32xf32>, vector<32x128xf32>, vector<2x128xf32> -> vector<2x128xf32>
    %569 = arith.addf %567, %568 : vector<2x128xf32>
    %570 = arith.negf %569 : vector<2x128xf32>
    %571 = math.exp %570 : vector<2x128xf32>
    %cst_98 = arith.constant 1.000000e+00 : f32
    %572 = vector.broadcast %cst_98 : f32 to vector<2x128xf32>
    %573 = arith.addf %572, %571 : vector<2x128xf32>
    %574 = arith.divf %572, %573 : vector<2x128xf32>
    %575 = math.tanh %569 : vector<2x128xf32>
    %576 = vector.extract_strided_slice %574 {offsets = [0, 0], sizes = [2, 32], strides = [1, 1]} : vector<2x128xf32> to vector<2x32xf32>
    %577 = vector.extract_strided_slice %574 {offsets = [0, 32], sizes = [2, 32], strides = [1, 1]} : vector<2x128xf32> to vector<2x32xf32>
    %578 = vector.extract_strided_slice %575 {offsets = [0, 64], sizes = [2, 32], strides = [1, 1]} : vector<2x128xf32> to vector<2x32xf32>
    %579 = vector.extract_strided_slice %574 {offsets = [0, 96], sizes = [2, 32], strides = [1, 1]} : vector<2x128xf32> to vector<2x32xf32>
    %580 = arith.mulf %577, %546 : vector<2x32xf32>
    %581 = arith.mulf %576, %578 : vector<2x32xf32>
    %582 = arith.addf %580, %581 : vector<2x32xf32>
    %583 = math.tanh %582 : vector<2x32xf32>
    %584 = arith.mulf %579, %583 : vector<2x32xf32>
    %585 = vector.extract_strided_slice %318 {offsets = [14, 0], sizes = [2, 128], strides = [1, 1]} : vector<16x128xf32> to vector<2x128xf32>
    %cst_99 = arith.constant dense<0.000000e+00> : vector<2x128xf32>
    %586 = tpu.matmul %566, %319, %cst_99 {dimension_numbers = #tpu.dot_dimension_numbers<[1], [0], [0], [1], [0, 0, 1, 1], [], []>} : vector<2x32xf32>, vector<32x128xf32>, vector<2x128xf32> -> vector<2x128xf32>
    %587 = arith.addf %585, %586 : vector<2x128xf32>
    %588 = arith.negf %587 : vector<2x128xf32>
    %589 = math.exp %588 : vector<2x128xf32>
    %cst_100 = arith.constant 1.000000e+00 : f32
    %590 = vector.broadcast %cst_100 : f32 to vector<2x128xf32>
    %591 = arith.addf %590, %589 : vector<2x128xf32>
    %592 = arith.divf %590, %591 : vector<2x128xf32>
    %593 = math.tanh %587 : vector<2x128xf32>
    %594 = vector.extract_strided_slice %592 {offsets = [0, 0], sizes = [2, 32], strides = [1, 1]} : vector<2x128xf32> to vector<2x32xf32>
    %595 = vector.extract_strided_slice %592 {offsets = [0, 32], sizes = [2, 32], strides = [1, 1]} : vector<2x128xf32> to vector<2x32xf32>
    %596 = vector.extract_strided_slice %593 {offsets = [0, 64], sizes = [2, 32], strides = [1, 1]} : vector<2x128xf32> to vector<2x32xf32>
    %597 = vector.extract_strided_slice %592 {offsets = [0, 96], sizes = [2, 32], strides = [1, 1]} : vector<2x128xf32> to vector<2x32xf32>
    %598 = arith.mulf %595, %564 : vector<2x32xf32>
    %599 = arith.mulf %594, %596 : vector<2x32xf32>
    %600 = arith.addf %598, %599 : vector<2x32xf32>
    %601 = math.tanh %600 : vector<2x32xf32>
    %602 = arith.mulf %597, %601 : vector<2x32xf32>
    %603 = vector.extract_strided_slice %327 {offsets = [0, 0], sizes = [2, 128], strides = [1, 1]} : vector<16x128xf32> to vector<2x128xf32>
    %cst_101 = arith.constant dense<0.000000e+00> : vector<2x128xf32>
    %604 = tpu.matmul %584, %328, %cst_101 {dimension_numbers = #tpu.dot_dimension_numbers<[1], [0], [0], [1], [0, 0, 1, 1], [], []>} : vector<2x32xf32>, vector<32x128xf32>, vector<2x128xf32> -> vector<2x128xf32>
    %605 = arith.addf %603, %604 : vector<2x128xf32>
    %606 = arith.negf %605 : vector<2x128xf32>
    %607 = math.exp %606 : vector<2x128xf32>
    %cst_102 = arith.constant 1.000000e+00 : f32
    %608 = vector.broadcast %cst_102 : f32 to vector<2x128xf32>
    %609 = arith.addf %608, %607 : vector<2x128xf32>
    %610 = arith.divf %608, %609 : vector<2x128xf32>
    %611 = math.tanh %605 : vector<2x128xf32>
    %612 = vector.extract_strided_slice %610 {offsets = [0, 0], sizes = [2, 32], strides = [1, 1]} : vector<2x128xf32> to vector<2x32xf32>
    %613 = vector.extract_strided_slice %610 {offsets = [0, 32], sizes = [2, 32], strides = [1, 1]} : vector<2x128xf32> to vector<2x32xf32>
    %614 = vector.extract_strided_slice %611 {offsets = [0, 64], sizes = [2, 32], strides = [1, 1]} : vector<2x128xf32> to vector<2x32xf32>
    %615 = vector.extract_strided_slice %610 {offsets = [0, 96], sizes = [2, 32], strides = [1, 1]} : vector<2x128xf32> to vector<2x32xf32>
    %616 = arith.mulf %613, %582 : vector<2x32xf32>
    %617 = arith.mulf %612, %614 : vector<2x32xf32>
    %618 = arith.addf %616, %617 : vector<2x32xf32>
    %619 = math.tanh %618 : vector<2x32xf32>
    %620 = arith.mulf %615, %619 : vector<2x32xf32>
    %c0_103 = arith.constant 0 : index
    %c0_104 = arith.constant 0 : index
    %621 = vector.load %arg13[%c0_103, %c0_104] : memref<64x8xf32, #tpu.memory_space<vmem>>, vector<32x8xf32>
    %cst_105 = arith.constant dense<0.000000e+00> : vector<2x8xf32>
    %622 = tpu.matmul %602, %621, %cst_105 {dimension_numbers = #tpu.dot_dimension_numbers<[1], [0], [0], [1], [0, 0, 1, 1], [], []>} : vector<2x32xf32>, vector<32x8xf32>, vector<2x8xf32> -> vector<2x8xf32>
    %c0_106 = arith.constant 0 : index
    %c0_107 = arith.constant 0 : index
    %623 = vector.load %arg14[%c0_106, %c0_107] : memref<1x8xf32, #tpu.memory_space<vmem>>, vector<1x8xf32>
    %624 = vector.broadcast %623 : vector<1x8xf32> to vector<2x8xf32>
    %625 = arith.addf %622, %624 : vector<2x8xf32>
    %c32_108 = arith.constant 32 : index
    %c0_109 = arith.constant 0 : index
    %626 = vector.load %arg13[%c32_108, %c0_109] : memref<64x8xf32, #tpu.memory_space<vmem>>, vector<32x8xf32>
    %cst_110 = arith.constant dense<0.000000e+00> : vector<2x8xf32>
    %627 = tpu.matmul %620, %626, %cst_110 {dimension_numbers = #tpu.dot_dimension_numbers<[1], [0], [0], [1], [0, 0, 1, 1], [], []>} : vector<2x32xf32>, vector<32x8xf32>, vector<2x8xf32> -> vector<2x8xf32>
    %628 = arith.addf %625, %627 : vector<2x8xf32>
    %c0_111 = arith.constant 0 : index
    %c0_112 = arith.constant 0 : index
    %629 = vector.load %arg15[%c0_111, %c0_112] : memref<2x8xf32, #tpu.memory_space<vmem>>, vector<2x8xf32>
    tpu.vector_store %arg15[%c0_111, %c0_112], %628 {strides = array<i32>} : memref<2x8xf32, #tpu.memory_space<vmem>>, vector<2x8xf32>,
    return
  }
}

</mosaic_0001>

<bundles_post_ra>
// kernel: plain_lstm_forward.1
= control target key start
LH: loop header
LB: loop body
LE: loop exit
PB: predicated region body
PF: predicated region fallthrough
CT: control target
= control target key end

     0   :  { %s6460_s0 = inlined_call_operand.vmem [shape: f32[16,1], index: 0, kind: input, shape index: {}]   ;;  %s6461_s1 = inlined_call_operand.hbm [shape: f32[1,128], index: 1, kind: input, shape index: {}]   ;;  %s6462_s2 = inlined_call_operand.hbm [shape: f32[32,128], index: 2, kind: input, shape index: {}]   ;;  %s6463_s3 = inlined_call_operand.hbm [shape: f32[1,128], index: 3, kind: input, shape index: {}]   ;;  %s6464_s4 = inlined_call_operand.hbm [shape: f32[1,128], index: 4, kind: input, shape index: {}]   ;;  %s6465_s5 = inlined_call_operand.hbm [shape: f32[32,128], index: 5, kind: input, shape index: {}]   ;;  %s6466_s6 = inlined_call_operand.hbm [shape: f32[1,128], index: 6, kind: input, shape index: {}]   ;;  %s6467_s7 = inlined_call_operand.vmem [shape: f32[64,128], index: 7, kind: input, shape index: {}]   ;;  %s6468_s8 = inlined_call_operand.hbm [shape: f32[32,128], index: 8, kind: input, shape index: {}]   ;;  %s6469_s9 = inlined_call_operand.vmem [shape: f32[1,128], index: 9, kind: input, shape index: {}]   ;;  %s6470_s10 = inlined_call_operand.vmem [shape: f32[64,128], index: 10, kind: input, shape index: {}]   ;;  %s6471_s11 = inlined_call_operand.hbm [shape: f32[32,128], index: 11, kind: input, shape index: {}]   ;;  %s6472_s12 = inlined_call_operand.vmem [shape: f32[1,128], index: 12, kind: input, shape index: {}]   ;;  %s6473_s13 = inlined_call_operand.vmem [shape: f32[64,8], index: 13, kind: input, shape index: {}]   ;;  %s6474_s14 = inlined_call_operand.vmem [shape: f32[1,8], index: 14, kind: input, shape index: {}]   ;;  %s6475_s15 = inlined_call_operand.hbm [shape: f32[2,8], index: 15, kind: output, shape index: {}]  }
   0x1   :  { %6477 = sst [smem:[#allocation23_spill]] %s6475_s15 }
   0x2   :  { %20 = vsyncpa [#allocation3], 0 }
   0x3   :  { %21 = vsyncpa [#allocation6], 0 }
   0x4   :  { %22 = vsyncpa [#allocation9], 0 }
   0x5   :  { %23 = vsyncpa [#allocation12], 0 }
   0x6   :  { %24 = vsyncpa [#allocation15], 0 }
   0x7   :  { %25 = vsyncpa [#allocation4], 0  ;;  %s5559_s18 = smov [#allocation5]   ;;  %s5349_s22 = scalar_lea.hbm %s6462_s2, 512 }
   0x8   :  { %s43_s19 = sshll.u32 %s5559_s18, 4  ;;  %p5350_p0 = scmp.ne.s32.totalorder %s6462_s2, %s5349_s22  ;;  %s44_s19 = int_to_ptr.vmem [resolvable:$true] %s43_s19 }
   0x9   :  { %p5353_p1 = scmp.lt.u32.totalorder %s5349_s22, %s6462_s2 }
   0xb   :  { %p5355_p2 = pnand %p5353_p1, %p5350_p0 }
   0xd   :  { %5358 = shalt.err (!%p5355_p2)
}
   0xe   :  { %s5359_s27 = scalar_lea.vmem %s44_s19, 512  ;;  %p5364_p4 = scmp.lt.s32.totalorder %s44_s19, %s44_s19 }
   0xf   :  { %p5360_p3 = scmp.ne.s32.totalorder %s44_s19, %s5359_s27  ;;  %p5365_p5 = scmp.lt.s32.totalorder %s5359_s27, %s5359_s27 }
  0x11   :  { %p5366_p6 = por %p5365_p5, %p5364_p4 }
  0x13   :  { %p5367_p7 = pnand %p5366_p6, %p5360_p3 }
  0x15   :  { %5370 = shalt.err (!%p5367_p7)
}
  0x16   :  { %s5560_s28 = smov 128   ;;  %s5561_s29 = smov 8  }
  0x17   :  { %49 = dma.hbm_to_vmem [thread:$0]  %s6462_s2, 512, %s44_s19, [#allocation6], %s5560_s28, %s5560_s28, %s5561_s29  }
  0x18   :  { %s5562_s17 = smov [#allocation8]   ;;  %s5563_s20 = smov [#allocation11]  }
  0x19   :  { %s66_s18 = sshll.u32 %s5562_s17, 4  ;;  %s88_s21 = sshll.u32 %s5563_s20, 4  ;;  %s67_s18 = int_to_ptr.vmem [resolvable:$true] %s66_s18  ;;  %s89_s21 = int_to_ptr.vmem [resolvable:$true] %s88_s21 }
  0x1a   :  { %s5371_s24 = scalar_lea.hbm %s6464_s4, 16 }
  0x1b   :  { %p5372_p8 = scmp.ne.s32.totalorder %s6464_s4, %s5371_s24  ;;  %p5375_p9 = scmp.lt.u32.totalorder %s5371_s24, %s6464_s4 }
  0x1d   :  { %p5377_p10 = pnand %p5375_p9, %p5372_p8 }
  0x1f   :  { %5380 = shalt.err (!%p5377_p10)
}
  0x20   :  { %s5381_s2 = scalar_lea.vmem %s67_s18, 16  ;;  %s5385_s19 = scalar_lea.vmem %s67_s18, 32 }
  0x21   :  { %p5382_p11 = scmp.ne.s32.totalorder %s67_s18, %s5381_s2  ;;  %p5386_p12 = scmp.lt.s32.totalorder %s67_s18, %s67_s18 }
  0x22   :  { %p5387_p13 = scmp.lt.s32.totalorder %s5385_s19, %s5381_s2 }
  0x24   :  { %p5388_p0 = por %p5387_p13, %p5386_p12 }
  0x26   :  { %p5389_p1 = pnand %p5388_p0, %p5382_p11 }
  0x28   :  { %5392 = shalt.err (!%p5389_p1)
}
  0x29   :  { %69 = dma.hbm_to_vmem [thread:$0]  %s6464_s4, 16, %s67_s18, [#allocation9]  }
  0x2a   :  { %s5393_s15 = scalar_lea.hbm %s6466_s6, 16 }
  0x2b   :  { %p5394_p2 = scmp.ne.s32.totalorder %s6466_s6, %s5393_s15  ;;  %p5397_p3 = scmp.lt.u32.totalorder %s5393_s15, %s6466_s6 }
  0x2d   :  { %p5399_p4 = pnand %p5397_p3, %p5394_p2 }
  0x2f   :  { %5402 = shalt.err (!%p5399_p4)
}
  0x30   :  { %s5403_s26 = scalar_lea.vmem %s89_s21, 16  ;;  %s5407_s27 = scalar_lea.vmem %s89_s21, 32 }
  0x31   :  { %p5404_p5 = scmp.ne.s32.totalorder %s89_s21, %s5403_s26  ;;  %p5408_p6 = scmp.lt.s32.totalorder %s89_s21, %s89_s21 }
  0x32   :  { %p5409_p7 = scmp.lt.s32.totalorder %s5407_s27, %s5403_s26 }
  0x34   :  { %p5410_p8 = por %p5409_p7, %p5408_p6 }
  0x36   :  { %p5411_p9 = pnand %p5410_p8, %p5404_p5 }
  0x38   :  { %5414 = shalt.err (!%p5411_p9)
}
  0x39   :  { %91 = dma.hbm_to_vmem [thread:$0]  %s6466_s6, 16, %s89_s21, [#allocation12]  }
  0x3a   :  { %s5564_s2 = smov [#allocation2]   ;;  %s5565_s30 = smov [#allocation7]  }
  0x3b   :  { %s34_s19 = sshll.u32 %s5564_s2, 4  ;;  %s56_s16 = sshll.u32 %s5565_s30, 4  ;;  %s35_s19 = int_to_ptr.vmem [resolvable:$true] %s34_s19  ;;  %s57_s16 = int_to_ptr.vmem [resolvable:$true] %s56_s16 }
  0x3c   :  { %s5415_s15 = scalar_lea.hbm %s6461_s1, 16 }
  0x3d   :  { %p5416_p10 = scmp.ne.s32.totalorder %s6461_s1, %s5415_s15  ;;  %p5419_p11 = scmp.lt.u32.totalorder %s5415_s15, %s6461_s1 }
  0x3f   :  { %p5421_p12 = pnand %p5419_p11, %p5416_p10 }
  0x41   :  { %5424 = shalt.err (!%p5421_p12)
}
  0x42   :  { %s5425_s6 = scalar_lea.vmem %s35_s19, 16  ;;  %s5429_s21 = scalar_lea.vmem %s35_s19, 32 }
  0x43   :  { %p5426_p13 = scmp.ne.s32.totalorder %s35_s19, %s5425_s6  ;;  %p5430_p0 = scmp.lt.s32.totalorder %s35_s19, %s35_s19 }
  0x44   :  { %p5431_p1 = scmp.lt.s32.totalorder %s5429_s21, %s5425_s6 }
  0x46   :  { %p5432_p2 = por %p5431_p1, %p5430_p0 }
  0x48   :  { %p5433_p3 = pnand %p5432_p2, %p5426_p13 }
  0x4a   :  { %5436 = shalt.err (!%p5433_p3)
}
  0x4b   :  { %37 = dma.hbm_to_vmem [thread:$0]  %s6461_s1, 16, %s35_s19, [#allocation3]  }
  0x4c   :  { %s5437_s2 = scalar_lea.hbm %s6463_s3, 16 }
  0x4d   :  { %p5438_p4 = scmp.ne.s32.totalorder %s6463_s3, %s5437_s2  ;;  %p5441_p5 = scmp.lt.u32.totalorder %s5437_s2, %s6463_s3 }
  0x4f   :  { %p5443_p6 = pnand %p5441_p5, %p5438_p4 }
  0x51   :  { %5446 = shalt.err (!%p5443_p6)
}
  0x52   :  { %s5447_s22 = scalar_lea.vmem %s57_s16, 16  ;;  %s5451_s23 = scalar_lea.vmem %s57_s16, 32 }
  0x53   :  { %p5448_p7 = scmp.ne.s32.totalorder %s57_s16, %s5447_s22  ;;  %p5452_p8 = scmp.lt.s32.totalorder %s57_s16, %s57_s16 }
  0x54   :  { %p5453_p9 = scmp.lt.s32.totalorder %s5451_s23, %s5447_s22 }
  0x56   :  { %p5454_p10 = por %p5453_p9, %p5452_p8 }
  0x58   :  { %p5455_p11 = pnand %p5454_p10, %p5448_p7 }
  0x5a   :  { %5458 = shalt.err (!%p5455_p11)
}
  0x5b   :  { %59 = dma.hbm_to_vmem [thread:$0]  %s6463_s3, 16, %s57_s16, [#allocation6]  }
  0x5c   :  { %s5566_s24 = smov [#allocation10]   ;;  %s5567_s6 = smov [#allocation13]  }
  0x5d   :  { %s75_s25 = sshll.u32 %s5566_s24, 4  ;;  %s99_s21 = sshll.u32 %s5567_s6, 4  ;;  %s76_s25 = int_to_ptr.vmem [resolvable:$true] %s75_s25  ;;  %s100_s21 = int_to_ptr.vmem [resolvable:$true] %s99_s21 }
  0x5e   :  { %s5459_s4 = scalar_lea.hbm %s6465_s5, 512 }
  0x5f   :  { %p5460_p12 = scmp.ne.s32.totalorder %s6465_s5, %s5459_s4  ;;  %p5463_p13 = scmp.lt.u32.totalorder %s5459_s4, %s6465_s5 }
  0x61   :  { %p5465_p0 = pnand %p5463_p13, %p5460_p12 }
  0x63   :  { %5468 = shalt.err (!%p5465_p0)
}
  0x64   :  { %s5469_s3 = scalar_lea.vmem %s76_s25, 512  ;;  %p5474_p2 = scmp.lt.s32.totalorder %s76_s25, %s76_s25 }
  0x65   :  { %p5470_p1 = scmp.ne.s32.totalorder %s76_s25, %s5469_s3  ;;  %p5475_p3 = scmp.lt.s32.totalorder %s5469_s3, %s5469_s3 }
  0x67   :  { %p5476_p4 = por %p5475_p3, %p5474_p2 }
  0x69   :  { %p5477_p5 = pnand %p5476_p4, %p5470_p1 }
  0x6b   :  { %5480 = shalt.err (!%p5477_p5)
}
  0x6c   :  { %81 = dma.hbm_to_vmem [thread:$0]  %s6465_s5, 512, %s76_s25, [#allocation9], %s5560_s28, %s5560_s28, %s5561_s29  }
  0x6d   :  { %s5481_s23 = scalar_lea.hbm %s6468_s8, 512 }
  0x6e   :  { %p5482_p6 = scmp.ne.s32.totalorder %s6468_s8, %s5481_s23  ;;  %p5485_p7 = scmp.lt.u32.totalorder %s5481_s23, %s6468_s8 }
  0x70   :  { %p5487_p8 = pnand %p5485_p7, %p5482_p6 }
  0x72   :  { %5490 = shalt.err (!%p5487_p8)
}
  0x73   :  { %s5491_s26 = scalar_lea.vmem %s100_s21, 512  ;;  %p5496_p10 = scmp.lt.s32.totalorder %s100_s21, %s100_s21 }
  0x74   :  { %p5492_p9 = scmp.ne.s32.totalorder %s100_s21, %s5491_s26  ;;  %p5497_p11 = scmp.lt.s32.totalorder %s5491_s26, %s5491_s26 }
  0x76   :  { %p5498_p12 = por %p5497_p11, %p5496_p10 }
  0x78   :  { %p5499_p13 = pnand %p5498_p12, %p5492_p9 }
  0x7a   :  { %5502 = shalt.err (!%p5499_p13)
}
  0x7b   :  { %105 = dma.hbm_to_vmem [thread:$0]  %s6468_s8, 512, %s100_s21, [#allocation12], %s5560_s28, %s5560_s28, %s5561_s29  }
  0x7c   :  { %s5568_s27 = smov [#allocation14]   ;;  %s5503_s30 = scalar_lea.hbm %s6471_s11, 512 }
  0x7d   :  { %s115_s4 = sshll.u32 %s5568_s27, 4  ;;  %p5504_p0 = scmp.ne.s32.totalorder %s6471_s11, %s5503_s30  ;;  %s116_s4 = int_to_ptr.vmem [resolvable:$true] %s115_s4 }
  0x7e   :  { %p5507_p1 = scmp.lt.u32.totalorder %s5503_s30, %s6471_s11 }
  0x80   :  { %p5509_p2 = pnand %p5507_p1, %p5504_p0 }
  0x82   :  { %5512 = shalt.err (!%p5509_p2)
}
  0x83   :  { %s5513_s15 = scalar_lea.vmem %s116_s4, 512  ;;  %p5518_p4 = scmp.lt.s32.totalorder %s116_s4, %s116_s4 }
  0x84   :  { %p5514_p3 = scmp.ne.s32.totalorder %s116_s4, %s5513_s15  ;;  %p5519_p5 = scmp.lt.s32.totalorder %s5513_s15, %s5513_s15 }
  0x86   :  { %p5520_p6 = por %p5519_p5, %p5518_p4 }
  0x88   :  { %p5521_p7 = pnand %p5520_p6, %p5514_p3 }
  0x8a   :  { %5524 = shalt.err (!%p5521_p7)
}
  0x8b   :  { %121 = dma.hbm_to_vmem [thread:$0]  %s6471_s11, 512, %s116_s4, [#allocation15], %s5560_s28, %s5560_s28, %s5561_s29  }
  0x8c   :  { %5547 = dma.done.wait [#allocation3], 16  }
  0x8d   :  { %5548 = vsyncadd [#allocation3], 4294967280 }
  0x8e   :  { %5549 = dma.done.wait [#allocation6], 528  }
  0x8f   :  { %5550 = vsyncadd [#allocation6], 4294966768 }
  0x90   :  { %5551 = dma.done.wait [#allocation9], 528  }
  0x91   :  { %5552 = vsyncadd [#allocation9], 4294966768 }
  0x92   :  { %5553 = dma.done.wait [#allocation12], 528  }
  0x93   :  { %5554 = vsyncadd [#allocation12], 4294966768 }
  0x94   :  { %5555 = dma.done.wait [#allocation15], 512  }
  0x95   :  { %5556 = vsyncadd [#allocation15], 4294966784  ;;  %v5569_v0 = vmov 0.0|0.0   ;;  %vm5570_vm0 = vmmov 0   ;;  %v5571_v1 = vmov 0.0   ;;  %v5572_v2 = vmov 0  }
  0x96   :  { %4828 = vmatprep.subr.bf16.mxu1 %v5569_v0  ;;  %4418 = vmatprep.mubr.msk.f32.mxu1 %vm5570_vm0, %v5571_v1  ;;  %v182_v3 = vld [vmem:[#allocation5] sm:$0xff]  ;;  %v183_v4 = vld [vmem:[#allocation5 + $0x8] sm:$0xff]  ;;  %v184_v5 = vld [vmem:[#allocation5 + $0x10] sm:$0xff]  ;;  %s5574_s23 = smov 32   ;;  %vm208_vm1 = vcmask 261120   ;;  %vm1891_vm2 = vcmask 1041408  }
  0x97   :  { %5092 = vset.pattern.permute.xlu0 %v5572_v2  ;;  %4840 = vmatprep.subr.bf16.mxu0 %v5569_v0  ;;  %v5770_v6 = vpack.c.bf16 %v183_v4, %v182_v3  ;;  %v185_v7 = vld [vmem:[#allocation5 + $0x18] sm:$0xff]  ;;  %v204_v10 = vld [vmem:[#allocation10] sm:$0xff]  ;;  %v205_v11 = vld [vmem:[#allocation10 + $0x8] sm:$0xff]  ;;  %vm1893_vm3 = vcmask 1043456   ;;  %vm1895_vm4 = vcmask 1045504   ;;  %s5575_s24 = smov [#allocation16]  }
  0x98   :  { %4440 = vmatprep.mubr.msk.f32.mxu0 %vm5570_vm0, %v5571_v1  ;;  %v152_v8 = vld [vmem:[%s6460_s0] sm:$0xff]  ;;  %v5776_v9 = vpack.c.bf16 %v185_v7, %v184_v5  ;;  %v153_v12 = vld [vmem:[%s6460_s0 + $0x8] sm:$0xff]  ;;  %v5785_v13 = vpack.c.bf16 %v205_v11, %v204_v10  ;;  %v206_v14 = vld [vmem:[#allocation10 + $0x10] sm:$0xff]  ;;  %s5573_s0 = smov 64   ;;  %vm4118_vm5 = vcmask 58368  }
  0x99   :  { %4830 = vmatpush3.bf16.msra.mxu1 %v5770_v6  ;;  %158 = vperm.xlu0 %5092, %v152_v8   ;;  %v207_v15 = vld [vmem:[#allocation10 + $0x18] sm:$0xff]  ;;  %v4142_v18 = vld [vmem:[#allocation11] ss:$0 sm:$0xff] }
  0x9a   :  { %4831 = vmatprep.subr.bf16.mxu1 %v5569_v0  ;;  %4842 = vmatpush3.bf16.msra.mxu0 %v5770_v6  ;;  %v5792_v16 = vpack.c.bf16 %v207_v15, %v206_v14  ;;  %v4141_v17 = vld [vmem:[#allocation8] ss:$0 sm:$0xff]  ;;  %v4139_v22 = vld [vmem:[#allocation2] ss:$0 sm:$0xff]  ;;  %v4140_v25 = vld [vmem:[#allocation7] ss:$0 sm:$0xff] }
  0x9b   :  { %4843 = vmatprep.subr.bf16.mxu0 %v5569_v0 }
  0x9d   :  { %4833 = vmatpush3.bf16.msra.mxu1 %v5776_v9  ;;  %163 = vperm.xlu0 %5092, %v153_v12  }
  0x9e   :  { %4834 = vmatprep.subr.bf16.mxu1 %v5569_v0  ;;  %4845 = vmatpush3.bf16.msra.mxu0 %v5776_v9 }
  0x9f   :  { %4852 = vmatprep.subr.bf16.mxu0 %v5569_v0 }
  0xa0   :  { %4419 = vmatmul.mubr.f32.vlgmr.msra.gmra.mrb[0].mxu1 %v5571_v1 }
  0xa1   :  { %4836 = vmatpush3.bf16.msra.mxu1 %v5785_v13  ;;  %4429 = vmatprep.mubr.msk.f32.mxu1 %vm5570_vm0, %v5571_v1 }
  0xa2   :  { %4837 = vmatprep.subr.bf16.mxu1 %v5569_v0 }
  0xa5   :  { %4839 = vmatpush3.bf16.msra.mxu1 %v5792_v16 }
  0xa6   :  { %4846 = vmatprep.subr.bf16.mxu1 %v5569_v0 }
  0xa8   :  { %4430 = vmatmul.mubr.f32.vlgmr.msra.gmra.mrb[2].mxu1 %v5571_v1 }
  0xa9   :  { %4848 = vmatpush3.bf16.msra.mxu1 %v5785_v13  ;;  %4451 = vmatprep.mubr.msk.f32.mxu1 %vm5570_vm0, %v5571_v1 }
  0xaa   :  { %4849 = vmatprep.subr.bf16.mxu1 %v5569_v0 }
  0xad   :  { %4851 = vmatpush3.bf16.msra.mxu1 %v5792_v16 }
  0xae   :  { %4858 = vmatprep.subr.bf16.mxu1 %v5569_v0 }
 0x118   :  { %v159_v19 = vpop.permute.xlu0 %158 }
 0x119   :  { %v194_v20 = vmul.f32 %v4141_v17, %v159_v19  ;;  %v172_v27 = vmul.f32 %v4139_v22, %v159_v19 }
 0x11b   :  { %v5806_v21 = vadd.f32 %v4142_v18, %v194_v20  ;;  %v5810_v28 = vadd.f32 %v4140_v25, %v172_v27 }
 0x11c   :  { %v164_v23 = vpop.permute.xlu0 %163 }
 0x11d   :  { %v173_v24 = vmul.f32 %v4139_v22, %v164_v23  ;;  %v195_v32 = vmul.f32 %v4141_v17, %v164_v23 }
 0x11f   :  { %v5808_v26 = vadd.f32 %v4140_v25, %v173_v24  ;;  %v5813_v34 = vadd.f32 %v4142_v18, %v195_v32 }
 0x173   :  { %v278_v29 = vpop.f32.mrb[0].mxu1 }
 0x174   :  { %v282_v30 = vadd.f32 %v278_v29, %v5810_v28  ;;  %v4420_v31 = vpop.f32.mrb[1].mxu1 }
 0x176   :  { %5093 = vtanh.f32 %v282_v30  ;;  %v4143_v40 = vmul.f32 -1.442695, %v282_v30 }
 0x17b   :  { %v373_v33 = vpop.f32.mrb[2].mxu1 }
 0x17c   :  { %v378_v35 = vrot.slane %v373_v33, 2  ;;  %v4431_v36 = vpop.f32.mrb[3].mxu1 }
 0x17e   :  { %v380_v37 = vadd.f32 %v378_v35, %v5813_v34 }
 0x180   :  { %v5094_v38 = vpop.eup %5093  ;;  %5095 = vtanh.f32 %v380_v37  ;;  %v4144_v41 = vmul.f32 -1.442695, %v380_v37 }
 0x181   :  { %292 = vrot.lane.b32.xlu1 %v5094_v38, %s5573_s0  ;;  %5097 = vpow2.f32 %v4143_v40 }
 0x182   :  { %5099 = vpow2.f32 %v4144_v41 }
 0x18a   :  { %v5096_v39 = vpop.eup %5095 }
 0x18b   :  { %390 = vrot.lane.b32.xlu1 %v5096_v39, %s5573_s0  ;;  %v5098_v42 = vpop.eup %5097 }
 0x18c   :  { %v286_v43 = vadd.f32 1.0, %v5098_v42  ;;  %v5100_v44 = vpop.eup %5099 }
 0x18d   :  { %v384_v45 = vadd.f32 1.0, %v5100_v44 }
 0x18e   :  { %5101 = vrcp.f32 %v286_v43 }
 0x18f   :  { %5103 = vrcp.f32 %v384_v45 }
 0x198   :  { %v5102_v46 = vpop.eup %5101 }
 0x199   :  { %v5104_v49 = vpop.eup %5103  ;;  %v290_v52 = vmul.f32 0.0, %v5102_v46 }
 0x19a   :  { %v388_v55 = vmul.f32 0.0, %v5104_v49 }
 0x1f3   :  { %v293_v47 = vpop.permute.xlu1 %292 }
 0x1f4   :  { %v295_v48 = vmul.f32 %v5102_v46, %v293_v47 }
 0x1f6   :  { %297 = vrot.lane.b32.xlu0 %v295_v48, %s5574_s23 }
 0x1fd   :  { %v391_v50 = vpop.permute.xlu1 %390 }
 0x1fe   :  { %v393_v51 = vmul.f32 %v5104_v49, %v391_v50 }
 0x200   :  { %395 = vrot.lane.b32.xlu1 %v393_v51, %s5574_s23 }
 0x268   :  { %v298_v53 = vpop.permute.xlu0 %297 }
 0x269   :  { %v5820_v54 = vadd.f32 %v298_v53, %v290_v52 }
 0x26b   :  { %5105 = vtanh.f32 %v5820_v54  ;;  %v492_v35 = vrot.slane %v5820_v54, 6 }
 0x272   :  { %v396_v56 = vpop.permute.xlu1 %395 }
 0x273   :  { %v5823_v57 = vadd.f32 %v396_v56, %v388_v55 }
 0x275   :  { %v5106_v58 = vpop.eup %5105  ;;  %5107 = vtanh.f32 %v5823_v57  ;;  %v599_v39 = vrot.slane %v5823_v57, 2 }
 0x276   :  { %303 = vrot.lane.b32.xlu0 %v5106_v58, %s5573_s0 }
 0x27f   :  { %v5108_v59 = vpop.eup %5107 }
 0x280   :  { %401 = vrot.lane.b32.xlu1 %v5108_v59, %s5573_s0 }
 0x2e8   :  { %v304_v60 = vpop.permute.xlu0 %303 }
 0x2e9   :  { %v5828_v61 = vmul.f32 %v5102_v46, %v304_v60 }
 0x2eb   :  { %406 = vrot.lane.b32.xlu0 %v5828_v61, %s5574_s23 }
 0x2f2   :  { %v402_v62 = vpop.permute.xlu1 %401 }
 0x2f3   :  { %v5832_v63 = vmul.f32 %v5104_v49, %v402_v62 }
 0x2f5   :  { %v512_v2 = vrot.slane %v5832_v63, 6 }
 0x2f7   :  { %513 = vrot.lane.b32.xlu1 %v512_v2, %s5574_s23 }
 0x35d   :  { %v407_v3 = vpop.permute.xlu0 %406 }
 0x35e   :  { %4441 = vmatmul.mubr.msk.f32.vlgmr.msra.gmra.mrb[0].mxu0 %vm208_vm1, %v407_v3 }
 0x35f   :  { %4854 = vmatpush3.bf16.msra.mxu0 %v5770_v6  ;;  %4462 = vmatprep.mubr.msk.f32.mxu0 %vm5570_vm0, %v5571_v1 }
 0x360   :  { %4855 = vmatprep.subr.bf16.mxu0 %v5569_v0 }
 0x363   :  { %4857 = vmatpush3.bf16.msra.mxu0 %v5776_v9 }
 0x364   :  { %4864 = vmatprep.subr.bf16.mxu0 %v5569_v0 }
 0x369   :  { %v514_v4 = vpop.permute.xlu1 %513 }
 0x36a   :  { %4452 = vmatmul.mubr.msk.f32.vlgmr.msra.gmra.mrb[4].mxu1 %vm208_vm1, %v514_v4 }
 0x36b   :  { %4860 = vmatpush3.bf16.msra.mxu1 %v5785_v13  ;;  %4473 = vmatprep.mubr.msk.f32.mxu1 %vm5570_vm0, %v5571_v1 }
 0x36c   :  { %4861 = vmatprep.subr.bf16.mxu1 %v5569_v0 }
 0x36f   :  { %4863 = vmatpush3.bf16.msra.mxu1 %v5792_v16 }
 0x370   :  { %4870 = vmatprep.subr.bf16.mxu1 %v5569_v0 }
 0x431   :  { %v476_v5 = vpop.f32.mrb[0].mxu0 }
 0x432   :  { %v481_v7 = vrot.slane %v476_v5, 6  ;;  %v4442_v8 = vpop.f32.mrb[1].mxu0 }
 0x434   :  { %v483_v10 = vadd.f32 %v481_v7, %v5810_v28 }
 0x436   :  { %5109 = vtanh.f32 %v483_v10  ;;  %v4146_v19 = vmul.f32 -1.442695, %v483_v10 }
 0x43d   :  { %v583_v11 = vpop.f32.mrb[4].mxu1 }
 0x43e   :  { %v588_v12 = vrot.slane %v583_v11, 4  ;;  %v4453_v14 = vpop.f32.mrb[5].mxu1 }
 0x440   :  { %v5110_v15 = vpop.eup %5109  ;;  %v590_v17 = vadd.f32 %v588_v12, %v5813_v34 }
 0x441   :  { %496 = vrot.lane.b32.xlu0 %v5110_v15, %s5573_s0 }
 0x442   :  { %5111 = vtanh.f32 %v590_v17  ;;  %v4148_v20 = vmul.f32 -1.442695, %v590_v17 }
 0x443   :  { %5113 = vpow2.f32 %v4146_v19 }
 0x444   :  { %5115 = vpow2.f32 %v4148_v20 }
 0x44c   :  { %v5112_v18 = vpop.eup %5111 }
 0x44d   :  { %603 = vrot.lane.b32.xlu1 %v5112_v18, %s5573_s0  ;;  %v5114_v22 = vpop.eup %5113 }
 0x44e   :  { %v487_v23 = vadd.f32 1.0, %v5114_v22  ;;  %v5116_v24 = vpop.eup %5115 }
 0x44f   :  { %v594_v25 = vadd.f32 1.0, %v5116_v24 }
 0x450   :  { %5117 = vrcp.f32 %v487_v23 }
 0x451   :  { %5119 = vrcp.f32 %v594_v25 }
 0x45a   :  { %v5118_v27 = vpop.eup %5117 }
 0x45b   :  { %v5120_v31 = vpop.eup %5119  ;;  %v494_v36 = vmul.f32 %v5118_v27, %v492_v35 }
 0x45c   :  { %v601_v40 = vmul.f32 %v5120_v31, %v599_v39 }
 0x4b3   :  { %v497_v29 = vpop.permute.xlu0 %496 }
 0x4b4   :  { %v499_v30 = vmul.f32 %v5118_v27, %v497_v29 }
 0x4b6   :  { %501 = vrot.lane.b32.xlu0 %v499_v30, %s5574_s23 }
 0x4bf   :  { %v604_v32 = vpop.permute.xlu1 %603 }
 0x4c0   :  { %v606_v33 = vmul.f32 %v5120_v31, %v604_v32 }
 0x4c2   :  { %608 = vrot.lane.b32.xlu1 %v606_v33, %s5574_s23 }
 0x528   :  { %v502_v37 = vpop.permute.xlu0 %501 }
 0x529   :  { %v5857_v38 = vadd.f32 %v502_v37, %v494_v36 }
 0x52b   :  { %5121 = vtanh.f32 %v5857_v38  ;;  %v706_v19 = vrot.slane %v5857_v38, 6 }
 0x534   :  { %v609_v41 = vpop.permute.xlu1 %608 }
 0x535   :  { %v5122_v42 = vpop.eup %5121  ;;  %v5861_v43 = vadd.f32 %v609_v41, %v601_v40 }
 0x536   :  { %507 = vrot.lane.b32.xlu0 %v5122_v42, %s5573_s0 }
 0x537   :  { %5123 = vtanh.f32 %v5861_v43  ;;  %v813_v24 = vrot.slane %v5861_v43, 2 }
 0x541   :  { %v5124_v44 = vpop.eup %5123 }
 0x542   :  { %614 = vrot.lane.b32.xlu1 %v5124_v44, %s5573_s0 }
 0x5a8   :  { %v508_v45 = vpop.permute.xlu0 %507 }
 0x5a9   :  { %v5866_v46 = vmul.f32 %v5118_v27, %v508_v45 }
 0x5ab   :  { %v619_v47 = vrot.slane %v5866_v46, 2  ;;  %v1892_v35 = vsel %vm1891_vm2, %v5828_v61, %v5866_v46 }
 0x5ad   :  { %620 = vrot.lane.b32.xlu0 %v619_v47, %s5574_s23 }
 0x5b4   :  { %v615_v48 = vpop.permute.xlu1 %614 }
 0x5b5   :  { %v5870_v49 = vmul.f32 %v5120_v31, %v615_v48 }
 0x5b7   :  { %v726_v50 = vrot.slane %v5870_v49, 4 }
 0x5b9   :  { %727 = vrot.lane.b32.xlu1 %v726_v50, %s5574_s23 }
 0x61f   :  { %v621_v51 = vpop.permute.xlu0 %620 }
 0x620   :  { %4463 = vmatmul.mubr.msk.f32.vlgmr.msra.gmra.mrb[2].mxu0 %vm208_vm1, %v621_v51 }
 0x621   :  { %4866 = vmatpush3.bf16.msra.mxu0 %v5770_v6  ;;  %4484 = vmatprep.mubr.msk.f32.mxu0 %vm5570_vm0, %v5571_v1 }
 0x622   :  { %4867 = vmatprep.subr.bf16.mxu0 %v5569_v0 }
 0x625   :  { %4869 = vmatpush3.bf16.msra.mxu0 %v5776_v9 }
 0x626   :  { %4876 = vmatprep.subr.bf16.mxu0 %v5569_v0 }
 0x62b   :  { %v728_v52 = vpop.permute.xlu1 %727 }
 0x62c   :  { %4474 = vmatmul.mubr.msk.f32.vlgmr.msra.gmra.mrb[6].mxu1 %vm208_vm1, %v728_v52 }
 0x62d   :  { %4872 = vmatpush3.bf16.msra.mxu1 %v5785_v13  ;;  %4495 = vmatprep.mubr.msk.f32.mxu1 %vm5570_vm0, %v5571_v1 }
 0x62e   :  { %4873 = vmatprep.subr.bf16.mxu1 %v5569_v0 }
 0x631   :  { %4875 = vmatpush3.bf16.msra.mxu1 %v5792_v16 }
 0x632   :  { %4882 = vmatprep.subr.bf16.mxu1 %v5569_v0 }
 0x6f3   :  { %v690_v53 = vpop.f32.mrb[2].mxu0 }
 0x6f4   :  { %v695_v54 = vrot.slane %v690_v53, 4  ;;  %v4464_v55 = vpop.f32.mrb[3].mxu0 }
 0x6f6   :  { %v697_v56 = vadd.f32 %v695_v54, %v5810_v28 }
 0x6f8   :  { %5125 = vtanh.f32 %v697_v56  ;;  %v4150_v3 = vmul.f32 -1.442695, %v697_v56 }
 0x6ff   :  { %v797_v57 = vpop.f32.mrb[6].mxu1 }
 0x700   :  { %v802_v58 = vrot.slane %v797_v57, 6  ;;  %v4475_v59 = vpop.f32.mrb[7].mxu1 }
 0x702   :  { %v5126_v60 = vpop.eup %5125  ;;  %v804_v62 = vadd.f32 %v802_v58, %v5813_v34 }
 0x703   :  { %710 = vrot.lane.b32.xlu0 %v5126_v60, %s5573_s0 }
 0x704   :  { %5127 = vtanh.f32 %v804_v62  ;;  %v4152_v4 = vmul.f32 -1.442695, %v804_v62 }
 0x705   :  { %5129 = vpow2.f32 %v4150_v3 }
 0x706   :  { %5131 = vpow2.f32 %v4152_v4 }
 0x70e   :  { %v5128_v2 = vpop.eup %5127 }
 0x70f   :  { %817 = vrot.lane.b32.xlu1 %v5128_v2, %s5573_s0  ;;  %v5130_v5 = vpop.eup %5129 }
 0x710   :  { %v701_v7 = vadd.f32 1.0, %v5130_v5  ;;  %v5132_v8 = vpop.eup %5131 }
 0x711   :  { %v808_v10 = vadd.f32 1.0, %v5132_v8 }
 0x712   :  { %5133 = vrcp.f32 %v701_v7 }
 0x713   :  { %5135 = vrcp.f32 %v808_v10 }
 0x71c   :  { %v5134_v11 = vpop.eup %5133 }
 0x71d   :  { %v5136_v15 = vpop.eup %5135  ;;  %v708_v20 = vmul.f32 %v5134_v11, %v706_v19 }
 0x71e   :  { %v815_v25 = vmul.f32 %v5136_v15, %v813_v24 }
 0x775   :  { %v711_v12 = vpop.permute.xlu0 %710 }
 0x776   :  { %v713_v14 = vmul.f32 %v5134_v11, %v711_v12 }
 0x778   :  { %715 = vrot.lane.b32.xlu0 %v713_v14, %s5574_s23 }
 0x781   :  { %v818_v17 = vpop.permute.xlu1 %817 }
 0x782   :  { %v820_v18 = vmul.f32 %v5136_v15, %v818_v17 }
 0x784   :  { %822 = vrot.lane.b32.xlu1 %v820_v18, %s5574_s23 }
 0x7ea   :  { %v716_v22 = vpop.permute.xlu0 %715 }
 0x7eb   :  { %v5895_v23 = vadd.f32 %v716_v22, %v708_v20 }
 0x7ed   :  { %5137 = vtanh.f32 %v5895_v23  ;;  %v920_v2 = vrot.slane %v5895_v23, 6 }
 0x7f6   :  { %v823_v27 = vpop.permute.xlu1 %822 }
 0x7f7   :  { %v5138_v29 = vpop.eup %5137  ;;  %v5899_v30 = vadd.f32 %v823_v27, %v815_v25 }
 0x7f8   :  { %721 = vrot.lane.b32.xlu0 %v5138_v29, %s5573_s0 }
 0x7f9   :  { %5139 = vtanh.f32 %v5899_v30  ;;  %v1024_v7 = vrot.slane %v5899_v30, 2 }
 0x803   :  { %v5140_v31 = vpop.eup %5139 }
 0x804   :  { %828 = vrot.lane.b32.xlu1 %v5140_v31, %s5573_s0 }
 0x86a   :  { %v722_v32 = vpop.permute.xlu0 %721 }
 0x86b   :  { %v724_v33 = vmul.f32 %v5134_v11, %v722_v32 }
 0x86d   :  { %v833_v36 = vrot.slane %v724_v33, 4  ;;  %v5908_v37 = vsel %vm1893_vm3, %v1892_v35, %v724_v33 }
 0x86f   :  { %834 = vrot.lane.b32.xlu0 %v833_v36, %s5574_s23 }
 0x876   :  { %v829_v38 = vpop.permute.xlu1 %828 }
 0x877   :  { %v5911_v39 = vmul.f32 %v5136_v15, %v829_v38 }
 0x879   :  { %v940_v40 = vrot.slane %v5911_v39, 2 }
 0x87b   :  { %941 = vrot.lane.b32.xlu1 %v940_v40, %s5574_s23 }
 0x8e1   :  { %v835_v41 = vpop.permute.xlu0 %834 }
 0x8e2   :  { %4485 = vmatmul.mubr.msk.f32.vlgmr.msra.gmra.mrb[4].mxu0 %vm208_vm1, %v835_v41 }
 0x8e3   :  { %4878 = vmatpush3.bf16.msra.mxu0 %v5770_v6  ;;  %4506 = vmatprep.mubr.msk.f32.mxu0 %vm5570_vm0, %v5571_v1 }
 0x8e4   :  { %4879 = vmatprep.subr.bf16.mxu0 %v5569_v0 }
 0x8e7   :  { %4881 = vmatpush3.bf16.msra.mxu0 %v5776_v9 }
 0x8e8   :  { %4888 = vmatprep.subr.bf16.mxu0 %v5569_v0 }
 0x8ed   :  { %v942_v61 = vpop.permute.xlu1 %941 }
 0x8ee   :  { %4496 = vmatmul.mubr.msk.f32.vlgmr.msra.gmra.mrb[8].mxu1 %vm208_vm1, %v942_v61 }
 0x8ef   :  { %4884 = vmatpush3.bf16.msra.mxu1 %v5785_v13  ;;  %4517 = vmatprep.mubr.msk.f32.mxu1 %vm5570_vm0, %v5571_v1 }
 0x8f0   :  { %4885 = vmatprep.subr.bf16.mxu1 %v5569_v0 }
 0x8f3   :  { %4887 = vmatpush3.bf16.msra.mxu1 %v5792_v16 }
 0x8f4   :  { %4894 = vmatprep.subr.bf16.mxu1 %v5569_v0 }
 0x9b5   :  { %v904_v42 = vpop.f32.mrb[4].mxu0 }
 0x9b6   :  { %v909_v43 = vrot.slane %v904_v42, 2  ;;  %v4486_v44 = vpop.f32.mrb[5].mxu0 }
 0x9b8   :  { %v911_v45 = vadd.f32 %v909_v43, %v5810_v28 }
 0x9ba   :  { %5141 = vtanh.f32 %v911_v45  ;;  %v4154_v52 = vmul.f32 -1.442695, %v911_v45 }
 0x9c1   :  { %v1011_v46 = vpop.f32.mrb[8].mxu1 }
 0x9c2   :  { %v1015_v47 = vadd.f32 %v1011_v46, %v5813_v34  ;;  %v4497_v48 = vpop.f32.mrb[9].mxu1 }
 0x9c4   :  { %v5142_v50 = vpop.eup %5141  ;;  %5143 = vtanh.f32 %v1015_v47  ;;  %v4156_v53 = vmul.f32 -1.442695, %v1015_v47 }
 0x9c5   :  { %924 = vrot.lane.b32.xlu0 %v5142_v50, %s5573_s0  ;;  %5145 = vpow2.f32 %v4154_v52 }
 0x9c6   :  { %5147 = vpow2.f32 %v4156_v53 }
 0x9ce   :  { %v5144_v51 = vpop.eup %5143 }
 0x9cf   :  { %1028 = vrot.lane.b32.xlu1 %v5144_v51, %s5573_s0  ;;  %v5146_v54 = vpop.eup %5145 }
 0x9d0   :  { %v915_v55 = vadd.f32 1.0, %v5146_v54  ;;  %v5148_v28 = vpop.eup %5147 }
 0x9d1   :  { %v1019_v56 = vadd.f32 1.0, %v5148_v28 }
 0x9d2   :  { %5149 = vrcp.f32 %v915_v55 }
 0x9d3   :  { %5151 = vrcp.f32 %v1019_v56 }
 0x9dc   :  { %v5150_v57 = vpop.eup %5149 }
 0x9dd   :  { %v5152_v59 = vpop.eup %5151  ;;  %v922_v3 = vmul.f32 %v5150_v57, %v920_v2 }
 0x9de   :  { %v1026_v8 = vmul.f32 %v5152_v59, %v1024_v7 }
 0xa37   :  { %v925_v34 = vpop.permute.xlu0 %924 }
 0xa38   :  { %v927_v58 = vmul.f32 %v5150_v57, %v925_v34 }
 0xa3a   :  { %929 = vrot.lane.b32.xlu0 %v927_v58, %s5574_s23 }
 0xa41   :  { %v1029_v60 = vpop.permute.xlu1 %1028 }
 0xa42   :  { %v1031_v62 = vmul.f32 %v5152_v59, %v1029_v60 }
 0xa44   :  { %1033 = vrot.lane.b32.xlu1 %v1031_v62, %s5574_s23 }
 0xaac   :  { %v930_v4 = vpop.permute.xlu0 %929 }
 0xaad   :  { %v5936_v5 = vadd.f32 %v930_v4, %v922_v3 }
 0xaaf   :  { %5153 = vtanh.f32 %v5936_v5  ;;  %v1128_v50 = vrot.slane %v5936_v5, 6 }
 0xab6   :  { %v1034_v10 = vpop.permute.xlu1 %1033 }
 0xab7   :  { %v5940_v11 = vadd.f32 %v1034_v10, %v1026_v8 }
 0xab9   :  { %v5154_v12 = vpop.eup %5153  ;;  %5155 = vtanh.f32 %v5940_v11  ;;  %v1234_v54 = vrot.slane %v5940_v11, 2 }
 0xaba   :  { %935 = vrot.lane.b32.xlu0 %v5154_v12, %s5573_s0 }
 0xac3   :  { %v5156_v14 = vpop.eup %5155 }
 0xac4   :  { %1039 = vrot.lane.b32.xlu1 %v5156_v14, %s5573_s0 }
 0xb2c   :  { %v936_v15 = vpop.permute.xlu0 %935 }
 0xb2d   :  { %v938_v17 = vmul.f32 %v5150_v57, %v936_v15 }
 0xb2f   :  { %v1044_v18 = vrot.slane %v938_v17, 6  ;;  %v5947_v19 = vsel %vm1895_vm4, %v5908_v37, %v938_v17 }
 0xb31   :  { %1045 = vrot.lane.b32.xlu0 %v1044_v18, %s5574_s23 }
 0xb36   :  { %v1040_v20 = vpop.permute.xlu1 %1039 }
 0xb37   :  { %v5950_v22 = vmul.f32 %v5152_v59, %v1040_v20 }
 0xb39   :  { %1148 = vrot.lane.b32.xlu1 %v5950_v22, %s5574_s23 }
 0xba3   :  { %v1046_v23 = vpop.permute.xlu0 %1045 }
 0xba4   :  { %4507 = vmatmul.mubr.msk.f32.vlgmr.msra.gmra.mrb[6].mxu0 %vm208_vm1, %v1046_v23 }
 0xba5   :  { %4890 = vmatpush3.bf16.msra.mxu0 %v5770_v6  ;;  %4528 = vmatprep.mubr.msk.f32.mxu0 %vm5570_vm0, %v5571_v1 }
 0xba6   :  { %4891 = vmatprep.subr.bf16.mxu0 %v5569_v0 }
 0xba9   :  { %4893 = vmatpush3.bf16.msra.mxu0 %v5776_v9 }
 0xbaa   :  { %4900 = vmatprep.subr.bf16.mxu0 %v5569_v0 }
 0xbab   :  { %v1149_v24 = vpop.permute.xlu1 %1148 }
 0xbac   :  { %4518 = vmatmul.mubr.msk.f32.vlgmr.msra.gmra.mrb[10].mxu1 %vm208_vm1, %v1149_v24 }
 0xbad   :  { %4896 = vmatpush3.bf16.msra.mxu1 %v5785_v13  ;;  %4539 = vmatprep.mubr.msk.f32.mxu1 %vm5570_vm0, %v5571_v1 }
 0xbae   :  { %4897 = vmatprep.subr.bf16.mxu1 %v5569_v0 }
 0xbb1   :  { %4899 = vmatpush3.bf16.msra.mxu1 %v5792_v16 }
 0xbb2   :  { %4906 = vmatprep.subr.bf16.mxu1 %v5569_v0 }
 0xc77   :  { %v1115_v25 = vpop.f32.mrb[6].mxu0 }
 0xc78   :  { %v1119_v27 = vadd.f32 %v1115_v25, %v5808_v26  ;;  %v4508_v29 = vpop.f32.mrb[7].mxu0 }
 0xc7a   :  { %5157 = vtanh.f32 %v1119_v27  ;;  %v4158_v37 = vmul.f32 -1.442695, %v1119_v27 }
 0xc7f   :  { %v1218_v30 = vpop.f32.mrb[10].mxu1 }
 0xc80   :  { %v1223_v31 = vrot.slane %v1218_v30, 2  ;;  %v4519_v32 = vpop.f32.mrb[11].mxu1 }
 0xc82   :  { %v1225_v33 = vadd.f32 %v1223_v31, %v5806_v21 }
 0xc84   :  { %v5158_v35 = vpop.eup %5157  ;;  %5159 = vtanh.f32 %v1225_v33  ;;  %v4160_v38 = vmul.f32 -1.442695, %v1225_v33 }
 0xc85   :  { %1132 = vrot.lane.b32.xlu0 %v5158_v35, %s5573_s0  ;;  %5161 = vpow2.f32 %v4158_v37 }
 0xc86   :  { %5163 = vpow2.f32 %v4160_v38 }
 0xc8e   :  { %v5160_v36 = vpop.eup %5159 }
 0xc8f   :  { %1238 = vrot.lane.b32.xlu1 %v5160_v36, %s5573_s0  ;;  %v5162_v40 = vpop.eup %5161 }
 0xc90   :  { %v1123_v41 = vadd.f32 1.0, %v5162_v40  ;;  %v5164_v61 = vpop.eup %5163 }
 0xc91   :  { %v1229_v42 = vadd.f32 1.0, %v5164_v61 }
 0xc92   :  { %5165 = vrcp.f32 %v1123_v41 }
 0xc93   :  { %5167 = vrcp.f32 %v1229_v42 }
 0xc9c   :  { %v5166_v43 = vpop.eup %5165 }
 0xc9d   :  { %v5168_v46 = vpop.eup %5167  ;;  %v1130_v51 = vmul.f32 %v5166_v43, %v1128_v50 }
 0xc9e   :  { %v1236_v55 = vmul.f32 %v5168_v46, %v1234_v54 }
 0xcf7   :  { %v1133_v44 = vpop.permute.xlu0 %1132 }
 0xcf8   :  { %v1135_v45 = vmul.f32 %v5166_v43, %v1133_v44 }
 0xcfa   :  { %1137 = vrot.lane.b32.xlu0 %v1135_v45, %s5574_s23 }
 0xd01   :  { %v1239_v47 = vpop.permute.xlu1 %1238 }
 0xd02   :  { %v1241_v48 = vmul.f32 %v5168_v46, %v1239_v47 }
 0xd04   :  { %1243 = vrot.lane.b32.xlu1 %v1241_v48, %s5574_s23 }
 0xd6c   :  { %v1138_v52 = vpop.permute.xlu0 %1137 }
 0xd6d   :  { %v5975_v53 = vadd.f32 %v1138_v52, %v1130_v51 }
 0xd6f   :  { %5169 = vtanh.f32 %v5975_v53  ;;  %v1340_v37 = vrot.slane %v5975_v53, 6 }
 0xd76   :  { %v1244_v28 = vpop.permute.xlu1 %1243 }
 0xd77   :  { %v5979_v56 = vadd.f32 %v1244_v28, %v1236_v55 }
 0xd79   :  { %v5170_v57 = vpop.eup %5169  ;;  %5171 = vtanh.f32 %v5979_v56  ;;  %v1447_v61 = vrot.slane %v5979_v56, 2 }
 0xd7a   :  { %1143 = vrot.lane.b32.xlu0 %v5170_v57, %s5573_s0 }
 0xd83   :  { %v5172_v34 = vpop.eup %5171 }
 0xd84   :  { %1249 = vrot.lane.b32.xlu1 %v5172_v34, %s5573_s0 }
 0xdec   :  { %v1144_v58 = vpop.permute.xlu0 %1143 }
 0xded   :  { %v5984_v59 = vmul.f32 %v5166_v43, %v1144_v58 }
 0xdef   :  { %1254 = vrot.lane.b32.xlu0 %v5984_v59, %s5574_s23 }
 0xdf6   :  { %v1250_v60 = vpop.permute.xlu1 %1249 }
 0xdf7   :  { %v5988_v62 = vmul.f32 %v5168_v46, %v1250_v60 }
 0xdf9   :  { %v1360_v2 = vrot.slane %v5988_v62, 6 }
 0xdfb   :  { %1361 = vrot.lane.b32.xlu1 %v1360_v2, %s5574_s23 }
 0xe61   :  { %v1255_v3 = vpop.permute.xlu0 %1254 }
 0xe62   :  { %4529 = vmatmul.mubr.msk.f32.vlgmr.msra.gmra.mrb[8].mxu0 %vm208_vm1, %v1255_v3 }
 0xe63   :  { %4902 = vmatpush3.bf16.msra.mxu0 %v5770_v6  ;;  %4550 = vmatprep.mubr.msk.f32.mxu0 %vm5570_vm0, %v5571_v1 }
 0xe64   :  { %4903 = vmatprep.subr.bf16.mxu0 %v5569_v0 }
 0xe67   :  { %4905 = vmatpush3.bf16.msra.mxu0 %v5776_v9 }
 0xe68   :  { %4912 = vmatprep.subr.bf16.mxu0 %v5569_v0 }
 0xe6d   :  { %v1362_v4 = vpop.permute.xlu1 %1361 }
 0xe6e   :  { %4540 = vmatmul.mubr.msk.f32.vlgmr.msra.gmra.mrb[12].mxu1 %vm208_vm1, %v1362_v4 }
 0xe6f   :  { %4908 = vmatpush3.bf16.msra.mxu1 %v5785_v13  ;;  %4561 = vmatprep.mubr.msk.f32.mxu1 %vm5570_vm0, %v5571_v1 }
 0xe70   :  { %4909 = vmatprep.subr.bf16.mxu1 %v5569_v0 }
 0xe73   :  { %4911 = vmatpush3.bf16.msra.mxu1 %v5792_v16 }
 0xe74   :  { %4918 = vmatprep.subr.bf16.mxu1 %v5569_v0 }
 0xf35   :  { %v1324_v5 = vpop.f32.mrb[8].mxu0 }
 0xf36   :  { %v1329_v7 = vrot.slane %v1324_v5, 6  ;;  %v4530_v8 = vpop.f32.mrb[9].mxu0 }
 0xf38   :  { %v1331_v10 = vadd.f32 %v1329_v7, %v5808_v26 }
 0xf3a   :  { %5173 = vtanh.f32 %v1331_v10  ;;  %v4162_v20 = vmul.f32 -1.442695, %v1331_v10 }
 0xf41   :  { %v1431_v11 = vpop.f32.mrb[12].mxu1 }
 0xf42   :  { %v1436_v12 = vrot.slane %v1431_v11, 4  ;;  %v4541_v14 = vpop.f32.mrb[13].mxu1 }
 0xf44   :  { %v5174_v15 = vpop.eup %5173  ;;  %v1438_v17 = vadd.f32 %v1436_v12, %v5806_v21 }
 0xf45   :  { %1344 = vrot.lane.b32.xlu0 %v5174_v15, %s5573_s0 }
 0xf46   :  { %5175 = vtanh.f32 %v1438_v17  ;;  %v4164_v23 = vmul.f32 -1.442695, %v1438_v17 }
 0xf47   :  { %5177 = vpow2.f32 %v4162_v20 }
 0xf48   :  { %5179 = vpow2.f32 %v4164_v23 }
 0xf50   :  { %v5176_v18 = vpop.eup %5175 }
 0xf51   :  { %1451 = vrot.lane.b32.xlu1 %v5176_v18, %s5573_s0  ;;  %v5178_v24 = vpop.eup %5177 }
 0xf52   :  { %v1335_v25 = vadd.f32 1.0, %v5178_v24  ;;  %v5180_v27 = vpop.eup %5179 }
 0xf53   :  { %v1442_v29 = vadd.f32 1.0, %v5180_v27 }
 0xf54   :  { %5181 = vrcp.f32 %v1335_v25 }
 0xf55   :  { %5183 = vrcp.f32 %v1442_v29 }
 0xf5e   :  { %v5182_v30 = vpop.eup %5181 }
 0xf5f   :  { %v5184_v33 = vpop.eup %5183  ;;  %v1342_v38 = vmul.f32 %v5182_v30, %v1340_v37 }
 0xf60   :  { %v1449_v42 = vmul.f32 %v5184_v33, %v1447_v61 }
 0xfb7   :  { %v1345_v31 = vpop.permute.xlu0 %1344 }
 0xfb8   :  { %v1347_v32 = vmul.f32 %v5182_v30, %v1345_v31 }
 0xfba   :  { %1349 = vrot.lane.b32.xlu0 %v1347_v32, %s5574_s23 }
 0xfc3   :  { %v1452_v35 = vpop.permute.xlu1 %1451 }
 0xfc4   :  { %v1454_v36 = vmul.f32 %v5184_v33, %v1452_v35 }
 0xfc6   :  { %1456 = vrot.lane.b32.xlu1 %v1454_v36, %s5574_s23 }
0x102c   :  { %v1350_v40 = vpop.permute.xlu0 %1349 }
0x102d   :  { %v6013_v41 = vadd.f32 %v1350_v40, %v1342_v38 }
0x102f   :  { %5185 = vtanh.f32 %v6013_v41  ;;  %v1554_v18 = vrot.slane %v6013_v41, 6 }
0x1038   :  { %v1457_v43 = vpop.permute.xlu1 %1456 }
0x1039   :  { %v5186_v44 = vpop.eup %5185  ;;  %v6017_v45 = vadd.f32 %v1457_v43, %v1449_v42 }
0x103a   :  { %1355 = vrot.lane.b32.xlu0 %v5186_v44, %s5573_s0 }
0x103b   :  { %5187 = vtanh.f32 %v6017_v45  ;;  %v1661_v25 = vrot.slane %v6017_v45, 2 }
0x1045   :  { %v5188_v46 = vpop.eup %5187 }
0x1046   :  { %1462 = vrot.lane.b32.xlu1 %v5188_v46, %s5573_s0 }
0x10ac   :  { %v1356_v47 = vpop.permute.xlu0 %1355 }
0x10ad   :  { %v6022_v48 = vmul.f32 %v5182_v30, %v1356_v47 }
0x10af   :  { %v1467_v50 = vrot.slane %v6022_v48, 2  ;;  %v1897_v36 = vsel %vm1891_vm2, %v5984_v59, %v6022_v48 }
0x10b1   :  { %1468 = vrot.lane.b32.xlu0 %v1467_v50, %s5574_s23 }
0x10b8   :  { %v1463_v51 = vpop.permute.xlu1 %1462 }
0x10b9   :  { %v6026_v52 = vmul.f32 %v5184_v33, %v1463_v51 }
0x10bb   :  { %v1574_v53 = vrot.slane %v6026_v52, 4 }
0x10bd   :  { %1575 = vrot.lane.b32.xlu1 %v1574_v53, %s5574_s23 }
0x1123   :  { %v1469_v54 = vpop.permute.xlu0 %1468 }
0x1124   :  { %4551 = vmatmul.mubr.msk.f32.vlgmr.msra.gmra.mrb[10].mxu0 %vm208_vm1, %v1469_v54 }
0x1125   :  { %4914 = vmatpush3.bf16.msra.mxu0 %v5770_v6  ;;  %4572 = vmatprep.mubr.msk.f32.mxu0 %vm5570_vm0, %v5571_v1 }
0x1126   :  { %4915 = vmatprep.subr.bf16.mxu0 %v5569_v0 }
0x1129   :  { %4917 = vmatpush3.bf16.msra.mxu0 %v5776_v9 }
0x112f   :  { %v1576_v55 = vpop.permute.xlu1 %1575 }
0x1130   :  { %4562 = vmatmul.mubr.msk.f32.vlgmr.msra.gmra.mrb[14].mxu1 %vm208_vm1, %v1576_v55 }
0x1131   :  { %4920 = vmatpush3.bf16.msra.mxu1 %v5785_v13  ;;  %4583 = vmatprep.mubr.msk.f32.mxu1 %vm5570_vm0, %v5571_v1 }
0x1132   :  { %4921 = vmatprep.subr.bf16.mxu1 %v5569_v0 }
0x1135   :  { %4923 = vmatpush3.bf16.msra.mxu1 %v5792_v16 }
0x11f7   :  { %v1538_v6 = vpop.f32.mrb[10].mxu0 }
0x11f8   :  { %v1543_v28 = vrot.slane %v1538_v6, 4  ;;  %v4552_v56 = vpop.f32.mrb[11].mxu0 }
0x11fa   :  { %v1545_v57 = vadd.f32 %v1543_v28, %v5808_v26 }
0x11fc   :  { %5189 = vtanh.f32 %v1545_v57  ;;  %v4166_v3 = vmul.f32 -1.442695, %v1545_v57 }
0x1203   :  { %v1645_v34 = vpop.f32.mrb[14].mxu1 }
0x1204   :  { %v1650_v9 = vrot.slane %v1645_v34, 6  ;;  %v4563_v58 = vpop.f32.mrb[15].mxu1 }
0x1206   :  { %v5190_v60 = vpop.eup %5189  ;;  %v1652_v2 = vadd.f32 %v1650_v9, %v5806_v21 }
0x1207   :  { %1558 = vrot.lane.b32.xlu0 %v5190_v60, %s5573_s0 }
0x1208   :  { %5191 = vtanh.f32 %v1652_v2  ;;  %v4168_v16 = vmul.f32 -1.442695, %v1652_v2 }
0x1209   :  { %5193 = vpow2.f32 %v4166_v3 }
0x120a   :  { %5195 = vpow2.f32 %v4168_v16 }
0x1212   :  { %v5192_v13 = vpop.eup %5191 }
0x1213   :  { %1665 = vrot.lane.b32.xlu1 %v5192_v13, %s5573_s0  ;;  %v5194_v4 = vpop.eup %5193 }
0x1214   :  { %v1549_v5 = vadd.f32 1.0, %v5194_v4  ;;  %v5196_v7 = vpop.eup %5195 }
0x1215   :  { %v1656_v8 = vadd.f32 1.0, %v5196_v7 }
0x1216   :  { %5197 = vrcp.f32 %v1549_v5 }
0x1217   :  { %5199 = vrcp.f32 %v1656_v8 }
0x1220   :  { %v5198_v10 = vpop.eup %5197 }
0x1221   :  { %v5200_v14 = vpop.eup %5199  ;;  %v1556_v20 = vmul.f32 %v5198_v10, %v1554_v18  ;;  %v1909_v18 = vld [vmem:[%s6467_s7 + $0x10] sm:$0xff] }
0x1222   :  { %v1663_v27 = vmul.f32 %v5200_v14, %v1661_v25  ;;  %v2102_v25 = vld [vmem:[%s6470_s10 + $0x10] sm:$0xff] }
0x1279   :  { %v1559_v11 = vpop.permute.xlu0 %1558 }
0x127a   :  { %v1561_v12 = vmul.f32 %v5198_v10, %v1559_v11  ;;  %v1907_v11 = vld [vmem:[%s6467_s7] sm:$0xff] }
0x127c   :  { %1563 = vrot.lane.b32.xlu0 %v1561_v12, %s5574_s23  ;;  %v1908_v12 = vld [vmem:[%s6467_s7 + $0x8] sm:$0xff] }
0x1285   :  { %v1666_v15 = vpop.permute.xlu1 %1665 }
0x1286   :  { %v1668_v17 = vmul.f32 %v5200_v14, %v1666_v15  ;;  %v4924_v15 = vpack.c.bf16 %v1908_v12, %v1907_v11 }
0x1288   :  { %1670 = vrot.lane.b32.xlu1 %v1668_v17, %s5574_s23  ;;  %v2101_v17 = vld [vmem:[%s6470_s10 + $0x8] sm:$0xff]  ;;  %4925 = vmatprep.subr.bf16.mxu0 %v4924_v15 }
0x12ee   :  { %v1564_v23 = vpop.permute.xlu0 %1563 }
0x12ef   :  { %v1566_v24 = vadd.f32 %v1564_v23, %v1556_v20  ;;  %v1910_v20 = vld [vmem:[%s6467_s7 + $0x18] sm:$0xff] }
0x12f1   :  { %5201 = vtanh.f32 %v1566_v24  ;;  %v1768_v2 = vrot.slane %v1566_v24, 6  ;;  %v4928_v24 = vpack.c.bf16 %v1910_v20, %v1909_v18 }
0x12fa   :  { %v1671_v29 = vpop.permute.xlu1 %1670 }
0x12fb   :  { %v5202_v30 = vpop.eup %5201  ;;  %v1673_v31 = vadd.f32 %v1671_v29, %v1663_v27  ;;  %v2103_v27 = vld [vmem:[%s6470_s10 + $0x18] sm:$0xff] }
0x12fc   :  { %1569 = vrot.lane.b32.xlu0 %v5202_v30, %s5573_s0  ;;  %v4944_v29 = vpack.c.bf16 %v2103_v27, %v2102_v25 }
0x12fd   :  { %5203 = vtanh.f32 %v1673_v31  ;;  %v1872_v4 = vrot.slane %v1673_v31, 2  ;;  %v2005_v31 = vld [vmem:[%s6467_s7 + $0x28] sm:$0xff] }
0x1307   :  { %v5204_v32 = vpop.eup %5203 }
0x1308   :  { %1676 = vrot.lane.b32.xlu1 %v5204_v32, %s5573_s0  ;;  %v2187_v32 = vld [vmem:[%s6470_s10 + $0x20] sm:$0xff] }
0x136e   :  { %v1570_v33 = vpop.permute.xlu0 %1569 }
0x136f   :  { %v1572_v35 = vmul.f32 %v5198_v10, %v1570_v33 }
0x1371   :  { %v1681_v37 = vrot.slane %v1572_v35, 4  ;;  %v6056_v38 = vsel %vm1893_vm3, %v1897_v36, %v1572_v35  ;;  %v2188_v35 = vld [vmem:[%s6470_s10 + $0x28] sm:$0xff] }
0x1372   :  { %v4948_v36 = vpack.c.bf16 %v2188_v35, %v2187_v32 }
0x1373   :  { %1682 = vrot.lane.b32.xlu0 %v1681_v37, %s5574_s23 }
0x137a   :  { %v1677_v40 = vpop.permute.xlu1 %1676 }
0x137b   :  { %v6059_v41 = vmul.f32 %v5200_v14, %v1677_v40  ;;  %v2100_v14 = vld [vmem:[%s6470_s10] sm:$0xff] }
0x137c   :  { %v4940_v23 = vpack.c.bf16 %v2101_v17, %v2100_v14 }
0x137d   :  { %v1788_v61 = vrot.slane %v6059_v41, 2 }
0x137e   :  { %4941 = vmatprep.subr.bf16.mxu1 %v4940_v23 }
0x137f   :  { %1789 = vrot.lane.b32.xlu1 %v1788_v61, %s5574_s23  ;;  %v1903_v61 = vsel %vm1891_vm2, %v5950_v22, %v5911_v39 }
0x13e5   :  { %v1683_v42 = vpop.permute.xlu0 %1682 }
0x13e6   :  { %4573 = vmatmul.mubr.msk.f32.vlgmr.msra.gmra.mrb[12].mxu0 %vm208_vm1, %v1683_v42 }
0x13e7   :  { %4927 = vmatpush3.bf16.msra.mxu0 %v4924_v15 }
0x13e8   :  { %4929 = vmatprep.subr.bf16.mxu0 %v4928_v24 }
0x13eb   :  { %4931 = vmatpush3.bf16.msra.mxu0 %v4928_v24 }
0x13f1   :  { %v1790_v43 = vpop.permute.xlu1 %1789 }
0x13f2   :  { %4584 = vmatmul.mubr.msk.f32.vlgmr.msra.gmra.mrb[16].mxu1 %vm208_vm1, %v1790_v43 }
0x13f3   :  { %4943 = vmatpush3.bf16.msra.mxu1 %v4940_v23 }
0x13f4   :  { %4945 = vmatprep.subr.bf16.mxu1 %v4944_v29 }
0x13f7   :  { %4947 = vmatpush3.bf16.msra.mxu1 %v4944_v29 }
0x13f8   :  { %4949 = vmatprep.subr.bf16.mxu1 %v4948_v36 }
0x14b9   :  { %v1752_v59 = vpop.f32.mrb[12].mxu0 }
0x14ba   :  { %v1757_v44 = vrot.slane %v1752_v59, 2  ;;  %v4574_v45 = vpop.f32.mrb[13].mxu0  ;;  %v1904_v59 = vsel %vm1893_vm3, %v1903_v61, %v5870_v49 }
0x14bc   :  { %v1759_v46 = vadd.f32 %v1757_v44, %v5808_v26  ;;  %v1905_v44 = vsel %vm1895_vm4, %v1904_v59, %v5832_v63  ;;  %v2007_v63 = vld [vmem:[%s6467_s7 + $0x38] sm:$0xff] }
0x14be   :  { %5205 = vtanh.f32 %v1759_v46  ;;  %v4170_v54 = vmul.f32 -1.442695, %v1759_v46  ;;  %v2006_v46 = vld [vmem:[%s6467_s7 + $0x30] sm:$0xff] }
0x14c5   :  { %v1859_v47 = vpop.f32.mrb[16].mxu1 }
0x14c6   :  { %v1863_v48 = vadd.f32 %v1859_v47, %v5806_v21  ;;  %v4585_v50 = vpop.f32.mrb[17].mxu1  ;;  %v4936_v47 = vpack.c.bf16 %v2007_v63, %v2006_v46 }
0x14c7   :  { %v2095_v50 = vld [vmem:[#allocation13] sm:$0xff] }
0x14c8   :  { %v5206_v51 = vpop.eup %5205  ;;  %5207 = vtanh.f32 %v1863_v48  ;;  %v4172_v55 = vmul.f32 -1.442695, %v1863_v48 }
0x14c9   :  { %1772 = vrot.lane.b32.xlu0 %v5206_v51, %s5573_s0  ;;  %5209 = vpow2.f32 %v4170_v54  ;;  %v2096_v51 = vld [vmem:[#allocation13 + $0x8] sm:$0xff] }
0x14ca   :  { %5211 = vpow2.f32 %v4172_v55  ;;  %v2269_v54 = vld [vmem:[#allocation14 + $0x8] sm:$0xff]  ;;  %v6147_v55 = vpack.c.bf16 %v2096_v51, %v2095_v50 }
0x14d2   :  { %v5208_v53 = vpop.eup %5207 }
0x14d3   :  { %1876 = vrot.lane.b32.xlu1 %v5208_v53, %s5573_s0  ;;  %v5210_v6 = vpop.eup %5209  ;;  %v2268_v53 = vld [vmem:[#allocation14] sm:$0xff] }
0x14d4   :  { %v1763_v28 = vadd.f32 1.0, %v5210_v6  ;;  %v5212_v26 = vpop.eup %5211  ;;  %v6149_v6 = vpack.c.bf16 %v2269_v54, %v2268_v53 }
0x14d5   :  { %v1867_v56 = vadd.f32 1.0, %v5212_v26 }
0x14d6   :  { %5213 = vrcp.f32 %v1763_v28  ;;  %v2097_v28 = vld [vmem:[#allocation13 + $0x10] sm:$0xff] }
0x14d7   :  { %5215 = vrcp.f32 %v1867_v56  ;;  %v2098_v56 = vld [vmem:[#allocation13 + $0x18] sm:$0xff] }
0x14e0   :  { %v5214_v57 = vpop.eup %5213 }
0x14e1   :  { %v5216_v9 = vpop.eup %5215  ;;  %v1770_v13 = vmul.f32 %v5214_v57, %v1768_v2  ;;  %v4180_v2 = vld [vmem:[%s6472_s12] ss:$0 sm:$0xff] }
0x14e2   :  { %v1874_v5 = vmul.f32 %v5216_v9, %v1872_v4 }
0x153b   :  { %v1773_v21 = vpop.permute.xlu0 %1772 }
0x153c   :  { %v1775_v34 = vmul.f32 %v5214_v57, %v1773_v21  ;;  %v2271_v21 = vld [vmem:[#allocation14 + $0x18] sm:$0xff] }
0x153e   :  { %1777 = vrot.lane.b32.xlu0 %v1775_v34, %s5574_s23 }
0x1545   :  { %v1877_v58 = vpop.permute.xlu1 %1876 }
0x1546   :  { %v1879_v60 = vmul.f32 %v5216_v9, %v1877_v58 }
0x1548   :  { %1881 = vrot.lane.b32.xlu1 %v1879_v60, %s5574_s23  ;;  %v4175_v60 = vld [vmem:[%s6469_s9] ss:$0 sm:$0xff] }
0x15b0   :  { %v1778_v3 = vpop.permute.xlu0 %1777 }
0x15b1   :  { %v1780_v16 = vadd.f32 %v1778_v3, %v1770_v13 }
0x15b3   :  { %5217 = vtanh.f32 %v1780_v16 }
0x15ba   :  { %v1882_v7 = vpop.permute.xlu1 %1881 }
0x15bb   :  { %v1884_v8 = vadd.f32 %v1882_v7, %v1874_v5 }
0x15bd   :  { %v5218_v10 = vpop.eup %5217  ;;  %5219 = vtanh.f32 %v1884_v8 }
0x15be   :  { %1783 = vrot.lane.b32.xlu0 %v5218_v10, %s5573_s0 }
0x15c2   :  { %1913 = vrot.lane.b32.xlu0 %v5947_v19, %s5574_s23  ;;  %v2004_v19 = vld [vmem:[%s6467_s7 + $0x20] sm:$0xff] }
0x15c3   :  { %v4932_v33 = vpack.c.bf16 %v2005_v31, %v2004_v19 }
0x15c5   :  { %4933 = vmatprep.subr.bf16.mxu0 %v4932_v33 }
0x15c7   :  { %v5220_v30 = vpop.eup %5219 }
0x15c8   :  { %1887 = vrot.lane.b32.xlu1 %v5220_v30, %s5573_s0 }
0x1630   :  { %v1784_v37 = vpop.permute.xlu0 %1783 }
0x1631   :  { %v1786_v40 = vmul.f32 %v5214_v57, %v1784_v37  ;;  %v2270_v57 = vld [vmem:[#allocation14 + $0x10] sm:$0xff] }
0x1632   :  { %v6159_v58 = vpack.c.bf16 %v2271_v21, %v2270_v57 }
0x1633   :  { %v1899_v42 = vsel %vm1895_vm4, %v6056_v38, %v1786_v40 }
0x1634   :  { %1915 = vrot.lane.b32.xlu1 %v1899_v42, %s5574_s23  ;;  %v1914_v43 = vpop.permute.xlu0 %1913 }
0x1635   :  { %4594 = vmatprep.mubr.msk.f32.mxu0 %vm208_vm1, %v1914_v43  ;;  %4616 = vmatprep.mubr.msk.f32.mxu1 %vm208_vm1, %v1914_v43 }
0x1638   :  { %2012 = vrot.lane.b32.xlu1 %v1905_v44, %s5574_s23 }
0x163a   :  { %v1888_v45 = vpop.permute.xlu1 %1887 }
0x163b   :  { %v1890_v39 = vmul.f32 %v5216_v9, %v1888_v45  ;;  %v6157_v9 = vpack.c.bf16 %v2098_v56, %v2097_v28 }
0x163d   :  { %v1900_v22 = vsel %vm1891_vm2, %v1890_v39, %v6059_v41  ;;  %v2189_v41 = vld [vmem:[%s6470_s10 + $0x30] sm:$0xff] }
0x163e   :  { %v1901_v38 = vsel %vm1893_vm3, %v1900_v22, %v6026_v52  ;;  %v2190_v52 = vld [vmem:[%s6470_s10 + $0x38] sm:$0xff] }
0x163f   :  { %v1902_v49 = vsel %vm1895_vm4, %v1901_v38, %v5988_v62  ;;  %v4952_v62 = vpack.c.bf16 %v2190_v52, %v2189_v41 }
0x1640   :  { %2010 = vrot.lane.b32.xlu0 %v1902_v49, %s5574_s23 }
0x16a6   :  { %v1916_v48 = vpop.permute.xlu1 %1915 }
0x16a7   :  { %4595 = vmatmul.mubr.msk.f32.vlgmr.msra.gmra.mrb[14].mxu0 %vm208_vm1, %v1916_v48  ;;  %4617 = vmatmul.mubr.msk.f32.vlgmr.msra.gmra.mrb[18].mxu1 %vm208_vm1, %v1916_v48 }
0x16a8   :  { %4935 = vmatpush3.bf16.msra.mxu0 %v4932_v33  ;;  %4951 = vmatpush3.bf16.msra.mxu1 %v4948_v36 }
0x16a9   :  { %4937 = vmatprep.subr.bf16.mxu0 %v4936_v47  ;;  %4953 = vmatprep.subr.bf16.mxu1 %v4952_v62 }
0x16aa   :  { %v2013_v34 = vpop.permute.xlu1 %2012 }
0x16ac   :  { %4939 = vmatpush3.bf16.msra.mxu0 %v4936_v47  ;;  %4955 = vmatpush3.bf16.msra.mxu1 %v4952_v62 }
0x16ad   :  { %4956 = vmatprep.subr.bf16.mxu0 %v5569_v0  ;;  %4962 = vmatprep.subr.bf16.mxu1 %v5569_v0 }
0x16b2   :  { %v2011_v26 = vpop.permute.xlu0 %2010 }
0x16b3   :  { %4605 = vmatprep.mubr.msk.f32.mxu0 %vm208_vm1, %v2011_v26  ;;  %4627 = vmatprep.mubr.msk.f32.mxu1 %vm208_vm1, %v2011_v26 }
0x16b4   :  { %4606 = vmatmul.mubr.msk.f32.vlgmr.msra.gmra.mrb[14].mxu0 %vm208_vm1, %v2013_v34  ;;  %4628 = vmatmul.mubr.msk.f32.vlgmr.msra.gmra.mrb[18].mxu1 %vm208_vm1, %v2013_v34 }
0x16b5   :  { %4958 = vmatpush3.bf16.msra.mxu0 %v6147_v55  ;;  %4964 = vmatpush3.bf16.msra.mxu1 %v6149_v6 }
0x16b6   :  { %4959 = vmatprep.subr.bf16.mxu0 %v5569_v0  ;;  %4965 = vmatprep.subr.bf16.mxu1 %v5569_v0 }
0x16b7   :  { %4638 = vmatprep.mubr.msk.f32.mxu0 %vm5570_vm0, %v5571_v1  ;;  %4649 = vmatprep.mubr.msk.f32.mxu1 %vm5570_vm0, %v5571_v1 }
0x16b9   :  { %4961 = vmatpush3.bf16.msra.mxu0 %v6157_v9  ;;  %4967 = vmatpush3.bf16.msra.mxu1 %v6159_v58 }
0x16ba   :  { %4968 = vmatprep.subr.bf16.mxu0 %v5569_v0  ;;  %4974 = vmatprep.subr.bf16.mxu1 %v5569_v0 }
0x16bc   :  { %4639 = vmatmul.mubr.f32.vlgmr.msra.gmra.mrb[16].mxu0 %v5571_v1  ;;  %4650 = vmatmul.mubr.f32.vlgmr.msra.gmra.mrb[20].mxu1 %v5571_v1 }
0x16bd   :  { %4970 = vmatpush3.bf16.msra.mxu0 %v6147_v55  ;;  %4976 = vmatpush3.bf16.msra.mxu1 %v6149_v6 }
0x16be   :  { %4971 = vmatprep.subr.bf16.mxu0 %v5569_v0  ;;  %4660 = vmatprep.mubr.msk.f32.mxu0 %vm5570_vm0, %v5571_v1 }
0x16bf   :  { %4977 = vmatprep.subr.bf16.mxu1 %v5569_v0  ;;  %4671 = vmatprep.mubr.msk.f32.mxu1 %vm5570_vm0, %v5571_v1 }
0x16c1   :  { %4973 = vmatpush3.bf16.msra.mxu0 %v6157_v9  ;;  %4979 = vmatpush3.bf16.msra.mxu1 %v6159_v58 }
0x16c2   :  { %4980 = vmatprep.subr.bf16.mxu0 %v5569_v0  ;;  %4986 = vmatprep.subr.bf16.mxu1 %v5569_v0 }
0x1787   :  { %v4607_v13 = vpop.f32.mrb[14].mxu0  ;;  %v4629_v3 = vpop.f32.mrb[18].mxu1 }
0x1788   :  { %v6191_v16 = vadd.f32 %v4607_v13, %v4175_v60  ;;  %v2084_v4 = vpop.f32.mrb[15].mxu0  ;;  %v2257_v5 = vpop.f32.mrb[19].mxu1  ;;  %v6197_v12 = vadd.f32 %v4629_v3, %v4180_v2 }
0x1789   :  { %v6193_v7 = vadd.f32 %v4180_v2, %v2257_v5  ;;  %v6195_v8 = vadd.f32 %v4175_v60, %v2084_v4 }
0x178f   :  { %v2338_v10 = vpop.f32.mrb[16].mxu0  ;;  %v2433_v11 = vpop.f32.mrb[20].mxu1 }
0x1790   :  { %v2342_v14 = vadd.f32 %v6195_v8, %v2338_v10  ;;  %v2438_v15 = vrot.slane %v2433_v11, 2  ;;  %v4640_v17 = vpop.f32.mrb[17].mxu0  ;;  %v4651_v18 = vpop.f32.mrb[21].mxu1 }
0x1792   :  { %5221 = vtanh.f32 %v2342_v14  ;;  %v2440_v20 = vadd.f32 %v6197_v12, %v2438_v15  ;;  %v4183_v25 = vmul.f32 -1.442695, %v2342_v14 }
0x1794   :  { %5223 = vtanh.f32 %v2440_v20  ;;  %v4184_v27 = vmul.f32 -1.442695, %v2440_v20 }
0x1795   :  { %5225 = vpow2.f32 %v4183_v25 }
0x1796   :  { %5227 = vpow2.f32 %v4184_v27 }
0x179c   :  { %v5222_v23 = vpop.eup %5221 }
0x179d   :  { %2352 = vrot.lane.b32.xlu0 %v5222_v23, %s5573_s0 }
0x179e   :  { %v5224_v24 = vpop.eup %5223 }
0x179f   :  { %2450 = vrot.lane.b32.xlu1 %v5224_v24, %s5573_s0  ;;  %v5226_v29 = vpop.eup %5225 }
0x17a0   :  { %v5228_v30 = vpop.eup %5227  ;;  %v2346_v19 = vadd.f32 1.0, %v5226_v29 }
0x17a1   :  { %v2444_v31 = vadd.f32 1.0, %v5228_v30 }
0x17a2   :  { %5229 = vrcp.f32 %v2346_v19 }
0x17a3   :  { %5231 = vrcp.f32 %v2444_v31 }
0x17ac   :  { %v5230_v32 = vpop.eup %5229 }
0x17ad   :  { %v5232_v36 = vpop.eup %5231  ;;  %v2350_v61 = vmul.f32 0.0, %v5230_v32 }
0x17ae   :  { %v2448_v59 = vmul.f32 0.0, %v5232_v36 }
0x180f   :  { %v2353_v33 = vpop.permute.xlu0 %2352 }
0x1810   :  { %v2355_v35 = vmul.f32 %v5230_v32, %v2353_v33 }
0x1811   :  { %v2451_v37 = vpop.permute.xlu1 %2450 }
0x1812   :  { %2357 = vrot.lane.b32.xlu0 %v2355_v35, %s5574_s23  ;;  %v2453_v40 = vmul.f32 %v5232_v36, %v2451_v37 }
0x1814   :  { %2455 = vrot.lane.b32.xlu1 %v2453_v40, %s5574_s23 }
0x1884   :  { %v2358_v42 = vpop.permute.xlu0 %2357 }
0x1885   :  { %v6205_v43 = vadd.f32 %v2358_v42, %v2350_v61 }
0x1886   :  { %v2456_v44 = vpop.permute.xlu1 %2455 }
0x1887   :  { %5233 = vtanh.f32 %v6205_v43  ;;  %v6208_v45 = vadd.f32 %v2456_v44, %v2448_v59  ;;  %v2552_v17 = vrot.slane %v6205_v43, 6 }
0x1889   :  { %5235 = vtanh.f32 %v6208_v45  ;;  %v2659_v24 = vrot.slane %v6208_v45, 2 }
0x1891   :  { %v5234_v39 = vpop.eup %5233 }
0x1892   :  { %2363 = vrot.lane.b32.xlu0 %v5234_v39, %s5573_s0 }
0x1893   :  { %v5236_v22 = vpop.eup %5235 }
0x1894   :  { %2461 = vrot.lane.b32.xlu1 %v5236_v22, %s5573_s0 }
0x1904   :  { %v2364_v38 = vpop.permute.xlu0 %2363 }
0x1905   :  { %v2366_v49 = vmul.f32 %v5230_v32, %v2364_v38 }
0x1906   :  { %v2462_v46 = vpop.permute.xlu1 %2461 }
0x1907   :  { %2466 = vrot.lane.b32.xlu0 %v2366_v49, %s5574_s23  ;;  %v2464_v63 = vmul.f32 %v5232_v36, %v2462_v46 }
0x1909   :  { %v2572_v41 = vrot.slane %v2464_v63, 6 }
0x190b   :  { %2573 = vrot.lane.b32.xlu1 %v2572_v41, %s5574_s23 }
0x1979   :  { %v2467_v52 = vpop.permute.xlu0 %2466 }
0x197a   :  { %4661 = vmatmul.mubr.msk.f32.vlgmr.msra.gmra.mrb[18].mxu0 %vm208_vm1, %v2467_v52 }
0x197b   :  { %4982 = vmatpush3.bf16.msra.mxu0 %v6147_v55  ;;  %4682 = vmatprep.mubr.msk.f32.mxu0 %vm5570_vm0, %v5571_v1 }
0x197c   :  { %4983 = vmatprep.subr.bf16.mxu0 %v5569_v0 }
0x197d   :  { %v2574_v47 = vpop.permute.xlu1 %2573 }
0x197e   :  { %4672 = vmatmul.mubr.msk.f32.vlgmr.msra.gmra.mrb[22].mxu1 %vm208_vm1, %v2574_v47 }
0x197f   :  { %4985 = vmatpush3.bf16.msra.mxu0 %v6157_v9  ;;  %4988 = vmatpush3.bf16.msra.mxu1 %v6149_v6 }
0x1980   :  { %4693 = vmatprep.mubr.msk.f32.mxu1 %vm5570_vm0, %v5571_v1  ;;  %4989 = vmatprep.subr.bf16.mxu1 %v5569_v0 }
0x1981   :  { %4992 = vmatprep.subr.bf16.mxu0 %v5569_v0 }
0x1983   :  { %4991 = vmatpush3.bf16.msra.mxu1 %v6159_v58 }
0x1984   :  { %4998 = vmatprep.subr.bf16.mxu1 %v5569_v0 }
0x1a4d   :  { %v2536_v62 = vpop.f32.mrb[18].mxu0 }
0x1a4e   :  { %v2541_v48 = vrot.slane %v2536_v62, 6  ;;  %v4662_v50 = vpop.f32.mrb[19].mxu0 }
0x1a50   :  { %v2543_v51 = vadd.f32 %v6195_v8, %v2541_v48 }
0x1a51   :  { %v2643_v53 = vpop.f32.mrb[22].mxu1 }
0x1a52   :  { %5237 = vtanh.f32 %v2543_v51  ;;  %v2648_v54 = vrot.slane %v2643_v53, 4  ;;  %v4673_v28 = vpop.f32.mrb[23].mxu1  ;;  %v4186_v21 = vmul.f32 -1.442695, %v2543_v51 }
0x1a54   :  { %v2650_v26 = vadd.f32 %v6197_v12, %v2648_v54 }
0x1a56   :  { %5239 = vtanh.f32 %v2650_v26  ;;  %v4188_v34 = vmul.f32 -1.442695, %v2650_v26 }
0x1a57   :  { %5241 = vpow2.f32 %v4186_v21 }
0x1a58   :  { %5243 = vpow2.f32 %v4188_v34 }
0x1a5c   :  { %v5238_v56 = vpop.eup %5237 }
0x1a5d   :  { %2556 = vrot.lane.b32.xlu0 %v5238_v56, %s5573_s0 }
0x1a60   :  { %v5240_v57 = vpop.eup %5239 }
0x1a61   :  { %2663 = vrot.lane.b32.xlu1 %v5240_v57, %s5573_s0  ;;  %v5242_v60 = vpop.eup %5241 }
0x1a62   :  { %v2547_v2 = vadd.f32 1.0, %v5242_v60  ;;  %v5244_v13 = vpop.eup %5243 }
0x1a63   :  { %v2654_v3 = vadd.f32 1.0, %v5244_v13 }
0x1a64   :  { %5245 = vrcp.f32 %v2547_v2 }
0x1a65   :  { %5247 = vrcp.f32 %v2654_v3 }
0x1a6e   :  { %v5246_v4 = vpop.eup %5245 }
0x1a6f   :  { %v5248_v11 = vpop.eup %5247  ;;  %v2554_v18 = vmul.f32 %v5246_v4, %v2552_v17 }
0x1a70   :  { %v2661_v25 = vmul.f32 %v5248_v11, %v2659_v24 }
0x1acf   :  { %v2557_v5 = vpop.permute.xlu0 %2556 }
0x1ad0   :  { %v2559_v10 = vmul.f32 %v5246_v4, %v2557_v5 }
0x1ad2   :  { %2561 = vrot.lane.b32.xlu0 %v2559_v10, %s5574_s23 }
0x1ad3   :  { %v2664_v14 = vpop.permute.xlu1 %2663 }
0x1ad4   :  { %v2666_v15 = vmul.f32 %v5248_v11, %v2664_v14 }
0x1ad6   :  { %2668 = vrot.lane.b32.xlu1 %v2666_v15, %s5574_s23 }
0x1b44   :  { %v2562_v20 = vpop.permute.xlu0 %2561 }
0x1b45   :  { %v6236_v23 = vadd.f32 %v2562_v20, %v2554_v18 }
0x1b47   :  { %5249 = vtanh.f32 %v6236_v23  ;;  %v2766_v56 = vrot.slane %v6236_v23, 6 }
0x1b48   :  { %v2669_v27 = vpop.permute.xlu1 %2668 }
0x1b49   :  { %v6240_v29 = vadd.f32 %v2669_v27, %v2661_v25 }
0x1b4b   :  { %5251 = vtanh.f32 %v6240_v29  ;;  %v2873_v60 = vrot.slane %v6240_v29, 2 }
0x1b51   :  { %v5250_v30 = vpop.eup %5249 }
0x1b52   :  { %2567 = vrot.lane.b32.xlu0 %v5250_v30, %s5573_s0 }
0x1b55   :  { %v5252_v19 = vpop.eup %5251 }
0x1b56   :  { %2674 = vrot.lane.b32.xlu1 %v5252_v19, %s5573_s0 }
0x1bc4   :  { %v2568_v31 = vpop.permute.xlu0 %2567 }
0x1bc5   :  { %v2570_v32 = vmul.f32 %v5246_v4, %v2568_v31 }
0x1bc7   :  { %v2679_v33 = vrot.slane %v2570_v32, 2 }
0x1bc8   :  { %v2675_v35 = vpop.permute.xlu1 %2674 }
0x1bc9   :  { %2680 = vrot.lane.b32.xlu0 %v2679_v33, %s5574_s23  ;;  %v2677_v36 = vmul.f32 %v5248_v11, %v2675_v35 }
0x1bcb   :  { %v2786_v37 = vrot.slane %v2677_v36, 4 }
0x1bcd   :  { %2787 = vrot.lane.b32.xlu1 %v2786_v37, %s5574_s23 }
0x1c3b   :  { %v2681_v40 = vpop.permute.xlu0 %2680 }
0x1c3c   :  { %4683 = vmatmul.mubr.msk.f32.vlgmr.msra.gmra.mrb[20].mxu0 %vm208_vm1, %v2681_v40 }
0x1c3d   :  { %4994 = vmatpush3.bf16.msra.mxu0 %v6147_v55  ;;  %4704 = vmatprep.mubr.msk.f32.mxu0 %vm5570_vm0, %v5571_v1 }
0x1c3e   :  { %4995 = vmatprep.subr.bf16.mxu0 %v5569_v0 }
0x1c3f   :  { %v2788_v61 = vpop.permute.xlu1 %2787 }
0x1c40   :  { %4694 = vmatmul.mubr.msk.f32.vlgmr.msra.gmra.mrb[24].mxu1 %vm208_vm1, %v2788_v61 }
0x1c41   :  { %4997 = vmatpush3.bf16.msra.mxu0 %v6157_v9  ;;  %5000 = vmatpush3.bf16.msra.mxu1 %v6149_v6 }
0x1c42   :  { %4715 = vmatprep.mubr.msk.f32.mxu1 %vm5570_vm0, %v5571_v1  ;;  %5001 = vmatprep.subr.bf16.mxu1 %v5569_v0 }
0x1c43   :  { %5004 = vmatprep.subr.bf16.mxu0 %v5569_v0 }
0x1c45   :  { %5003 = vmatpush3.bf16.msra.mxu1 %v6159_v58 }
0x1c46   :  { %5010 = vmatprep.subr.bf16.mxu1 %v5569_v0 }
0x1d0f   :  { %v2750_v42 = vpop.f32.mrb[20].mxu0 }
0x1d10   :  { %v2755_v43 = vrot.slane %v2750_v42, 4  ;;  %v4684_v59 = vpop.f32.mrb[21].mxu0 }
0x1d12   :  { %v2757_v44 = vadd.f32 %v6195_v8, %v2755_v43 }
0x1d13   :  { %v2857_v45 = vpop.f32.mrb[24].mxu1 }
0x1d14   :  { %5253 = vtanh.f32 %v2757_v44  ;;  %v2862_v39 = vrot.slane %v2857_v45, 6  ;;  %v4695_v22 = vpop.f32.mrb[25].mxu1  ;;  %v4190_v63 = vmul.f32 -1.442695, %v2757_v44 }
0x1d16   :  { %v2864_v38 = vadd.f32 %v6197_v12, %v2862_v39 }
0x1d18   :  { %5255 = vtanh.f32 %v2864_v38  ;;  %v4192_v41 = vmul.f32 -1.442695, %v2864_v38 }
0x1d19   :  { %5257 = vpow2.f32 %v4190_v63 }
0x1d1a   :  { %5259 = vpow2.f32 %v4192_v41 }
0x1d1e   :  { %v5254_v49 = vpop.eup %5253 }
0x1d1f   :  { %2770 = vrot.lane.b32.xlu0 %v5254_v49, %s5573_s0 }
0x1d22   :  { %v5256_v46 = vpop.eup %5255 }
0x1d23   :  { %2877 = vrot.lane.b32.xlu1 %v5256_v46, %s5573_s0  ;;  %v5258_v52 = vpop.eup %5257 }
0x1d24   :  { %v2761_v47 = vadd.f32 1.0, %v5258_v52  ;;  %v5260_v62 = vpop.eup %5259 }
0x1d25   :  { %v2868_v48 = vadd.f32 1.0, %v5260_v62 }
0x1d26   :  { %5261 = vrcp.f32 %v2761_v47 }
0x1d27   :  { %5263 = vrcp.f32 %v2868_v48 }
0x1d30   :  { %v5262_v50 = vpop.eup %5261 }
0x1d31   :  { %v5264_v54 = vpop.eup %5263  ;;  %v2768_v57 = vmul.f32 %v5262_v50, %v2766_v56 }
0x1d32   :  { %v2875_v2 = vmul.f32 %v5264_v54, %v2873_v60 }
0x1d91   :  { %v2771_v51 = vpop.permute.xlu0 %2770 }
0x1d92   :  { %v2773_v53 = vmul.f32 %v5262_v50, %v2771_v51 }
0x1d94   :  { %2775 = vrot.lane.b32.xlu0 %v2773_v53, %s5574_s23 }
0x1d95   :  { %v2878_v28 = vpop.permute.xlu1 %2877 }
0x1d96   :  { %v2880_v26 = vmul.f32 %v5264_v54, %v2878_v28 }
0x1d98   :  { %2882 = vrot.lane.b32.xlu1 %v2880_v26, %s5574_s23 }
0x1e06   :  { %v2776_v21 = vpop.permute.xlu0 %2775 }
0x1e07   :  { %v6268_v34 = vadd.f32 %v2776_v21, %v2768_v57 }
0x1e09   :  { %5265 = vtanh.f32 %v6268_v34  ;;  %v2980_v39 = vrot.slane %v6268_v34, 6 }
0x1e0a   :  { %v2883_v13 = vpop.permute.xlu1 %2882 }
0x1e0b   :  { %v6272_v3 = vadd.f32 %v2883_v13, %v2875_v2 }
0x1e0d   :  { %5267 = vtanh.f32 %v6272_v3  ;;  %v3084_v38 = vrot.slane %v6272_v3, 2 }
0x1e13   :  { %v5266_v4 = vpop.eup %5265 }
0x1e14   :  { %2781 = vrot.lane.b32.xlu0 %v5266_v4, %s5573_s0 }
0x1e17   :  { %v5268_v5 = vpop.eup %5267 }
0x1e18   :  { %2888 = vrot.lane.b32.xlu1 %v5268_v5, %s5573_s0 }
0x1e86   :  { %v2782_v10 = vpop.permute.xlu0 %2781 }
0x1e87   :  { %v2784_v11 = vmul.f32 %v5262_v50, %v2782_v10 }
0x1e89   :  { %v2893_v14 = vrot.slane %v2784_v11, 4 }
0x1e8a   :  { %v2889_v15 = vpop.permute.xlu1 %2888 }
0x1e8b   :  { %2894 = vrot.lane.b32.xlu0 %v2893_v14, %s5574_s23  ;;  %v2891_v17 = vmul.f32 %v5264_v54, %v2889_v15 }
0x1e8d   :  { %v3000_v18 = vrot.slane %v2891_v17, 2 }
0x1e8f   :  { %3001 = vrot.lane.b32.xlu1 %v3000_v18, %s5574_s23 }
0x1efd   :  { %v2895_v20 = vpop.permute.xlu0 %2894 }
0x1efe   :  { %4705 = vmatmul.mubr.msk.f32.vlgmr.msra.gmra.mrb[22].mxu0 %vm208_vm1, %v2895_v20 }
0x1eff   :  { %5006 = vmatpush3.bf16.msra.mxu0 %v6147_v55  ;;  %4726 = vmatprep.mubr.msk.f32.mxu0 %vm5570_vm0, %v5571_v1 }
0x1f00   :  { %5007 = vmatprep.subr.bf16.mxu0 %v5569_v0 }
0x1f01   :  { %v3002_v23 = vpop.permute.xlu1 %3001 }
0x1f02   :  { %4716 = vmatmul.mubr.msk.f32.vlgmr.msra.gmra.mrb[26].mxu1 %vm208_vm1, %v3002_v23 }
0x1f03   :  { %5009 = vmatpush3.bf16.msra.mxu0 %v6157_v9  ;;  %5012 = vmatpush3.bf16.msra.mxu1 %v6149_v6 }
0x1f04   :  { %4737 = vmatprep.mubr.msk.f32.mxu1 %vm5570_vm0, %v5571_v1  ;;  %5013 = vmatprep.subr.bf16.mxu1 %v5569_v0 }
0x1f05   :  { %5016 = vmatprep.subr.bf16.mxu0 %v5569_v0 }
0x1f07   :  { %5015 = vmatpush3.bf16.msra.mxu1 %v6159_v58 }
0x1f08   :  { %5022 = vmatprep.subr.bf16.mxu1 %v5569_v0 }
0x1fd1   :  { %v2964_v24 = vpop.f32.mrb[22].mxu0 }
0x1fd2   :  { %v2969_v25 = vrot.slane %v2964_v24, 2  ;;  %v4706_v27 = vpop.f32.mrb[23].mxu0 }
0x1fd4   :  { %v2971_v29 = vadd.f32 %v6195_v8, %v2969_v25 }
0x1fd5   :  { %v3071_v30 = vpop.f32.mrb[26].mxu1 }
0x1fd6   :  { %5269 = vtanh.f32 %v2971_v29  ;;  %v3075_v19 = vadd.f32 %v6197_v12, %v3071_v30  ;;  %v4717_v31 = vpop.f32.mrb[27].mxu1  ;;  %v4194_v35 = vmul.f32 -1.442695, %v2971_v29 }
0x1fd8   :  { %5271 = vtanh.f32 %v3075_v19  ;;  %v4196_v36 = vmul.f32 -1.442695, %v3075_v19 }
0x1fd9   :  { %5273 = vpow2.f32 %v4194_v35 }
0x1fda   :  { %5275 = vpow2.f32 %v4196_v36 }
0x1fe0   :  { %v5270_v32 = vpop.eup %5269 }
0x1fe1   :  { %2984 = vrot.lane.b32.xlu0 %v5270_v32, %s5573_s0 }
0x1fe2   :  { %v5272_v33 = vpop.eup %5271 }
0x1fe3   :  { %3088 = vrot.lane.b32.xlu1 %v5272_v33, %s5573_s0  ;;  %v5274_v37 = vpop.eup %5273 }
0x1fe4   :  { %v5276_v40 = vpop.eup %5275  ;;  %v2975_v61 = vadd.f32 1.0, %v5274_v37 }
0x1fe5   :  { %v3079_v8 = vadd.f32 1.0, %v5276_v40 }
0x1fe6   :  { %5277 = vrcp.f32 %v2975_v61 }
0x1fe7   :  { %5279 = vrcp.f32 %v3079_v8 }
0x1ff0   :  { %v5278_v42 = vpop.eup %5277 }
0x1ff1   :  { %v5280_v59 = vpop.eup %5279  ;;  %v2982_v22 = vmul.f32 %v5278_v42, %v2980_v39 }
0x1ff2   :  { %v3086_v63 = vmul.f32 %v5280_v59, %v3084_v38 }
0x2053   :  { %v2985_v12 = vpop.permute.xlu0 %2984 }
0x2054   :  { %v2987_v43 = vmul.f32 %v5278_v42, %v2985_v12 }
0x2055   :  { %v3089_v44 = vpop.permute.xlu1 %3088 }
0x2056   :  { %2989 = vrot.lane.b32.xlu0 %v2987_v43, %s5574_s23  ;;  %v3091_v45 = vmul.f32 %v5280_v59, %v3089_v44 }
0x2058   :  { %3093 = vrot.lane.b32.xlu1 %v3091_v45, %s5574_s23 }
0x20c8   :  { %v2990_v49 = vpop.permute.xlu0 %2989 }
0x20c9   :  { %v6301_v46 = vadd.f32 %v2990_v49, %v2982_v22 }
0x20ca   :  { %v3094_v41 = vpop.permute.xlu1 %3093 }
0x20cb   :  { %5281 = vtanh.f32 %v6301_v46  ;;  %v6304_v52 = vadd.f32 %v3094_v41, %v3086_v63  ;;  %v3188_v29 = vrot.slane %v6301_v46, 6 }
0x20cd   :  { %5283 = vtanh.f32 %v6304_v52  ;;  %v3294_v19 = vrot.slane %v6304_v52, 2 }
0x20d5   :  { %v5282_v47 = vpop.eup %5281 }
0x20d6   :  { %2995 = vrot.lane.b32.xlu0 %v5282_v47, %s5573_s0 }
0x20d7   :  { %v5284_v62 = vpop.eup %5283 }
0x20d8   :  { %3099 = vrot.lane.b32.xlu1 %v5284_v62, %s5573_s0 }
0x2148   :  { %v2996_v48 = vpop.permute.xlu0 %2995 }
0x2149   :  { %v2998_v50 = vmul.f32 %v5278_v42, %v2996_v48 }
0x214a   :  { %v3100_v53 = vpop.permute.xlu1 %3099 }
0x214b   :  { %v3104_v51 = vrot.slane %v2998_v50, 6  ;;  %v3102_v54 = vmul.f32 %v5280_v59, %v3100_v53 }
0x214d   :  { %3105 = vrot.lane.b32.xlu0 %v3104_v51, %s5574_s23  ;;  %3208 = vrot.lane.b32.xlu1 %v3102_v54, %s5574_s23 }
0x21bf   :  { %v3106_v28 = vpop.permute.xlu0 %3105  ;;  %v3209_v26 = vpop.permute.xlu1 %3208 }
0x21c0   :  { %4727 = vmatmul.mubr.msk.f32.vlgmr.msra.gmra.mrb[24].mxu0 %vm208_vm1, %v3106_v28  ;;  %4738 = vmatmul.mubr.msk.f32.vlgmr.msra.gmra.mrb[28].mxu1 %vm208_vm1, %v3209_v26 }
0x21c1   :  { %5018 = vmatpush3.bf16.msra.mxu0 %v6147_v55  ;;  %5024 = vmatpush3.bf16.msra.mxu1 %v6149_v6 }
0x21c2   :  { %5019 = vmatprep.subr.bf16.mxu0 %v5569_v0  ;;  %4748 = vmatprep.mubr.msk.f32.mxu0 %vm5570_vm0, %v5571_v1 }
0x21c3   :  { %5025 = vmatprep.subr.bf16.mxu1 %v5569_v0  ;;  %4759 = vmatprep.mubr.msk.f32.mxu1 %vm5570_vm0, %v5571_v1 }
0x21c5   :  { %5021 = vmatpush3.bf16.msra.mxu0 %v6157_v9  ;;  %5027 = vmatpush3.bf16.msra.mxu1 %v6159_v58 }
0x21c6   :  { %5028 = vmatprep.subr.bf16.mxu0 %v5569_v0  ;;  %5034 = vmatprep.subr.bf16.mxu1 %v5569_v0 }
0x2293   :  { %v3175_v56 = vpop.f32.mrb[24].mxu0  ;;  %v3278_v21 = vpop.f32.mrb[28].mxu1 }
0x2294   :  { %v3179_v57 = vadd.f32 %v6191_v16, %v3175_v56  ;;  %v4728_v34 = vpop.f32.mrb[25].mxu0  ;;  %v3283_v60 = vrot.slane %v3278_v21, 2  ;;  %v4739_v2 = vpop.f32.mrb[29].mxu1 }
0x2296   :  { %5285 = vtanh.f32 %v3179_v57  ;;  %v3285_v13 = vadd.f32 %v6193_v7, %v3283_v60  ;;  %v4198_v5 = vmul.f32 -1.442695, %v3179_v57 }
0x2298   :  { %5287 = vtanh.f32 %v3285_v13  ;;  %v4200_v10 = vmul.f32 -1.442695, %v3285_v13 }
0x2299   :  { %5289 = vpow2.f32 %v4198_v5 }
0x229a   :  { %5291 = vpow2.f32 %v4200_v10 }
0x22a0   :  { %v5286_v3 = vpop.eup %5285 }
0x22a1   :  { %3192 = vrot.lane.b32.xlu0 %v5286_v3, %s5573_s0 }
0x22a2   :  { %v5288_v4 = vpop.eup %5287 }
0x22a3   :  { %3298 = vrot.lane.b32.xlu1 %v5288_v4, %s5573_s0  ;;  %v5290_v11 = vpop.eup %5289 }
0x22a4   :  { %v5292_v14 = vpop.eup %5291  ;;  %v3183_v15 = vadd.f32 1.0, %v5290_v11 }
0x22a5   :  { %v3289_v17 = vadd.f32 1.0, %v5292_v14 }
0x22a6   :  { %5293 = vrcp.f32 %v3183_v15 }
0x22a7   :  { %5295 = vrcp.f32 %v3289_v17 }
0x22b0   :  { %v5294_v18 = vpop.eup %5293 }
0x22b1   :  { %v5296_v24 = vpop.eup %5295  ;;  %v3190_v30 = vmul.f32 %v5294_v18, %v3188_v29 }
0x22b2   :  { %v3296_v33 = vmul.f32 %v5296_v24, %v3294_v19 }
0x2313   :  { %v3193_v20 = vpop.permute.xlu0 %3192 }
0x2314   :  { %v3195_v23 = vmul.f32 %v5294_v18, %v3193_v20 }
0x2315   :  { %v3299_v25 = vpop.permute.xlu1 %3298 }
0x2316   :  { %3197 = vrot.lane.b32.xlu0 %v3195_v23, %s5574_s23  ;;  %v3301_v27 = vmul.f32 %v5296_v24, %v3299_v25 }
0x2318   :  { %3303 = vrot.lane.b32.xlu1 %v3301_v27, %s5574_s23 }
0x2388   :  { %v3198_v31 = vpop.permute.xlu0 %3197 }
0x2389   :  { %v6333_v32 = vadd.f32 %v3198_v31, %v3190_v30 }
0x238a   :  { %v3304_v35 = vpop.permute.xlu1 %3303 }
0x238b   :  { %5297 = vtanh.f32 %v6333_v32  ;;  %v6336_v36 = vadd.f32 %v3304_v35, %v3296_v33  ;;  %v3400_v60 = vrot.slane %v6333_v32, 6 }
0x238d   :  { %5299 = vtanh.f32 %v6336_v36  ;;  %v3507_v4 = vrot.slane %v6336_v36, 2 }
0x2395   :  { %v5298_v37 = vpop.eup %5297 }
0x2396   :  { %3203 = vrot.lane.b32.xlu0 %v5298_v37, %s5573_s0 }
0x2397   :  { %v5300_v40 = vpop.eup %5299 }
0x2398   :  { %3309 = vrot.lane.b32.xlu1 %v5300_v40, %s5573_s0 }
0x2408   :  { %v3204_v61 = vpop.permute.xlu0 %3203 }
0x2409   :  { %v3206_v8 = vmul.f32 %v5294_v18, %v3204_v61 }
0x240a   :  { %v3310_v42 = vpop.permute.xlu1 %3309 }
0x240b   :  { %3314 = vrot.lane.b32.xlu0 %v3206_v8, %s5574_s23  ;;  %v3312_v12 = vmul.f32 %v5296_v24, %v3310_v42 }
0x240d   :  { %v3420_v43 = vrot.slane %v3312_v12, 6 }
0x240f   :  { %3421 = vrot.lane.b32.xlu1 %v3420_v43, %s5574_s23 }
0x247d   :  { %v3315_v59 = vpop.permute.xlu0 %3314 }
0x247e   :  { %4749 = vmatmul.mubr.msk.f32.vlgmr.msra.gmra.mrb[26].mxu0 %vm208_vm1, %v3315_v59 }
0x247f   :  { %5030 = vmatpush3.bf16.msra.mxu0 %v6147_v55  ;;  %4770 = vmatprep.mubr.msk.f32.mxu0 %vm5570_vm0, %v5571_v1 }
0x2480   :  { %5031 = vmatprep.subr.bf16.mxu0 %v5569_v0 }
0x2481   :  { %v3422_v44 = vpop.permute.xlu1 %3421 }
0x2482   :  { %4760 = vmatmul.mubr.msk.f32.vlgmr.msra.gmra.mrb[30].mxu1 %vm208_vm1, %v3422_v44 }
0x2483   :  { %5033 = vmatpush3.bf16.msra.mxu0 %v6157_v9  ;;  %5036 = vmatpush3.bf16.msra.mxu1 %v6149_v6 }
0x2484   :  { %4781 = vmatprep.mubr.msk.f32.mxu1 %vm5570_vm0, %v5571_v1  ;;  %5037 = vmatprep.subr.bf16.mxu1 %v5569_v0 }
0x2485   :  { %5040 = vmatprep.subr.bf16.mxu0 %v5569_v0 }
0x2487   :  { %5039 = vmatpush3.bf16.msra.mxu1 %v6159_v58 }
0x2488   :  { %5046 = vmatprep.subr.bf16.mxu1 %v5569_v0 }
0x2551   :  { %v3384_v45 = vpop.f32.mrb[26].mxu0 }
0x2552   :  { %v3389_v39 = vrot.slane %v3384_v45, 6  ;;  %v4750_v22 = vpop.f32.mrb[27].mxu0 }
0x2554   :  { %v3391_v38 = vadd.f32 %v6191_v16, %v3389_v39 }
0x2555   :  { %v3491_v49 = vpop.f32.mrb[30].mxu1 }
0x2556   :  { %5301 = vtanh.f32 %v3391_v38  ;;  %v3496_v46 = vrot.slane %v3491_v49, 4  ;;  %v4761_v63 = vpop.f32.mrb[31].mxu1  ;;  %v4202_v62 = vmul.f32 -1.442695, %v3391_v38 }
0x2558   :  { %v3498_v41 = vadd.f32 %v6193_v7, %v3496_v46 }
0x255a   :  { %5303 = vtanh.f32 %v3498_v41  ;;  %v4204_v48 = vmul.f32 -1.442695, %v3498_v41 }
0x255b   :  { %5305 = vpow2.f32 %v4202_v62 }
0x255c   :  { %5307 = vpow2.f32 %v4204_v48 }
0x2560   :  { %v5302_v52 = vpop.eup %5301 }
0x2561   :  { %3404 = vrot.lane.b32.xlu0 %v5302_v52, %s5573_s0 }
0x2564   :  { %v5304_v47 = vpop.eup %5303 }
0x2565   :  { %3511 = vrot.lane.b32.xlu1 %v5304_v47, %s5573_s0  ;;  %v5306_v50 = vpop.eup %5305 }
0x2566   :  { %v3395_v51 = vadd.f32 1.0, %v5306_v50  ;;  %v5308_v53 = vpop.eup %5307 }
0x2567   :  { %v3502_v54 = vadd.f32 1.0, %v5308_v53 }
0x2568   :  { %5309 = vrcp.f32 %v3395_v51 }
0x2569   :  { %5311 = vrcp.f32 %v3502_v54 }
0x2572   :  { %v5310_v28 = vpop.eup %5309 }
0x2573   :  { %v5312_v57 = vpop.eup %5311  ;;  %v3402_v2 = vmul.f32 %v5310_v28, %v3400_v60 }
0x2574   :  { %v3509_v5 = vmul.f32 %v5312_v57, %v3507_v4 }
0x25d3   :  { %v3405_v26 = vpop.permute.xlu0 %3404 }
0x25d4   :  { %v3407_v56 = vmul.f32 %v5310_v28, %v3405_v26 }
0x25d6   :  { %3409 = vrot.lane.b32.xlu0 %v3407_v56, %s5574_s23 }
0x25d7   :  { %v3512_v21 = vpop.permute.xlu1 %3511 }
0x25d8   :  { %v3514_v34 = vmul.f32 %v5312_v57, %v3512_v21 }
0x25da   :  { %3516 = vrot.lane.b32.xlu1 %v3514_v34, %s5574_s23 }
0x2648   :  { %v3410_v13 = vpop.permute.xlu0 %3409 }
0x2649   :  { %v6364_v3 = vadd.f32 %v3410_v13, %v3402_v2 }
0x264b   :  { %5313 = vtanh.f32 %v6364_v3  ;;  %v3614_v22 = vrot.slane %v6364_v3, 6 }
0x264c   :  { %v3517_v10 = vpop.permute.xlu1 %3516 }
0x264d   :  { %v6368_v11 = vadd.f32 %v3517_v10, %v3509_v5 }
0x264f   :  { %5315 = vtanh.f32 %v6368_v11  ;;  %v3721_v63 = vrot.slane %v6368_v11, 2 }
0x2655   :  { %v5314_v14 = vpop.eup %5313 }
0x2656   :  { %3415 = vrot.lane.b32.xlu0 %v5314_v14, %s5573_s0 }
0x2659   :  { %v5316_v15 = vpop.eup %5315 }
0x265a   :  { %3522 = vrot.lane.b32.xlu1 %v5316_v15, %s5573_s0 }
0x26c8   :  { %v3416_v17 = vpop.permute.xlu0 %3415 }
0x26c9   :  { %v3418_v18 = vmul.f32 %v5310_v28, %v3416_v17 }
0x26cb   :  { %v3527_v20 = vrot.slane %v3418_v18, 2 }
0x26cc   :  { %v3523_v23 = vpop.permute.xlu1 %3522 }
0x26cd   :  { %3528 = vrot.lane.b32.xlu0 %v3527_v20, %s5574_s23  ;;  %v3525_v24 = vmul.f32 %v5312_v57, %v3523_v23 }
0x26cf   :  { %v3634_v25 = vrot.slane %v3525_v24, 4 }
0x26d1   :  { %3635 = vrot.lane.b32.xlu1 %v3634_v25, %s5574_s23 }
0x273f   :  { %v3529_v27 = vpop.permute.xlu0 %3528 }
0x2740   :  { %4771 = vmatmul.mubr.msk.f32.vlgmr.msra.gmra.mrb[28].mxu0 %vm208_vm1, %v3529_v27 }
0x2741   :  { %5042 = vmatpush3.bf16.msra.mxu0 %v6147_v55  ;;  %4792 = vmatprep.mubr.msk.f32.mxu0 %vm5570_vm0, %v5571_v1 }
0x2742   :  { %5043 = vmatprep.subr.bf16.mxu0 %v5569_v0 }
0x2743   :  { %v3636_v29 = vpop.permute.xlu1 %3635 }
0x2744   :  { %4782 = vmatmul.mubr.msk.f32.vlgmr.msra.gmra.mrb[32].mxu1 %vm208_vm1, %v3636_v29 }
0x2745   :  { %5045 = vmatpush3.bf16.msra.mxu0 %v6157_v9  ;;  %5048 = vmatpush3.bf16.msra.mxu1 %v6149_v6 }
0x2746   :  { %4803 = vmatprep.mubr.msk.f32.mxu1 %vm5570_vm0, %v5571_v1  ;;  %5049 = vmatprep.subr.bf16.mxu1 %v5569_v0 }
0x2747   :  { %5052 = vmatprep.subr.bf16.mxu0 %v5569_v0 }
0x2749   :  { %5051 = vmatpush3.bf16.msra.mxu1 %v6159_v58 }
0x2813   :  { %v3598_v55 = vpop.f32.mrb[28].mxu0 }
0x2814   :  { %v3603_v30 = vrot.slane %v3598_v55, 4  ;;  %v4772_v19 = vpop.f32.mrb[29].mxu0 }
0x2816   :  { %v3605_v31 = vadd.f32 %v6191_v16, %v3603_v30 }
0x2817   :  { %v3705_v32 = vpop.f32.mrb[32].mxu1 }
0x2818   :  { %5317 = vtanh.f32 %v3605_v31  ;;  %v3710_v33 = vrot.slane %v3705_v32, 6  ;;  %v4783_v9 = vpop.f32.mrb[33].mxu1  ;;  %v4206_v37 = vmul.f32 -1.442695, %v3605_v31 }
0x281a   :  { %v3712_v6 = vadd.f32 %v6193_v7, %v3710_v33 }
0x281c   :  { %5319 = vtanh.f32 %v3712_v6  ;;  %v4208_v58 = vmul.f32 -1.442695, %v3712_v6  ;;  %v3951_v6 = vld [vmem:[%s6473_s13] sm:$0xff] }
0x281d   :  { %5321 = vpow2.f32 %v4206_v37 }
0x281e   :  { %5323 = vpow2.f32 %v4208_v58  ;;  %v3954_v58 = vld [vmem:[%s6473_s13 + $0x18] sm:$0xff] }
0x2822   :  { %v5318_v35 = vpop.eup %5317 }
0x2823   :  { %3618 = vrot.lane.b32.xlu0 %v5318_v35, %s5573_s0  ;;  %v3952_v35 = vld [vmem:[%s6473_s13 + $0x8] sm:$0xff] }
0x2824   :  { %v5053_v37 = vpack.c.bf16 %v3952_v35, %v3951_v6 }
0x2826   :  { %v5320_v36 = vpop.eup %5319 }
0x2827   :  { %3725 = vrot.lane.b32.xlu1 %v5320_v36, %s5573_s0  ;;  %v5322_v40 = vpop.eup %5321  ;;  %v3953_v36 = vld [vmem:[%s6473_s13 + $0x10] sm:$0xff] }
0x2828   :  { %v3609_v61 = vadd.f32 1.0, %v5322_v40  ;;  %v5324_v8 = vpop.eup %5323  ;;  %v5056_v40 = vpack.c.bf16 %v3954_v58, %v3953_v36 }
0x2829   :  { %v3716_v42 = vadd.f32 1.0, %v5324_v8 }
0x282a   :  { %5325 = vrcp.f32 %v3609_v61 }
0x282b   :  { %5327 = vrcp.f32 %v3716_v42 }
0x2834   :  { %v5326_v12 = vpop.eup %5325 }
0x2835   :  { %v5328_v44 = vpop.eup %5327  ;;  %v3616_v38 = vmul.f32 %v5326_v12, %v3614_v22 }
0x2836   :  { %v3723_v41 = vmul.f32 %v5328_v44, %v3721_v63 }
0x2895   :  { %v3619_v43 = vpop.permute.xlu0 %3618 }
0x2896   :  { %v3621_v59 = vmul.f32 %v5326_v12, %v3619_v43 }
0x2898   :  { %3623 = vrot.lane.b32.xlu0 %v3621_v59, %s5574_s23 }
0x2899   :  { %v3726_v45 = vpop.permute.xlu1 %3725 }
0x289a   :  { %v3728_v39 = vmul.f32 %v5328_v44, %v3726_v45  ;;  %v4038_v45 = vld [vmem:[%s6473_s13 + $0x20] sm:$0xff] }
0x289c   :  { %3730 = vrot.lane.b32.xlu1 %v3728_v39, %s5574_s23  ;;  %v4039_v39 = vld [vmem:[%s6473_s13 + $0x28] sm:$0xff] }
0x289d   :  { %v5059_v22 = vpack.c.bf16 %v4039_v39, %v4038_v45 }
0x290a   :  { %v3624_v49 = vpop.permute.xlu0 %3623 }
0x290b   :  { %v3626_v46 = vadd.f32 %v3624_v49, %v3616_v38  ;;  %v4040_v38 = vld [vmem:[%s6473_s13 + $0x30] sm:$0xff]  ;;  %v4041_v49 = vld [vmem:[%s6473_s13 + $0x38] sm:$0xff]  ;;  %s4126_s13 = sshll.u32 %s5575_s24, 4  ;;  %s4127_s13 = int_to_ptr.vmem [resolvable:$true] %s4126_s13 }
0x290c   :  { %v5062_v63 = vpack.c.bf16 %v4041_v49, %v4040_v38  ;;  %s5525_s6 = scalar_lea.vmem %s4127_s13, 32  ;;  %p5530_p9 = scmp.lt.s32.totalorder %s4127_s13, %s4127_s13 }
0x290d   :  { %5329 = vtanh.f32 %v3626_v46  ;;  %v3828_v29 = vrot.slane %v3626_v46, 6  ;;  %p5526_p8 = scmp.ne.s32.totalorder %s4127_s13, %s5525_s6  ;;  %p5531_p10 = scmp.lt.s32.totalorder %s5525_s6, %s5525_s6 }
0x290e   :  { %v3731_v52 = vpop.permute.xlu1 %3730 }
0x290f   :  { %v3733_v47 = vadd.f32 %v3731_v52, %v3723_v41  ;;  %v4213_v52 = vld [vmem:[%s6474_s14] ss:$0 sm:$0xff]  ;;  %p5532_p11 = por %p5531_p10, %p5530_p9 }
0x2911   :  { %5331 = vtanh.f32 %v3733_v47  ;;  %v3932_v30 = vrot.slane %v3733_v47, 2  ;;  %p5533_p12 = pnand %p5532_p11, %p5526_p8 }
0x2917   :  { %v5330_v62 = vpop.eup %5329 }
0x2918   :  { %3629 = vrot.lane.b32.xlu0 %v5330_v62, %s5573_s0 }
0x291b   :  { %v5332_v48 = vpop.eup %5331 }
0x291c   :  { %3736 = vrot.lane.b32.xlu1 %v5332_v48, %s5573_s0 }
0x298a   :  { %v3630_v50 = vpop.permute.xlu0 %3629 }
0x298b   :  { %v3632_v51 = vmul.f32 %v5326_v12, %v3630_v50 }
0x298d   :  { %v3741_v53 = vrot.slane %v3632_v51, 4 }
0x298e   :  { %v3737_v54 = vpop.permute.xlu1 %3736 }
0x298f   :  { %3742 = vrot.lane.b32.xlu0 %v3741_v53, %s5574_s23  ;;  %v3739_v28 = vmul.f32 %v5328_v44, %v3737_v54 }
0x2991   :  { %v3848_v26 = vrot.slane %v3739_v28, 2 }
0x2993   :  { %3849 = vrot.lane.b32.xlu1 %v3848_v26, %s5574_s23 }
0x2a01   :  { %v3743_v56 = vpop.permute.xlu0 %3742 }
0x2a02   :  { %4793 = vmatmul.mubr.msk.f32.vlgmr.msra.gmra.mrb[30].mxu0 %vm208_vm1, %v3743_v56 }
0x2a03   :  { %4814 = vmatprep.mubr.msk.f32.mxu0 %vm5570_vm0, %v5571_v1  ;;  %5054 = vmatpush3.bf16.msra.mxu0 %v5053_v37 }
0x2a04   :  { %5055 = vmatprep.subr.bf16.mxu0 %v5569_v0 }
0x2a05   :  { %v3850_v57 = vpop.permute.xlu1 %3849 }
0x2a06   :  { %4804 = vmatmul.mubr.msk.f32.vlgmr.msra.gmra.mrb[34].mxu1 %vm208_vm1, %v3850_v57 }
0x2a07   :  { %5057 = vmatpush3.bf16.msra.mxu0 %v5056_v40 }
0x2a08   :  { %5058 = vmatprep.subr.bf16.mxu0 %v5569_v0 }
0x2ad5   :  { %v3812_v21 = vpop.f32.mrb[30].mxu0 }
0x2ad6   :  { %v3817_v34 = vrot.slane %v3812_v21, 2  ;;  %v4794_v60 = vpop.f32.mrb[31].mxu0 }
0x2ad8   :  { %v3819_v2 = vadd.f32 %v6191_v16, %v3817_v34 }
0x2ad9   :  { %v3919_v13 = vpop.f32.mrb[34].mxu1 }
0x2ada   :  { %5333 = vtanh.f32 %v3819_v2  ;;  %v3923_v3 = vadd.f32 %v6193_v7, %v3919_v13  ;;  %v4805_v4 = vpop.f32.mrb[35].mxu1  ;;  %v4210_v11 = vmul.f32 -1.442695, %v3819_v2 }
0x2adc   :  { %5335 = vtanh.f32 %v3923_v3  ;;  %v4212_v14 = vmul.f32 -1.442695, %v3923_v3 }
0x2add   :  { %5337 = vpow2.f32 %v4210_v11 }
0x2ade   :  { %5339 = vpow2.f32 %v4212_v14 }
0x2ae4   :  { %v5334_v5 = vpop.eup %5333 }
0x2ae5   :  { %3832 = vrot.lane.b32.xlu0 %v5334_v5, %s5573_s0 }
0x2ae6   :  { %v5336_v10 = vpop.eup %5335 }
0x2ae7   :  { %3936 = vrot.lane.b32.xlu1 %v5336_v10, %s5573_s0  ;;  %v5338_v15 = vpop.eup %5337 }
0x2ae8   :  { %v5340_v17 = vpop.eup %5339  ;;  %v3823_v18 = vadd.f32 1.0, %v5338_v15 }
0x2ae9   :  { %v3927_v16 = vadd.f32 1.0, %v5340_v17 }
0x2aea   :  { %5341 = vrcp.f32 %v3823_v18 }
0x2aeb   :  { %5343 = vrcp.f32 %v3927_v16 }
0x2af4   :  { %v5342_v20 = vpop.eup %5341 }
0x2af5   :  { %v5344_v24 = vpop.eup %5343  ;;  %v3830_v55 = vmul.f32 %v5342_v20, %v3828_v29 }
0x2af6   :  { %v3934_v32 = vmul.f32 %v5344_v24, %v3932_v30 }
0x2b57   :  { %v3833_v7 = vpop.permute.xlu0 %3832 }
0x2b58   :  { %v3835_v23 = vmul.f32 %v5342_v20, %v3833_v7 }
0x2b59   :  { %v3937_v25 = vpop.permute.xlu1 %3936 }
0x2b5a   :  { %3837 = vrot.lane.b32.xlu0 %v3835_v23, %s5574_s23  ;;  %v3939_v27 = vmul.f32 %v5344_v24, %v3937_v25 }
0x2b5c   :  { %3941 = vrot.lane.b32.xlu1 %v3939_v27, %s5574_s23 }
0x2bcc   :  { %v3838_v19 = vpop.permute.xlu0 %3837 }
0x2bcd   :  { %v3840_v31 = vadd.f32 %v3838_v19, %v3830_v55 }
0x2bce   :  { %v3942_v33 = vpop.permute.xlu1 %3941 }
0x2bcf   :  { %5345 = vtanh.f32 %v3840_v31  ;;  %v3944_v9 = vadd.f32 %v3942_v33, %v3934_v32 }
0x2bd1   :  { %5347 = vtanh.f32 %v3944_v9 }
0x2bd9   :  { %v5346_v61 = vpop.eup %5345 }
0x2bda   :  { %3843 = vrot.lane.b32.xlu0 %v5346_v61, %s5573_s0 }
0x2bdb   :  { %v5348_v8 = vpop.eup %5347 }
0x2bdc   :  { %3947 = vrot.lane.b32.xlu1 %v5348_v8, %s5573_s0 }
0x2c4c   :  { %v3844_v42 = vpop.permute.xlu0 %3843 }
0x2c4d   :  { %v3846_v12 = vmul.f32 %v5342_v20, %v3844_v42 }
0x2c4e   :  { %v3948_v59 = vpop.permute.xlu1 %3947 }
0x2c4f   :  { %v3963_v43 = vrot.slane %v3846_v12, 6  ;;  %v3950_v44 = vmul.f32 %v5344_v24, %v3948_v59 }
0x2c51   :  { %3964 = vrot.lane.b32.xlu0 %v3963_v43, %s5574_s23  ;;  %4043 = vrot.lane.b32.xlu1 %v3950_v44, %s5574_s23 }
0x2cc3   :  { %v3965_v46 = vpop.permute.xlu0 %3964  ;;  %v4044_v41 = vpop.permute.xlu1 %4043 }
0x2cc4   :  { %4815 = vmatmul.mubr.msk.f32.vlgmr.msra.gmra.mrb[32].mxu0 %vm208_vm1, %v3965_v46 }
0x2cc5   :  { %5060 = vmatpush3.bf16.msra.mxu0 %v5059_v22  ;;  %4825 = vmatprep.mubr.msk.f32.mxu0 %vm5570_vm0, %v5571_v1 }
0x2cc6   :  { %5061 = vmatprep.subr.bf16.mxu0 %v5569_v0 }
0x2cc9   :  { %5063 = vmatpush3.bf16.msra.mxu0 %v5062_v63 }
0x2ccc   :  { %4826 = vmatmul.mubr.msk.f32.vlgmr.msra.gmra.mrb[32].mxu0 %vm208_vm1, %v4044_v41 }
0x2d9f   :  { %v4113_v47 = vpop.f32.mrb[32].mxu0 }
0x2da0   :  { %v5068_v62 = vadd.f32 %v4213_v52, %v4113_v47  ;;  %v4827_v48 = vpop.f32.mrb[33].mxu0 }
0x2da2   :  { %4119 = vst.msk [vmem:[#allocation16] sm:$0x3] %vm4118_vm5, %v5068_v62 }
0x2da3   :  { %5536 = shalt.err (!%p5533_p12)
}
0x2da4   :  { %s6478_s25 = sld [smem:[#allocation23_spill]] }
0x2daa   :  { %s5537_s27 = scalar_lea.hbm %s6478_s25, 32 }
0x2dab   :  { %p5538_p13 = scmp.ne.s32.totalorder %s6478_s25, %s5537_s27  ;;  %p5541_p0 = scmp.lt.u32.totalorder %s5537_s27, %s6478_s25 }
0x2dad   :  { %p5543_p1 = pnand %p5541_p0, %p5538_p13 }
0x2daf   :  { %5546 = shalt.err (!%p5543_p1)
}
0x2db0   :  { %4129 = dma.vmem_to_hbm [thread:$0]  %s4127_s13, 32, %s6478_s25, [#allocation4]  }
0x2db1   :  { %5557 = dma.done.wait [#allocation4], 32  }
0x2db2   :  { %5558 = vsyncadd [#allocation4], 4294967264 }
0x2db3   :  { %4133 = vsyncpa [#allocation3], 1 }
0x2db4   :  { %4134 = vsyncpa [#allocation6], 1 }
0x2db5   :  { %4135 = vsyncpa [#allocation9], 1 }
0x2db6   :  { %4136 = vsyncpa [#allocation12], 1 }
0x2db7   :  { %4137 = vsyncpa [#allocation15], 1 }
0x2db8   :  { %4138 = vsyncpa [#allocation4], 1 }

</bundles_post_ra>
